<compile_context>
chip_gen: v5e
topology: v5e:2x2
jax: 0.10.0
libtpu: 0.0.40
codegen_flags: <defaults>
</compile_context>

<pallas_src>
import functools

import jax
import jax.numpy as jnp
from jax.experimental import pallas as pl
from jax.experimental.pallas import tpu as pltpu


def _round_up(a, m):
    return ((a + m - 1) // m) * m


def _silu_dtype():
    """bf16 SiLU on v6e/v7x (bf16 VPU/EUP path); f32 on v5e and older (no bf16 vector path)."""
    try:
        kind = jax.devices()[0].device_kind.lower()
    except Exception:
        return jnp.float32
    if "v6" in kind or "v7" in kind:
        return jnp.bfloat16
    return jnp.float32


def _mtl_kernel(x_ref, w1_ref, b1_ref, wh_ref, bh_ref, out_ref, acc_ref, *,
                inv_hw, hw, silu_dtype):
    # x_ref  : (NB, TS, Cin) bf16  -- NB batch elements x TS spatial rows, channels on lanes
    # w1_ref : (Cin, F)  bf16      -- stand-in 1x1 conv weight
    # b1_ref : (1, F)    f32       -- stand-in conv bias
    # wh_ref : (F, NH_PAD) bf16    -- fused [domain | category | zero-pad] head weights (W^T)
    # bh_ref : (1, NH_PAD) f32     -- fused head biases
    # out_ref: (NB, NH_PAD) f32    -- lane-dense fused logits block for this batch-block
    # acc_ref: (NB, F) f32 VMEM    -- running spatial SUM of SiLU features
    s = pl.program_id(1)
    nb, ts, cin = x_ref.shape
    f = w1_ref.shape[1]

    @pl.when(s == 0)
    def _init():
        acc_ref[...] = jnp.zeros_like(acc_ref)

    # Stand-in backbone: one flat (NB*TS, Cin) @ (Cin, F) MXU matmul (bf16 in, f32 acc) + bias.
    x2 = x_ref[...].reshape(nb * ts, cin)
    feat = jnp.dot(x2, w1_ref[...], preferred_element_type=jnp.float32) + b1_ref[...]

    # SiLU: bf16 on v6e/v7x (bf16 EUP/VPU), f32 on v5e.  The spatial sum stays in f32.
    h = feat.astype(silu_dtype)
    feat = (h * jax.nn.sigmoid(h)).astype(jnp.float32)

    feat3 = feat.reshape(nb, ts, f)
    if hw % ts != 0:
        # Ragged spatial extent (e.g. 7x7 -> HW=49): zero-padded rows would contribute
        # SiLU(b1) != 0 to the pooled sum, so mask them out of the reduction.
        row = jax.lax.broadcasted_iota(jnp.int32, (ts, 1), 0)
        valid = (s * ts + row) < hw
        feat3 = jnp.where(valid[None, :, :], feat3, 0.0)

    acc_ref[...] += jnp.sum(feat3, axis=1)                       # (NB, F) f32

    @pl.when(s == pl.num_programs(1) - 1)
    def _finalize():
        # AdaptiveAvgPool2d((1,1)) + flatten == spatial mean; fold the 1/HW scale in here.
        pooled = (acc_ref[...] * inv_hw).astype(jnp.bfloat16)    # (NB, F)
        # Fused heads: one batched (NB, F) @ (F, NH_PAD) MXU matmul -> full (8,128) store.
        out_ref[...] = (jnp.dot(pooled, wh_ref[...], preferred_element_type=jnp.float32)
                        + bh_ref[...])


def multitask_forward(x, params, *, spatial_tile=512, batch_tile=8, channels_last=False):
    """x: (B, Cin, H, W) f32 (PyTorch NCHW), or (B, H, W, Cin) if channels_last=True.
    Returns (domain_preds (B, 4), category_preds (B, 65))."""
    w1, b1, wd, bd, wc, bc = (params["w1"], params["b1"], params["wd"],
                              params["bd"], params["wc"], params["bc"])
    if channels_last:
        B, H, W, Cin = x.shape
        x3 = x.reshape(B, H * W, Cin)
    else:
        B, Cin, H, W = x.shape
        # TODO(synk): this NCHW->NHWC transpose + cast is an extra HBM pass before the kernel;
        # feed NHWC (channels_last=True) or fuse the layout change upstream to avoid it.
        x3 = jnp.transpose(x, (0, 2, 3, 1)).reshape(B, H * W, Cin)
    HW = H * W
    F = w1.shape[1]
    ND = wd.shape[1]
    NC = wc.shape[1]
    NH = ND + NC
    NH_PAD = _round_up(NH, 128)                      # lane-dense fused head width

    # Tiling: NB batch elements x TS spatial rows per grid step.
    NB = _round_up(max(1, batch_tile), 8)            # multiple of 8 -> full-sublane output store
    TS = min(_round_up(spatial_tile, 8), _round_up(HW, 8))
    HW_pad = _round_up(HW, TS)
    B_pad = _round_up(B, NB)
    n_b = B_pad // NB
    n_s = HW_pad // TS

    x3 = x3.astype(jnp.bfloat16)
    if B_pad != B or HW_pad != HW:
        x3 = jnp.pad(x3, ((0, B_pad - B), (0, HW_pad - HW), (0, 0)))

    w1_bf = w1.astype(jnp.bfloat16)
    b1_2 = b1.reshape(1, F).astype(jnp.float32)
    # Fused heads in bf16 (half the VMEM/HBM footprint, single-pass MXU); biases stay f32.
    wh = (jnp.zeros((F, NH_PAD), jnp.bfloat16)
          .at[:, :ND].set(wd.astype(jnp.bfloat16))
          .at[:, ND:NH].set(wc.astype(jnp.bfloat16)))
    bh = (jnp.zeros((1, NH_PAD), jnp.float32)
          .at[0, :ND].set(bd).at[0, ND:NH].set(bc))

    kernel = functools.partial(_mtl_kernel, inv_hw=1.0 / HW, hw=HW,
                               silu_dtype=_silu_dtype())

    cost = pl.CostEstimate(
        flops=2 * B_pad * HW_pad * Cin * F + 2 * B_pad * F * NH_PAD,
        transcendentals=B_pad * HW_pad * F,                       # sigmoid in SiLU
        bytes_accessed=(B_pad * HW_pad * Cin * 2 + Cin * F * 2 + F * NH_PAD * 2
                        + (F + NH_PAD + B_pad * NH_PAD) * 4),
    )

    # VMEM budget: double-buffered x tile + single-buffered weights + out + feat intermediate.
    vmem_est = (2 * NB * TS * Cin * 2                             # x tile, bf16, 2 buffers
                + Cin * F * 2 + F * 4 + F * NH_PAD * 2 + NH_PAD * 4   # weights (1 buffer each)
                + 2 * NB * NH_PAD * 4                             # output block
                + NB * F * 4                                      # accumulator scratch
                + NB * TS * F * 4)                                # f32 feat intermediate
    vmem_limit = int(min(max(2 * vmem_est + (1 << 20), 32 << 20), 64 << 20))

    def wspec(shape):
        # Constant-index weight inputs: never re-DMA'd, so single-buffer them.
        return pl.BlockSpec(shape, lambda b, s: (0, 0), pipeline_mode=pl.Buffered(1))

    out = pl.pallas_call(
        kernel,
        out_shape=jax.ShapeDtypeStruct((B_pad, NH_PAD), jnp.float32),
        grid_spec=pltpu.PrefetchScalarGridSpec(
            num_scalar_prefetch=0,
            grid=(n_b, n_s),                        # batch-blocks outer, pooling reduction last
            in_specs=[
                pl.BlockSpec((NB, TS, Cin), lambda b, s: (b, s, 0)),
                wspec((Cin, F)),
                wspec((1, F)),
                wspec((F, NH_PAD)),
                wspec((1, NH_PAD)),
            ],
            out_specs=pl.BlockSpec((NB, NH_PAD), lambda b, s: (b, 0)),
            scratch_shapes=[pltpu.VMEM((NB, F), jnp.float32)],
        ),
        compiler_params=pltpu.CompilerParams(
            # TODO(synk): on v7x verify the batch-block axis shards across both TensorCores;
            # otherwise switch to pltpu.CORE_PARALLEL / a core_map with a leading size-2 axis.
            dimension_semantics=("parallel", "arbitrary"),
            vmem_limit_bytes=vmem_limit),
        cost_estimate=cost,
    )(x3, w1_bf, b1_2, wh, bh)

    out = out[:B]                                   # drop batch padding
    return out[:, :ND], out[:, ND:NH]


def init_params(key, cin, feature_dim, num_domains=4, num_categories=65):
    k1, k2, k3, k4, k5, k6 = jax.random.split(key, 6)
    # Stand-in backbone (pointwise conv) parameters; nonzero bias so pad-row masking is tested.
    w1 = jax.random.normal(k1, (cin, feature_dim), jnp.float32) * 0.1
    b1 = jax.random.normal(k4, (feature_dim,), jnp.float32) * 0.1
    # Heads: PyTorch nn.Linear weights are (out, in); store transposed (in, out).
    wd = jax.random.normal(k2, (feature_dim, num_domains), jnp.float32) * 0.05
    bd = jax.random.normal(k5, (num_domains,), jnp.float32) * 0.05
    wc = jax.random.normal(k3, (feature_dim, num_categories), jnp.float32) * 0.05
    bc = jax.random.normal(k6, (num_categories,), jnp.float32) * 0.05
    return {"w1": w1, "b1": b1, "wd": wd, "bd": bd, "wc": wc, "bc": bc}


def _reference(x_nchw, p):
    """Pure-JAX f32 reference with the original (unfused) head layout."""
    B, Cin, H, W = x_nchw.shape
    x3 = jnp.transpose(x_nchw, (0, 2, 3, 1)).reshape(B, H * W, Cin)
    feat = jnp.einsum('bsc,cf->bsf', x3, p["w1"],
                      preferred_element_type=jnp.float32) + p["b1"]
    feat = feat * jax.nn.sigmoid(feat)
    pooled = jnp.mean(feat, axis=1)
    return pooled @ p["wd"] + p["bd"], pooled @ p["wc"] + p["bc"]


if __name__ == "__main__":
    ND, NC = 4, 65
    FEATURE_DIM = 32                    # stand-in for EfficientNet-B1's 1280-dim last feature map
    CIN = 4

    key = jax.random.PRNGKey(0)
    kx1, kx2, kp = jax.random.split(key, 3)
    params = init_params(kp, CIN, FEATURE_DIM, ND, NC)

    # Case 1: NCHW toy input.  spatial_tile=128 exercises the multi-step pooling reduction
    # (grid n_s=2); batch_tile=8 > B=2 exercises the batch-padding path.
    x1 = jax.random.normal(kx1, (2, CIN, 16, 16), jnp.float32)
    fwd1 = jax.jit(lambda xx, pp: multitask_forward(xx, pp, spatial_tile=128, batch_tile=8))
    dom1, cat1 = jax.block_until_ready(fwd1(x1, params))
    assert dom1.shape == (2, ND) and cat1.shape == (2, NC)
    assert bool(jnp.all(jnp.isfinite(dom1))) and bool(jnp.all(jnp.isfinite(cat1)))
    dom1_ref, cat1_ref = _reference(x1, params)
    # Tolerance covers bf16 backbone/head matmuls (f32 accumulation); observed error ~1e-4.
    assert jnp.allclose(dom1, dom1_ref, rtol=2e-2, atol=5e-3), "domain head mismatch (case 1)"
    assert jnp.allclose(cat1, cat1_ref, rtol=2e-2, atol=5e-3), "category head mismatch (case 1)"

    # Case 2: ragged spatial extent like the real EfficientNet-B1 last feature map (7x7, HW=49);
    # exercises the masked pad-row pooling path (nonzero b1 makes the mask load-bearing).
    x2 = jax.random.normal(kx2, (3, CIN, 7, 7), jnp.float32)
    fwd2 = jax.jit(lambda xx, pp: multitask_forward(xx, pp))
    dom2, cat2 = jax.block_until_ready(fwd2(x2, params))
    assert dom2.shape == (3, ND) and cat2.shape == (3, NC)
    assert bool(jnp.all(jnp.isfinite(dom2))) and bool(jnp.all(jnp.isfinite(cat2)))
    dom2_ref, cat2_ref = _reference(x2, params)
    assert jnp.allclose(dom2, dom2_ref, rtol=2e-2, atol=5e-3), "domain head mismatch (case 2)"
    assert jnp.allclose(cat2, cat2_ref, rtol=2e-2, atol=5e-3), "category head mismatch (case 2)"

    print("KERNEL_OK")
</pallas_src>

<mosaic_0001>
module attributes {stable_mosaic.version = 11 : i64} {
  func.func @_mtl_kernel(%arg0: i32, %arg1: i32, %arg2: memref<8x128x4xbf16, #tpu.memory_space<vmem>>, %arg3: memref<4x32xbf16, #tpu.memory_space<vmem>>, %arg4: memref<1x32xf32, #tpu.memory_space<vmem>>, %arg5: memref<32x128xbf16, #tpu.memory_space<vmem>>, %arg6: memref<1x128xf32, #tpu.memory_space<vmem>>, %arg7: memref<8x128xf32, #tpu.memory_space<vmem>>, %arg8: memref<8x32xf32, #tpu.memory_space<vmem>>) attributes {dimension_semantics = [#tpu.dimension_semantics<parallel>, #tpu.dimension_semantics<arbitrary>], iteration_bounds = array<i64: 1, 2>, scalar_prefetch = 0 : i64, scratch_operands = 1 : i64, tpu.core_type = #tpu.core_type<tc>, window_params = [{transform_indices = @transform_0, window_bounds = array<i64: 8, 128, 4>}, {pipeline_mode = #tpu.pipeline_mode<synchronous>, transform_indices = @transform_1, window_bounds = array<i64: 4, 32>}, {pipeline_mode = #tpu.pipeline_mode<synchronous>, transform_indices = @transform_2, window_bounds = array<i64: 1, 32>}, {pipeline_mode = #tpu.pipeline_mode<synchronous>, transform_indices = @transform_3, window_bounds = array<i64: 32, 128>}, {pipeline_mode = #tpu.pipeline_mode<synchronous>, transform_indices = @transform_4, window_bounds = array<i64: 1, 128>}, {transform_indices = @transform_5, window_bounds = array<i64: 8, 128>}]} {
    %c0_i32 = arith.constant 0 : i32
    %0 = arith.cmpi eq, %arg1, %c0_i32 : i32
    %1 = arith.extui %0 : i1 to i32
    %c0_i32_0 = arith.constant 0 : i32
    %2 = arith.cmpi ne, %1, %c0_i32_0 : i32
    scf.if %2 {
      %cst_14 = arith.constant 0.000000e+00 : f32
      %24 = vector.broadcast %cst_14 : f32 to vector<8x32xf32>
      %c0_15 = arith.constant 0 : index
      %c0_16 = arith.constant 0 : index
      %25 = vector.load %arg8[%c0_15, %c0_16] : memref<8x32xf32, #tpu.memory_space<vmem>>, vector<8x32xf32>
      tpu.vector_store %arg8[%c0_15, %c0_16], %24 {strides = array<i32>} : memref<8x32xf32, #tpu.memory_space<vmem>>, vector<8x32xf32>,
    } else {
    }
    %c0 = arith.constant 0 : index
    %c0_1 = arith.constant 0 : index
    %c0_2 = arith.constant 0 : index
    %3 = vector.load %arg2[%c0, %c0_1, %c0_2] : memref<8x128x4xbf16, #tpu.memory_space<vmem>>, vector<8x128x4xbf16>
    %4 = vector.shape_cast %3 : vector<8x128x4xbf16> to vector<1024x4xbf16>
    %c0_3 = arith.constant 0 : index
    %c0_4 = arith.constant 0 : index
    %5 = vector.load %arg3[%c0_3, %c0_4] : memref<4x32xbf16, #tpu.memory_space<vmem>>, vector<4x32xbf16>
    %cst = arith.constant dense<0.000000e+00> : vector<1024x32xf32>
    %6 = tpu.matmul %4, %5, %cst {dimension_numbers = #tpu.dot_dimension_numbers<[1], [0], [0], [1], [0, 0, 1, 1], [], []>} : vector<1024x4xbf16>, vector<4x32xbf16>, vector<1024x32xf32> -> vector<1024x32xf32>
    %c0_5 = arith.constant 0 : index
    %c0_6 = arith.constant 0 : index
    %7 = vector.load %arg4[%c0_5, %c0_6] : memref<1x32xf32, #tpu.memory_space<vmem>>, vector<1x32xf32>
    %8 = vector.broadcast %7 : vector<1x32xf32> to vector<1024x32xf32>
    %9 = arith.addf %6, %8 : vector<1024x32xf32>
    %10 = arith.negf %9 : vector<1024x32xf32>
    %11 = math.exp %10 : vector<1024x32xf32>
    %cst_7 = arith.constant 1.000000e+00 : f32
    %12 = vector.broadcast %cst_7 : f32 to vector<1024x32xf32>
    %13 = arith.addf %12, %11 : vector<1024x32xf32>
    %14 = arith.divf %12, %13 : vector<1024x32xf32>
    %15 = arith.mulf %9, %14 : vector<1024x32xf32>
    %16 = vector.shape_cast %15 : vector<1024x32xf32> to vector<8x128x32xf32>
    %c0_8 = arith.constant 0 : index
    %c0_9 = arith.constant 0 : index
    %17 = vector.load %arg8[%c0_8, %c0_9] : memref<8x32xf32, #tpu.memory_space<vmem>>, vector<8x32xf32>
    %cst_10 = arith.constant dense<0.000000e+00> : vector<8x32xf32>
    %18 = vector.multi_reduction <add>, %16, %cst_10 [1] : vector<8x128x32xf32> to vector<8x32xf32>
    %19 = arith.addf %17, %18 : vector<8x32xf32>
    %c0_11 = arith.constant 0 : index
    %c0_12 = arith.constant 0 : index
    %20 = vector.load %arg8[%c0_11, %c0_12] : memref<8x32xf32, #tpu.memory_space<vmem>>, vector<8x32xf32>
    tpu.vector_store %arg8[%c0_11, %c0_12], %19 {strides = array<i32>} : memref<8x32xf32, #tpu.memory_space<vmem>>, vector<8x32xf32>,
    %c1_i32 = arith.constant 1 : i32
    %21 = arith.cmpi eq, %arg1, %c1_i32 : i32
    %22 = arith.extui %21 : i1 to i32
    %c0_i32_13 = arith.constant 0 : i32
    %23 = arith.cmpi ne, %22, %c0_i32_13 : i32
    scf.if %23 {
      %c0_14 = arith.constant 0 : index
      %c0_15 = arith.constant 0 : index
      %24 = vector.load %arg8[%c0_14, %c0_15] : memref<8x32xf32, #tpu.memory_space<vmem>>, vector<8x32xf32>
      %cst_16 = arith.constant 3.906250e-03 : f32
      %25 = vector.broadcast %cst_16 : f32 to vector<8x32xf32>
      %26 = arith.mulf %24, %25 : vector<8x32xf32>
      %27 = arith.truncf %26 : vector<8x32xf32> to vector<8x32xbf16>
      %c0_17 = arith.constant 0 : index
      %c0_18 = arith.constant 0 : index
      %28 = vector.load %arg5[%c0_17, %c0_18] : memref<32x128xbf16, #tpu.memory_space<vmem>>, vector<32x128xbf16>
      %cst_19 = arith.constant dense<0.000000e+00> : vector<8x128xf32>
      %29 = tpu.matmul %27, %28, %cst_19 {dimension_numbers = #tpu.dot_dimension_numbers<[1], [0], [0], [1], [0, 0, 1, 1], [], []>} : vector<8x32xbf16>, vector<32x128xbf16>, vector<8x128xf32> -> vector<8x128xf32>
      %c0_20 = arith.constant 0 : index
      %c0_21 = arith.constant 0 : index
      %30 = vector.load %arg6[%c0_20, %c0_21] : memref<1x128xf32, #tpu.memory_space<vmem>>, vector<1x128xf32>
      %31 = vector.broadcast %30 : vector<1x128xf32> to vector<8x128xf32>
      %32 = arith.addf %29, %31 : vector<8x128xf32>
      %c0_22 = arith.constant 0 : index
      %c0_23 = arith.constant 0 : index
      %33 = vector.load %arg7[%c0_22, %c0_23] : memref<8x128xf32, #tpu.memory_space<vmem>>, vector<8x128xf32>
      tpu.vector_store %arg7[%c0_22, %c0_23], %32 {strides = array<i32>} : memref<8x128xf32, #tpu.memory_space<vmem>>, vector<8x128xf32>,
    } else {
    }
    return
  }
  func.func @transform_0(%arg0: i32, %arg1: i32) -> (i32, i32, i32) {
    %c0_i32 = arith.constant 0 : i32
    %c0_i32_0 = arith.constant 0 : i32
    return %arg0, %arg1, %c0_i32 : i32, i32, i32
  }
  func.func @transform_1(%arg0: i32, %arg1: i32) -> (i32, i32) {
    %c0_i32 = arith.constant 0 : i32
    %c0_i32_0 = arith.constant 0 : i32
    %c0_i32_1 = arith.constant 0 : i32
    return %c0_i32, %c0_i32_0 : i32, i32
  }
  func.func @transform_2(%arg0: i32, %arg1: i32) -> (i32, i32) {
    %c0_i32 = arith.constant 0 : i32
    %c0_i32_0 = arith.constant 0 : i32
    %c0_i32_1 = arith.constant 0 : i32
    return %c0_i32, %c0_i32_0 : i32, i32
  }
  func.func @transform_3(%arg0: i32, %arg1: i32) -> (i32, i32) {
    %c0_i32 = arith.constant 0 : i32
    %c0_i32_0 = arith.constant 0 : i32
    %c0_i32_1 = arith.constant 0 : i32
    return %c0_i32, %c0_i32_0 : i32, i32
  }
  func.func @transform_4(%arg0: i32, %arg1: i32) -> (i32, i32) {
    %c0_i32 = arith.constant 0 : i32
    %c0_i32_0 = arith.constant 0 : i32
    %c0_i32_1 = arith.constant 0 : i32
    return %c0_i32, %c0_i32_0 : i32, i32
  }
  func.func @transform_5(%arg0: i32, %arg1: i32) -> (i32, i32) {
    %c0_i32 = arith.constant 0 : i32
    %c0_i32_0 = arith.constant 0 : i32
    return %arg0, %c0_i32 : i32, i32
  }
}

</mosaic_0001>

<bundles_post_ra>
// kernel: _lambda_.1
= control target key start
LH: loop header
LB: loop body
LE: loop exit
PB: predicated region body
PF: predicated region fallthrough
CT: control target
= control target key end

     0   :  { %s5946_s18 = smov 0   ;;  %s5948_s19 = smov 0   ;;  %s9755_s0 = inlined_call_operand.vmem [shape: bf16[8,256,4], index: 0, kind: input, shape index: {}]   ;;  %s9756_s1 = inlined_call_operand.vmem [shape: bf16[4,32], index: 1, kind: input, shape index: {}]   ;;  %s9757_s2 = inlined_call_operand.vmem [shape: f32[1,32], index: 2, kind: input, shape index: {}]   ;;  %s9758_s3 = inlined_call_operand.vmem [shape: bf16[32,128], index: 3, kind: input, shape index: {}]   ;;  %s9759_s4 = inlined_call_operand.vmem [shape: f32[1,128], index: 4, kind: input, shape index: {}]   ;;  %s9760_s5 = inlined_call_operand.vmem [shape: f32[8,128], index: 5, kind: output, shape index: {}]  }
   0x1   :  { %s5950_s20 = smov 0   ;;  %s5952_s21 = smov 0  }
   0x2   :  { %s5954_s22 = smov 0  }
   0x3 LB: > { %s24_s23 = sadd.s32 1, %s5909_s21  ;;  %p43_p1 = scmp.ne.s32.totalorder %s5901_s19, %s5897_s18  ;;  %s5913_s22 = sphi %s5954_s22, %s15_s22   ;;  %s5909_s21 = sphi %s5952_s21, %s10040_s21   ;;  %s5905_s20 = sphi %s5950_s20, %s10039_s20   ;;  %s5901_s19 = sphi %s5948_s19, %s10038_s19   ;;  %s5897_s18 = sphi %s5946_s18, %s10037_s18  }
   0x4   : > { %p25_p0 = scmp.ge.s32.totalorder %s24_s23, 2  ;;  %p44_p2 = scmp.eq.s32.totalorder %s5913_s22, 0 }
   0x5   : > { %s36_s25 = sadd.s32 1, %s5901_s19  ;;  %p4777_p5 = scmp.ge.s32.totalorder %s5913_s22, 2 }
   0x6   : > { %s10042_s23 = smov (%p25_p0, %s24_s23), 0  ;;  %p45_p3 = por %p44_p2, %p43_p1 }
   0x7   : > { %s32_s24 = ssub.s32 %s5909_s21, %s10042_s23  ;;  %191 = sbr.rel (%p4777_p5) target bundleno = 80 (0x50), region = 32 }
   0x8   : > { %p34_p4 = scmp.eq.s32.totalorder %s32_s24, 0 }
   0xa   : > { %s5981_s26 = scalar_select %p34_p4, %s5901_s19, %s36_s25  }
   0xc   : > { %194 = sbr.rel (!%p45_p3) target bundleno = 80 (0x50), region = 36  ;;  %s196_s27 = sand.u32 (%p45_p3), 1, %s5901_s19  }
   0xd   : > { %s5245_s28 = sshll.u32 (%p45_p3), %s5909_s21, 6  ;;  %s4778_s29 = sshll.u32 (%p45_p3), %s196_s27, 9 }
   0xe   : > { %s5989_s7 = scalar_lea.vmem (%p45_p3), %s9755_s0, %s5245_s28  ;;  %s5994_s8 = scalar_lea.vmem (%p45_p3), [#allocation3], %s4778_s29 }
   0xf   : > { %v221_v0 = vld [vmem:[%s5989_s7] sm:$0xff] (%p45_p3)   ;;  %v225_v1 = vld [vmem:[%s5989_s7 + $0x8] sm:$0xff] (%p45_p3)   ;;  %v229_v2 = vld [vmem:[%s5989_s7 + $0x10] sm:$0xff] (%p45_p3)  }
  0x10   : > { %222 = vst [vmem:[%s5994_s8] sm:$0xff] (%p45_p3), %v221_v0   ;;  %v233_v3 = vld [vmem:[%s5989_s7 + $0x18] sm:$0xff] (%p45_p3)   ;;  %v237_v4 = vld [vmem:[%s5989_s7 + $0x20] sm:$0xff] (%p45_p3)   ;;  %v241_v5 = vld [vmem:[%s5989_s7 + $0x28] sm:$0xff] (%p45_p3)  }
  0x11   : > { %226 = vst [vmem:[%s5994_s8 + $0x8] sm:$0xff] %v225_v1   ;;  %v245_v6 = vld [vmem:[%s5989_s7 + $0x30] sm:$0xff]   ;;  %v249_v7 = vld [vmem:[%s5989_s7 + $0x38] sm:$0xff]   ;;  %v253_v8 = vld [vmem:[%s5989_s7 + $0x80] sm:$0xff]  }
  0x12   : > { %230 = vst [vmem:[%s5994_s8 + $0x10] sm:$0xff] %v229_v2   ;;  %v257_v9 = vld [vmem:[%s5989_s7 + $0x88] sm:$0xff]   ;;  %v261_v10 = vld [vmem:[%s5989_s7 + $0x90] sm:$0xff]   ;;  %v265_v11 = vld [vmem:[%s5989_s7 + $0x98] sm:$0xff]  }
  0x13   : > { %234 = vst [vmem:[%s5994_s8 + $0x18] sm:$0xff] %v233_v3   ;;  %v269_v12 = vld [vmem:[%s5989_s7 + $0xa0] sm:$0xff]   ;;  %v273_v13 = vld [vmem:[%s5989_s7 + $0xa8] sm:$0xff]   ;;  %v277_v14 = vld [vmem:[%s5989_s7 + $0xb0] sm:$0xff]  }
  0x14   : > { %238 = vst [vmem:[%s5994_s8 + $0x20] sm:$0xff] %v237_v4   ;;  %v281_v15 = vld [vmem:[%s5989_s7 + $0xb8] sm:$0xff]   ;;  %v285_v16 = vld [vmem:[%s5989_s7 + $0x100] sm:$0xff]   ;;  %v289_v17 = vld [vmem:[%s5989_s7 + $0x108] sm:$0xff]  }
  0x15   : > { %242 = vst [vmem:[%s5994_s8 + $0x28] sm:$0xff] %v241_v5   ;;  %v293_v18 = vld [vmem:[%s5989_s7 + $0x110] sm:$0xff]   ;;  %v297_v19 = vld [vmem:[%s5989_s7 + $0x118] sm:$0xff]   ;;  %v301_v20 = vld [vmem:[%s5989_s7 + $0x120] sm:$0xff]  }
  0x16   : > { %246 = vst [vmem:[%s5994_s8 + $0x30] sm:$0xff] %v245_v6   ;;  %v305_v21 = vld [vmem:[%s5989_s7 + $0x128] sm:$0xff]   ;;  %v309_v22 = vld [vmem:[%s5989_s7 + $0x130] sm:$0xff]   ;;  %v313_v23 = vld [vmem:[%s5989_s7 + $0x138] sm:$0xff]  }
  0x17   : > { %250 = vst [vmem:[%s5994_s8 + $0x38] sm:$0xff] %v249_v7   ;;  %v317_v24 = vld [vmem:[%s5989_s7 + $0x180] sm:$0xff]   ;;  %v321_v25 = vld [vmem:[%s5989_s7 + $0x188] sm:$0xff]   ;;  %v325_v26 = vld [vmem:[%s5989_s7 + $0x190] sm:$0xff]  }
  0x18   : > { %254 = vst [vmem:[%s5994_s8 + $0x40] sm:$0xff] %v253_v8   ;;  %v329_v27 = vld [vmem:[%s5989_s7 + $0x198] sm:$0xff]   ;;  %v333_v28 = vld [vmem:[%s5989_s7 + $0x1a0] sm:$0xff]   ;;  %v337_v29 = vld [vmem:[%s5989_s7 + $0x1a8] sm:$0xff]  }
  0x19   : > { %258 = vst [vmem:[%s5994_s8 + $0x48] sm:$0xff] %v257_v9   ;;  %v341_v30 = vld [vmem:[%s5989_s7 + $0x1b0] sm:$0xff]   ;;  %v345_v31 = vld [vmem:[%s5989_s7 + $0x1b8] sm:$0xff]   ;;  %v349_v32 = vld [vmem:[%s5989_s7 + $0x200] sm:$0xff]  }
  0x1a   : > { %262 = vst [vmem:[%s5994_s8 + $0x50] sm:$0xff] %v261_v10   ;;  %v353_v33 = vld [vmem:[%s5989_s7 + $0x208] sm:$0xff]   ;;  %v357_v34 = vld [vmem:[%s5989_s7 + $0x210] sm:$0xff]   ;;  %v361_v35 = vld [vmem:[%s5989_s7 + $0x218] sm:$0xff]  }
  0x1b   : > { %266 = vst [vmem:[%s5994_s8 + $0x58] sm:$0xff] %v265_v11   ;;  %v365_v36 = vld [vmem:[%s5989_s7 + $0x220] sm:$0xff]   ;;  %v369_v37 = vld [vmem:[%s5989_s7 + $0x228] sm:$0xff]   ;;  %v373_v38 = vld [vmem:[%s5989_s7 + $0x230] sm:$0xff]  }
  0x1c   : > { %270 = vst [vmem:[%s5994_s8 + $0x60] sm:$0xff] %v269_v12   ;;  %v377_v39 = vld [vmem:[%s5989_s7 + $0x238] sm:$0xff]   ;;  %v381_v40 = vld [vmem:[%s5989_s7 + $0x280] sm:$0xff]   ;;  %v385_v41 = vld [vmem:[%s5989_s7 + $0x288] sm:$0xff]  }
  0x1d   : > { %274 = vst [vmem:[%s5994_s8 + $0x68] sm:$0xff] %v273_v13   ;;  %v389_v42 = vld [vmem:[%s5989_s7 + $0x290] sm:$0xff]   ;;  %v393_v43 = vld [vmem:[%s5989_s7 + $0x298] sm:$0xff]   ;;  %v397_v44 = vld [vmem:[%s5989_s7 + $0x2a0] sm:$0xff]  }
  0x1e   : > { %278 = vst [vmem:[%s5994_s8 + $0x70] sm:$0xff] %v277_v14   ;;  %v401_v45 = vld [vmem:[%s5989_s7 + $0x2a8] sm:$0xff]   ;;  %v405_v46 = vld [vmem:[%s5989_s7 + $0x2b0] sm:$0xff]   ;;  %v409_v47 = vld [vmem:[%s5989_s7 + $0x2b8] sm:$0xff]  }
  0x1f   : > { %282 = vst [vmem:[%s5994_s8 + $0x78] sm:$0xff] %v281_v15   ;;  %v413_v48 = vld [vmem:[%s5989_s7 + $0x300] sm:$0xff]   ;;  %v417_v49 = vld [vmem:[%s5989_s7 + $0x308] sm:$0xff]   ;;  %v421_v50 = vld [vmem:[%s5989_s7 + $0x310] sm:$0xff]  }
  0x20   : > { %286 = vst [vmem:[%s5994_s8 + $0x80] sm:$0xff] %v285_v16   ;;  %v425_v51 = vld [vmem:[%s5989_s7 + $0x318] sm:$0xff]   ;;  %v429_v52 = vld [vmem:[%s5989_s7 + $0x320] sm:$0xff]   ;;  %v433_v53 = vld [vmem:[%s5989_s7 + $0x328] sm:$0xff]  }
  0x21   : > { %290 = vst [vmem:[%s5994_s8 + $0x88] sm:$0xff] %v289_v17   ;;  %v437_v54 = vld [vmem:[%s5989_s7 + $0x330] sm:$0xff]   ;;  %v441_v55 = vld [vmem:[%s5989_s7 + $0x338] sm:$0xff]   ;;  %v445_v56 = vld [vmem:[%s5989_s7 + $0x380] sm:$0xff]  }
  0x22   : > { %294 = vst [vmem:[%s5994_s8 + $0x90] sm:$0xff] %v293_v18   ;;  %v449_v57 = vld [vmem:[%s5989_s7 + $0x388] sm:$0xff]   ;;  %v453_v58 = vld [vmem:[%s5989_s7 + $0x390] sm:$0xff]   ;;  %v457_v59 = vld [vmem:[%s5989_s7 + $0x398] sm:$0xff]  }
  0x23   : > { %298 = vst [vmem:[%s5994_s8 + $0x98] sm:$0xff] %v297_v19   ;;  %v461_v60 = vld [vmem:[%s5989_s7 + $0x3a0] sm:$0xff]   ;;  %v465_v61 = vld [vmem:[%s5989_s7 + $0x3a8] sm:$0xff]   ;;  %v469_v62 = vld [vmem:[%s5989_s7 + $0x3b0] sm:$0xff]  }
  0x24   : > { %302 = vst [vmem:[%s5994_s8 + $0xa0] sm:$0xff] %v301_v20   ;;  %v473_v63 = vld [vmem:[%s5989_s7 + $0x3b8] sm:$0xff]  }
  0x25   : > { %306 = vst [vmem:[%s5994_s8 + $0xa8] sm:$0xff] %v305_v21  }
  0x26   : > { %310 = vst [vmem:[%s5994_s8 + $0xb0] sm:$0xff] %v309_v22  }
  0x27   : > { %314 = vst [vmem:[%s5994_s8 + $0xb8] sm:$0xff] %v313_v23  }
  0x28   : > { %318 = vst [vmem:[%s5994_s8 + $0xc0] sm:$0xff] %v317_v24  }
  0x29   : > { %322 = vst [vmem:[%s5994_s8 + $0xc8] sm:$0xff] %v321_v25  }
  0x2a   : > { %326 = vst [vmem:[%s5994_s8 + $0xd0] sm:$0xff] %v325_v26  }
  0x2b   : > { %330 = vst [vmem:[%s5994_s8 + $0xd8] sm:$0xff] %v329_v27  }
  0x2c   : > { %334 = vst [vmem:[%s5994_s8 + $0xe0] sm:$0xff] %v333_v28  }
  0x2d   : > { %338 = vst [vmem:[%s5994_s8 + $0xe8] sm:$0xff] %v337_v29  }
  0x2e   : > { %342 = vst [vmem:[%s5994_s8 + $0xf0] sm:$0xff] %v341_v30  }
  0x2f   : > { %346 = vst [vmem:[%s5994_s8 + $0xf8] sm:$0xff] %v345_v31  }
  0x30   : > { %350 = vst [vmem:[%s5994_s8 + $0x100] sm:$0xff] %v349_v32  }
  0x31   : > { %354 = vst [vmem:[%s5994_s8 + $0x108] sm:$0xff] %v353_v33  }
  0x32   : > { %358 = vst [vmem:[%s5994_s8 + $0x110] sm:$0xff] %v357_v34  }
  0x33   : > { %362 = vst [vmem:[%s5994_s8 + $0x118] sm:$0xff] %v361_v35  }
  0x34   : > { %366 = vst [vmem:[%s5994_s8 + $0x120] sm:$0xff] %v365_v36  }
  0x35   : > { %370 = vst [vmem:[%s5994_s8 + $0x128] sm:$0xff] %v369_v37  }
  0x36   : > { %374 = vst [vmem:[%s5994_s8 + $0x130] sm:$0xff] %v373_v38  }
  0x37   : > { %378 = vst [vmem:[%s5994_s8 + $0x138] sm:$0xff] %v377_v39  }
  0x38   : > { %382 = vst [vmem:[%s5994_s8 + $0x140] sm:$0xff] %v381_v40  }
  0x39   : > { %386 = vst [vmem:[%s5994_s8 + $0x148] sm:$0xff] %v385_v41  }
  0x3a   : > { %390 = vst [vmem:[%s5994_s8 + $0x150] sm:$0xff] %v389_v42  }
  0x3b   : > { %394 = vst [vmem:[%s5994_s8 + $0x158] sm:$0xff] %v393_v43  }
  0x3c   : > { %398 = vst [vmem:[%s5994_s8 + $0x160] sm:$0xff] %v397_v44  }
  0x3d   : > { %402 = vst [vmem:[%s5994_s8 + $0x168] sm:$0xff] %v401_v45  }
  0x3e   : > { %406 = vst [vmem:[%s5994_s8 + $0x170] sm:$0xff] %v405_v46  }
  0x3f   : > { %410 = vst [vmem:[%s5994_s8 + $0x178] sm:$0xff] %v409_v47  }
  0x40   : > { %414 = vst [vmem:[%s5994_s8 + $0x180] sm:$0xff] %v413_v48  }
  0x41   : > { %418 = vst [vmem:[%s5994_s8 + $0x188] sm:$0xff] %v417_v49  }
  0x42   : > { %422 = vst [vmem:[%s5994_s8 + $0x190] sm:$0xff] %v421_v50  }
  0x43   : > { %426 = vst [vmem:[%s5994_s8 + $0x198] sm:$0xff] %v425_v51  }
  0x44   : > { %430 = vst [vmem:[%s5994_s8 + $0x1a0] sm:$0xff] %v429_v52  }
  0x45   : > { %434 = vst [vmem:[%s5994_s8 + $0x1a8] sm:$0xff] %v433_v53  }
  0x46   : > { %438 = vst [vmem:[%s5994_s8 + $0x1b0] sm:$0xff] %v437_v54  }
  0x47   : > { %442 = vst [vmem:[%s5994_s8 + $0x1b8] sm:$0xff] %v441_v55  }
  0x48   : > { %446 = vst [vmem:[%s5994_s8 + $0x1c0] sm:$0xff] %v445_v56  }
  0x49   : > { %450 = vst [vmem:[%s5994_s8 + $0x1c8] sm:$0xff] %v449_v57  }
  0x4a   : > { %454 = vst [vmem:[%s5994_s8 + $0x1d0] sm:$0xff] %v453_v58  }
  0x4b   : > { %458 = vst [vmem:[%s5994_s8 + $0x1d8] sm:$0xff] %v457_v59  }
  0x4c   : > { %462 = vst [vmem:[%s5994_s8 + $0x1e0] sm:$0xff] %v461_v60  }
  0x4d   : > { %466 = vst [vmem:[%s5994_s8 + $0x1e8] sm:$0xff] %v465_v61  }
  0x4e   : > { %470 = vst [vmem:[%s5994_s8 + $0x1f0] sm:$0xff] %v469_v62  }
  0x4f   : > { %474 = vst [vmem:[%s5994_s8 + $0x1f8] sm:$0xff] %v473_v63  }
  0x50 PF: > { %p4781_p6 = scmp.ge.s32.totalorder %s5913_s22, 1  ;;  %p755_p7 = scmp.lt.s32.totalorder %s5913_s22, 3 }
  0x52   : > { %p756_p8 = pnand %p4781_p6, %p755_p7 }
  0x53   : > { %s762_s9 = sand.u32 (!%p756_p8), 1, %s5897_s18   ;;  %p4783_p9 = scmp.ne.s32.totalorder (!%p756_p8), %s5905_s20, 0 }
  0x54   : > { %759 = sbr.rel (%p756_p8) target bundleno = 1050 (0x41a), region = 77  ;;  %s4782_s10 = sshll.u32 (!%p756_p8), %s762_s9, 9 }
  0x55   : > { %s6124_s11 = scalar_lea.vmem (!%p756_p8), [#allocation3], %s4782_s10 }
  0x59   : > { %798 = sbr.rel (%p4783_p9) target bundleno = 96 (0x60), region = 85 }
  0x5e   : > { %vm799_vm0 = vcmask 261120   ;;  %v5915_v0 = vmov 0.0  }
  0x5f   : > { %800 = vst.msk [vmem:[#allocation2] sm:$0xff] %vm799_vm0, %v5915_v0 }
  0x60 PF: > { %v929_v1 = vld [vmem:[%s9756_s1] sm:$0x3]  ;;  %vm1447_vm1 = vcmask 1041408   ;;  %v5246_v3 = vld [vmem:[%s6124_s11] sm:$0xff]  ;;  %vm1254_vm2 = vcmask 31744   ;;  %v5247_v7 = vld [vmem:[%s6124_s11 + $0x8] sm:$0xff] }
  0x61   : > { %v1449_v2 = vsel %vm1447_vm1, %v929_v1, 0  ;;  %v5262_v4 = vld [vmem:[%s6124_s11 + $0x80] sm:$0xff]  ;;  %v5263_v8 = vld [vmem:[%s6124_s11 + $0x88] sm:$0xff]  ;;  %v5248_v11 = vld [vmem:[%s6124_s11 + $0x10] sm:$0xff]  ;;  %vm4341_vm14 = vcmask 261120   ;;  %p5232_p10 = scmp.ne.s32.totalorder %s5905_s20, 1 }
  0x62   : > { %1458 = vmatpush.bf16.msra.mxu0 %v1449_v2  ;;  %5312 = vmatpush.bf16.msra.mxu1 %v1449_v2  ;;  %v5278_v5 = vld [vmem:[%s6124_s11 + $0x100] sm:$0xff]  ;;  %v5279_v9 = vld [vmem:[%s6124_s11 + $0x108] sm:$0xff]  ;;  %v5264_v12 = vld [vmem:[%s6124_s11 + $0x90] sm:$0xff] }
  0x63   : > { %v5294_v6 = vld [vmem:[%s6124_s11 + $0x180] sm:$0xff]  ;;  %5313 = vmatpush.bf16.msra.mxu2 %v1449_v2  ;;  %5314 = vmatpush.bf16.msra.mxu3 %v1449_v2  ;;  %v5295_v10 = vld [vmem:[%s6124_s11 + $0x188] sm:$0xff]  ;;  %v5280_v13 = vld [vmem:[%s6124_s11 + $0x110] sm:$0xff] }
  0x64   : > { %v5296_v14 = vld [vmem:[%s6124_s11 + $0x190] sm:$0xff]  ;;  %v5249_v15 = vld [vmem:[%s6124_s11 + $0x18] sm:$0xff]  ;;  %v5250_v19 = vld [vmem:[%s6124_s11 + $0x20] sm:$0xff] }
  0x65   : > { %5040 = vmatmul.msk.bf16.vlgmr.msra.gmra.mxu0 %vm1254_vm2, %v5246_v3  ;;  %5056 = vmatmul.msk.bf16.vlgmr.msra.gmra.mxu1 %vm1254_vm2, %v5262_v4  ;;  %v5265_v16 = vld [vmem:[%s6124_s11 + $0x98] sm:$0xff]  ;;  %v5266_v20 = vld [vmem:[%s6124_s11 + $0xa0] sm:$0xff]  ;;  %v5251_v23 = vld [vmem:[%s6124_s11 + $0x28] sm:$0xff] }
  0x66   : > { %5072 = vmatmul.msk.bf16.vlgmr.msra.gmra.mxu2 %vm1254_vm2, %v5278_v5  ;;  %5088 = vmatmul.msk.bf16.vlgmr.msra.gmra.mxu3 %vm1254_vm2, %v5294_v6  ;;  %v5281_v17 = vld [vmem:[%s6124_s11 + $0x118] sm:$0xff]  ;;  %v5282_v21 = vld [vmem:[%s6124_s11 + $0x120] sm:$0xff]  ;;  %v5267_v24 = vld [vmem:[%s6124_s11 + $0xa8] sm:$0xff] }
  0x67   : > { %v5297_v18 = vld [vmem:[%s6124_s11 + $0x198] sm:$0xff]  ;;  %v5298_v22 = vld [vmem:[%s6124_s11 + $0x1a0] sm:$0xff]  ;;  %v5283_v25 = vld [vmem:[%s6124_s11 + $0x128] sm:$0xff] }
  0x68   : > { %v5299_v26 = vld [vmem:[%s6124_s11 + $0x1a8] sm:$0xff]  ;;  %v5252_v27 = vld [vmem:[%s6124_s11 + $0x30] sm:$0xff]  ;;  %v5253_v31 = vld [vmem:[%s6124_s11 + $0x38] sm:$0xff] }
  0x69   : > { %v5268_v28 = vld [vmem:[%s6124_s11 + $0xb0] sm:$0xff]  ;;  %v5269_v32 = vld [vmem:[%s6124_s11 + $0xb8] sm:$0xff]  ;;  %v5254_v36 = vld [vmem:[%s6124_s11 + $0x40] sm:$0xff] }
  0x6a   : > { %v5284_v29 = vld [vmem:[%s6124_s11 + $0x130] sm:$0xff]  ;;  %v5285_v33 = vld [vmem:[%s6124_s11 + $0x138] sm:$0xff]  ;;  %v5270_v37 = vld [vmem:[%s6124_s11 + $0xc0] sm:$0xff] }
  0x6b   : > { %v5300_v30 = vld [vmem:[%s6124_s11 + $0x1b0] sm:$0xff]  ;;  %v5301_v34 = vld [vmem:[%s6124_s11 + $0x1b8] sm:$0xff]  ;;  %v5286_v40 = vld [vmem:[%s6124_s11 + $0x140] sm:$0xff] }
  0x6c   : > { %v6197_v35 = vld [vmem:[%s9757_s2] ss:$0 sm:$0xff]  ;;  %v5302_v41 = vld [vmem:[%s6124_s11 + $0x1c0] sm:$0xff]  ;;  %v5255_v0 = vld [vmem:[%s6124_s11 + $0x48] sm:$0xff] }
  0x6d   : > { %v5271_v1 = vld [vmem:[%s6124_s11 + $0xc8] sm:$0xff] }
  0x6e   : > { %v5287_v3 = vld [vmem:[%s6124_s11 + $0x148] sm:$0xff] }
  0x6f   : > { %v5303_v4 = vld [vmem:[%s6124_s11 + $0x1c8] sm:$0xff] }
  0x75   : > { %5041 = vmatmul.msk.bf16.gmra.mxu0 %vm1254_vm2, %v5247_v7  ;;  %5057 = vmatmul.msk.bf16.gmra.mxu1 %vm1254_vm2, %v5263_v8 }
  0x76   : > { %5073 = vmatmul.msk.bf16.gmra.mxu2 %vm1254_vm2, %v5279_v9  ;;  %5089 = vmatmul.msk.bf16.gmra.mxu3 %vm1254_vm2, %v5295_v10 }
  0x85   : > { %5042 = vmatmul.msk.bf16.gmra.mxu0 %vm1254_vm2, %v5248_v11  ;;  %5058 = vmatmul.msk.bf16.gmra.mxu1 %vm1254_vm2, %v5264_v12 }
  0x86   : > { %5074 = vmatmul.msk.bf16.gmra.mxu2 %vm1254_vm2, %v5280_v13  ;;  %5090 = vmatmul.msk.bf16.gmra.mxu3 %vm1254_vm2, %v5296_v14 }
  0x95   : > { %5043 = vmatmul.msk.bf16.gmra.mxu0 %vm1254_vm2, %v5249_v15  ;;  %5059 = vmatmul.msk.bf16.gmra.mxu1 %vm1254_vm2, %v5265_v16 }
  0x96   : > { %5075 = vmatmul.msk.bf16.gmra.mxu2 %vm1254_vm2, %v5281_v17  ;;  %5091 = vmatmul.msk.bf16.gmra.mxu3 %vm1254_vm2, %v5297_v18 }
  0xa5   : > { %5044 = vmatmul.msk.bf16.gmra.mxu0 %vm1254_vm2, %v5250_v19  ;;  %5060 = vmatmul.msk.bf16.gmra.mxu1 %vm1254_vm2, %v5266_v20 }
  0xa6   : > { %5076 = vmatmul.msk.bf16.gmra.mxu2 %vm1254_vm2, %v5282_v21  ;;  %5092 = vmatmul.msk.bf16.gmra.mxu3 %vm1254_vm2, %v5298_v22 }
  0xb5   : > { %5045 = vmatmul.msk.bf16.gmra.mxu0 %vm1254_vm2, %v5251_v23  ;;  %5061 = vmatmul.msk.bf16.gmra.mxu1 %vm1254_vm2, %v5267_v24 }
  0xb6   : > { %5077 = vmatmul.msk.bf16.gmra.mxu2 %vm1254_vm2, %v5283_v25  ;;  %5093 = vmatmul.msk.bf16.gmra.mxu3 %vm1254_vm2, %v5299_v26 }
  0xc5   : > { %5046 = vmatmul.msk.bf16.gmra.mxu0 %vm1254_vm2, %v5252_v27  ;;  %5062 = vmatmul.msk.bf16.gmra.mxu1 %vm1254_vm2, %v5268_v28 }
  0xc6   : > { %5078 = vmatmul.msk.bf16.gmra.mxu2 %vm1254_vm2, %v5284_v29  ;;  %5094 = vmatmul.msk.bf16.gmra.mxu3 %vm1254_vm2, %v5300_v30 }
  0xd5   : > { %5047 = vmatmul.msk.bf16.gmra.mxu0 %vm1254_vm2, %v5253_v31  ;;  %5063 = vmatmul.msk.bf16.gmra.mxu1 %vm1254_vm2, %v5269_v32 }
  0xd6   : > { %5079 = vmatmul.msk.bf16.gmra.mxu2 %vm1254_vm2, %v5285_v33  ;;  %5095 = vmatmul.msk.bf16.gmra.mxu3 %vm1254_vm2, %v5301_v34 }
  0xe2   : > { %v1460_v38 = vpop.f32.mrf.mxu0  ;;  %v1540_v39 = vpop.f32.mrf.mxu1 }
  0xe3   : > { %v6204_v42 = vadd.f32 %v6197_v35, %v1460_v38  ;;  %v6207_v43 = vadd.f32 %v6197_v35, %v1540_v39 }
  0xe5   : > { %v5104_v44 = vmul.f32 -1.442695, %v6204_v42  ;;  %v5136_v45 = vmul.f32 -1.442695, %v6207_v43  ;;  %5048 = vmatmul.msk.bf16.gmra.mxu0 %vm1254_vm2, %v5254_v36  ;;  %5064 = vmatmul.msk.bf16.gmra.mxu1 %vm1254_vm2, %v5270_v37 }
  0xe6   : > { %5080 = vmatmul.msk.bf16.gmra.mxu2 %vm1254_vm2, %v5286_v40  ;;  %5096 = vmatmul.msk.bf16.gmra.mxu3 %vm1254_vm2, %v5302_v41 }
  0xe7   : > { %5357 = vpow2.f32 %v5104_v44 }
  0xe8   : > { %5359 = vpow2.f32 %v5136_v45 }
  0xe9   : > { %v1620_v46 = vpop.f32.mrf.mxu2  ;;  %v1700_v47 = vpop.f32.mrf.mxu3 }
  0xea   : > { %v6216_v48 = vadd.f32 %v6197_v35, %v1620_v46  ;;  %v6219_v49 = vadd.f32 %v6197_v35, %v1700_v47  ;;  %v1462_v50 = vpop.f32.mrf.mxu0  ;;  %v1542_v51 = vpop.f32.mrf.mxu1 }
  0xeb   : > { %v6222_v52 = vadd.f32 %v6197_v35, %v1462_v50  ;;  %v6225_v53 = vadd.f32 %v6197_v35, %v1542_v51 }
  0xec   : > { %v5168_v54 = vmul.f32 -1.442695, %v6216_v48  ;;  %v5200_v55 = vmul.f32 -1.442695, %v6219_v49 }
  0xed   : > { %v5358_v56 = vpop.eup %5357  ;;  %v5105_v59 = vmul.f32 -1.442695, %v6222_v52  ;;  %v5137_v61 = vmul.f32 -1.442695, %v6225_v53 }
  0xee   : > { %v5360_v57 = vpop.eup %5359  ;;  %v6229_v58 = vadd.f32 1.0, %v5358_v56  ;;  %5361 = vpow2.f32 %v5168_v54 }
  0xef   : > { %v6232_v60 = vadd.f32 1.0, %v5360_v57  ;;  %5363 = vpow2.f32 %v5200_v55 }
  0xf0   : > { %5365 = vrcp.f32 %v6229_v58  ;;  %v2303_v7 = vand.u32 2147483648, %v6229_v58  ;;  %v2301_v10 = vand.u32 2147483647, %v6229_v58  ;;  %vm2297_vm3 = vweird.f32 %v6229_v58 }
  0xf1   : > { %5367 = vrcp.f32 %v6232_v60  ;;  %v1622_v62 = vpop.f32.mrf.mxu2  ;;  %v1702_v63 = vpop.f32.mrf.mxu3  ;;  %v2783_v11 = vand.u32 2147483648, %v6232_v60  ;;  %v2781_v14 = vand.u32 2147483647, %v6232_v60  ;;  %vm2777_vm4 = vweird.f32 %v6232_v60 }
  0xf2   : > { %5369 = vpow2.f32 %v5105_v59  ;;  %v6240_v2 = vadd.f32 %v6197_v35, %v1622_v62  ;;  %v1465_v5 = vpop.f32.mrf.mxu0  ;;  %v6246_v8 = vadd.f32 %v6197_v35, %v1702_v63  ;;  %v1545_v18 = vpop.f32.mrf.mxu1  ;;  %v2304_v22 = vor.u32 1.1754944e-38, %v2303_v7 }
  0xf3   : > { %5371 = vpow2.f32 %v5137_v61  ;;  %v6261_v17 = vadd.f32 %v6197_v35, %v1465_v5  ;;  %vm6275_vm5 = vcmp.eq.f32.partialorder %v2301_v10, 8.507059e+37  ;;  %v2784_v28 = vor.u32 1.1754944e-38, %v2783_v11 }
  0xf4   : > { %v5362_v6 = vpop.eup %5361  ;;  %v5169_v16 = vmul.f32 -1.442695, %v6240_v2  ;;  %v5201_v24 = vmul.f32 -1.442695, %v6246_v8  ;;  %v6281_v29 = vadd.f32 %v6197_v35, %v1545_v18  ;;  %vm6284_vm7 = vcmp.eq.f32.partialorder %v2781_v14, 8.507059e+37 }
  0xf5   : > { %v5364_v9 = vpop.eup %5363  ;;  %v6250_v12 = vadd.f32 1.0, %v5362_v6  ;;  %5049 = vmatmul.msk.bf16.gmra.mxu0 %vm1254_vm2, %v5255_v0  ;;  %5065 = vmatmul.msk.bf16.gmra.mxu1 %vm1254_vm2, %v5271_v1  ;;  %v6289_v32 = vmul.f32 -1.442695, %v6261_v17 }
  0xf6   : > { %v6254_v13 = vpop.eup %5365  ;;  %v6257_v15 = vadd.f32 1.0, %v5364_v9  ;;  %5081 = vmatmul.msk.bf16.gmra.mxu2 %vm1254_vm2, %v5287_v3  ;;  %5097 = vmatmul.msk.bf16.gmra.mxu3 %vm1254_vm2, %v5303_v4  ;;  %v6316_v51 = vmul.f32 -1.442695, %v6281_v29 }
  0xf7   : > { %v6265_v19 = vpop.eup %5367  ;;  %v2293_v20 = vmul.f32 %v6254_v13, %v6229_v58  ;;  %5373 = vrcp.f32 %v6250_v12  ;;  %vm2298_vm6 = vweird.f32 %v6254_v13  ;;  %v3261_v34 = vand.u32 2147483647, %v6250_v12 }
  0xf8   : > { %v5370_v21 = vpop.eup %5369  ;;  %v2773_v23 = vmul.f32 %v6265_v19, %v6232_v60  ;;  %5375 = vrcp.f32 %v6257_v15  ;;  %vm2778_vm8 = vweird.f32 %v6265_v19  ;;  %v3263_v39 = vand.u32 2147483648, %v6250_v12  ;;  %vm6308_vm9 = vmor %vm2297_vm3, %vm2298_vm6 }
  0xf9   : > { %v5372_v25 = vpop.eup %5371  ;;  %v2294_v26 = vsub.f32 1.0, %v2293_v20  ;;  %5377 = vpow2.f32 %v5169_v16  ;;  %v6293_v36 = vadd.f32 1.0, %v5370_v21  ;;  %v3741_v44 = vand.u32 2147483647, %v6257_v15  ;;  %v1625_v54 = vpop.f32.mrf.mxu2  ;;  %vm6325_vm11 = vmor %vm2777_vm4, %vm2778_vm8 }
  0xfa   : > { %v2774_v30 = vsub.f32 1.0, %v2773_v23  ;;  %v6295_v37 = vadd.f32 1.0, %v5372_v25  ;;  %5379 = vpow2.f32 %v5201_v24  ;;  %v3743_v45 = vand.u32 2147483648, %v6257_v15  ;;  %v1705_v57 = vpop.f32.mrf.mxu3 }
  0xfb   : > { %v2295_v33 = vmul.f32 %v6254_v13, %v2294_v26  ;;  %5381 = vrcp.f32 %v6293_v36  ;;  %vm3257_vm10 = vweird.f32 %v6250_v12  ;;  %vm6329_vm12 = vcmp.eq.f32.partialorder %v3261_v34, 8.507059e+37 }
  0xfc   : > { %v2775_v38 = vmul.f32 %v6265_v19, %v2774_v30  ;;  %vm3737_vm13 = vweird.f32 %v6257_v15  ;;  %5383 = vrcp.f32 %v6295_v37  ;;  %v3264_v60 = vor.u32 1.1754944e-38, %v3263_v39 }
  0xfd   : > { %v5374_v40 = vpop.eup %5373  ;;  %v2296_v41 = vadd.f32 %v6254_v13, %v2295_v33  ;;  %vm6339_vm15 = vcmp.eq.f32.partialorder %v3741_v44, 8.507059e+37  ;;  %v3744_v1 = vor.u32 1.1754944e-38, %v3743_v45  ;;  %v2316_v3 = vand.u32 2147483647, %v6293_v36 }
  0xfe   : > { %v2776_v47 = vadd.f32 %v6265_v19, %v2775_v38  ;;  %v3253_v50 = vmul.f32 %v5374_v40, %v6250_v12  ;;  %v5376_v55 = vpop.eup %5375  ;;  %v6345_v4 = vadd.f32 %v6197_v35, %v1625_v54  ;;  %vm3258_vm0 = vweird.f32 %v5374_v40 }
  0xff   : > { %v2300_v56 = vsel %vm6308_vm9, %v6254_v13, %v2296_v41  ;;  %v5378_v59 = vpop.eup %5377  ;;  %v3733_v63 = vmul.f32 %v5376_v55, %v6257_v15  ;;  %vm2312_vm1 = vweird.f32 %v6293_v36  ;;  %v2318_v13 = vand.u32 2147483648, %v6293_v36  ;;  %vm3259_vm4 = vmor %vm3257_vm10, %vm3258_vm0 }
 0x100   : > { %v2780_v61 = vsel %vm6325_vm11, %v6265_v19, %v2776_v47  ;;  %v3254_v62 = vsub.f32 1.0, %v3253_v50  ;;  %v5380_v5 = vpop.eup %5379  ;;  %v2305_v6 = vsel %vm6275_vm5, %v2304_v22, %v2300_v56  ;;  %v6353_v14 = vadd.f32 1.0, %v5378_v59 }
 0x101   : > { %v3734_v9 = vsub.f32 1.0, %v3733_v63  ;;  %v5382_v10 = vpop.eup %5381  ;;  %v2785_v11 = vsel %vm6284_vm7, %v2784_v28, %v2780_v61  ;;  %vm3738_vm3 = vweird.f32 %v5376_v55  ;;  %v4212_v21 = vmul.f32 %v2305_v6, %v6204_v42 }
 0x102   : > { %v3255_v7 = vmul.f32 %v5374_v40, %v3254_v62  ;;  %v2308_v19 = vmul.f32 %v5382_v10, %v6293_v36  ;;  %v5384_v20 = vpop.eup %5383  ;;  %vm6359_vm5 = vcmp.eq.f32.partialorder %v2316_v3, 8.507059e+37  ;;  %vm2792_vm6 = vweird.f32 %v6295_v37  ;;  %vm3739_vm7 = vmor %vm3737_vm13, %vm3738_vm3 }
 0x103   : > { %v3735_v18 = vmul.f32 %v5376_v55, %v3734_v9  ;;  %5385 = vrcp.f32 %v6353_v14  ;;  %v6365_v23 = vadd.f32 1.0, %v5380_v5  ;;  %v2788_v27 = vmul.f32 %v5384_v20, %v6295_v37  ;;  %v5272_v9 = vld [vmem:[%s6124_s11 + $0xd0] sm:$0xff] }
 0x104   : > { %v3256_v16 = vadd.f32 %v5374_v40, %v3255_v7  ;;  %v2309_v26 = vsub.f32 1.0, %v2308_v19  ;;  %v4244_v42 = vmul.f32 %v2785_v11, %v6207_v43  ;;  %v2796_v28 = vand.u32 2147483647, %v6295_v37  ;;  %v1547_v7 = vpop.f32.mrf.mxu1 }
 0x105   : > { %v3736_v25 = vadd.f32 %v5376_v55, %v3735_v18  ;;  %v2798_v30 = vand.u32 2147483648, %v6295_v37  ;;  %vm2313_vm8 = vweird.f32 %v5382_v10  ;;  %v2789_v34 = vsub.f32 1.0, %v2788_v27  ;;  %5066 = vmatmul.msk.bf16.gmra.mxu1 %vm1254_vm2, %v5272_v9 }
 0x106   : > { %v3260_v24 = vsel %vm3259_vm4, %v5374_v40, %v3256_v16  ;;  %v2310_v33 = vmul.f32 %v5382_v10, %v2309_v26  ;;  %v2319_v39 = vor.u32 1.1754944e-38, %v2318_v13  ;;  %v3276_v43 = vand.u32 2147483647, %v6353_v14  ;;  %vm2314_vm10 = vmor %vm2312_vm1, %vm2313_vm8  ;;  %v5304_v13 = vld [vmem:[%s6124_s11 + $0x1d0] sm:$0xff] }
 0x107   : > { %v3265_v12 = vsel %vm6329_vm12, %v3264_v60, %v3260_v24  ;;  %v3740_v31 = vsel %vm3739_vm7, %v5376_v55, %v3736_v25  ;;  %5387 = vrcp.f32 %v6365_v23  ;;  %v2790_v41 = vmul.f32 %v5384_v20, %v2789_v34  ;;  %5098 = vmatmul.msk.bf16.gmra.mxu3 %vm1254_vm2, %v5304_v13 }
 0x108   : > { %v4276_v38 = vmul.f32 %v3265_v12, %v6216_v48  ;;  %v3745_v40 = vsel %vm6339_vm15, %v3744_v1, %v3740_v31  ;;  %v2311_v15 = vadd.f32 %v5382_v10, %v2310_v33  ;;  %vm2793_vm9 = vweird.f32 %v5384_v20  ;;  %v1467_v1 = vpop.f32.mrf.mxu0 }
 0x109   : > { %v5386_v44 = vpop.eup %5385  ;;  %v6382_v45 = vsel %vm4341_vm14, %v4212_v21, 0.0  ;;  %v6385_v46 = vsel %vm4341_vm14, %v4244_v42, 0.0  ;;  %vm6389_vm11 = vcmp.eq.f32.partialorder %v2796_v28, 8.507059e+37  ;;  %v3278_v47 = vand.u32 2147483648, %v6353_v14  ;;  %vm2794_vm12 = vmor %vm2792_vm6, %vm2793_vm9 }
 0x10a   : > { %v2315_v50 = vsel %vm2314_vm10, %v5382_v10, %v2311_v15  ;;  %v2791_v54 = vadd.f32 %v5384_v20, %v2790_v41  ;;  %v2799_v55 = vor.u32 1.1754944e-38, %v2798_v30  ;;  %v3268_v56 = vmul.f32 %v5386_v44, %v6353_v14  ;;  %v5288_v10 = vld [vmem:[%s6124_s11 + $0x150] sm:$0xff]  ;;  %v1627_v30 = vpop.f32.mrf.mxu2 }
 0x10b   : > { %v6396_v58 = vsel %vm4341_vm14, %v4276_v38, 0.0  ;;  %v4308_v59 = vmul.f32 %v3745_v40, %v6219_v49  ;;  %vm3272_vm13 = vweird.f32 %v6353_v14  ;;  %vm6402_vm15 = vcmp.eq.f32.partialorder %v3276_v43, 8.507059e+37  ;;  %5082 = vmatmul.msk.bf16.gmra.mxu2 %vm1254_vm2, %v5288_v10  ;;  %v1707_v38 = vpop.f32.mrf.mxu3 }
 0x10c   : > { %v2320_v61 = vsel %vm6359_vm5, %v2319_v39, %v2315_v50  ;;  %v2795_v62 = vsel %vm2794_vm12, %v5384_v20, %v2791_v54  ;;  %v3269_v60 = vsub.f32 1.0, %v3268_v56  ;;  %5389 = vpow2.f32 %v6289_v32  ;;  %v5256_v32 = vld [vmem:[%s6124_s11 + $0x50] sm:$0xff] }
 0x10d   : > { %v5388_v49 = vpop.eup %5387  ;;  %v3279_v63 = vor.u32 1.1754944e-38, %v3278_v47  ;;  %5391 = vpow2.f32 %v6316_v51  ;;  %v5170_v37 = vmul.f32 -1.442695, %v6345_v4  ;;  %v6412_v0 = vadd.f32 %v6197_v35, %v1705_v57  ;;  %5050 = vmatmul.msk.bf16.gmra.mxu0 %vm1254_vm2, %v5256_v32 }
 0x10e   : > { %v2800_v3 = vsel %vm6389_vm11, %v2799_v55, %v2795_v62  ;;  %v3270_v5 = vmul.f32 %v5386_v44, %v3269_v60  ;;  %vm3273_vm0 = vweird.f32 %v5386_v44  ;;  %v3748_v6 = vmul.f32 %v5388_v49, %v6365_v23 }
 0x10f   : > { %v4213_v51 = vmul.f32 %v2320_v61, %v6222_v52  ;;  %vm3752_vm1 = vweird.f32 %v6365_v23  ;;  %5393 = vpow2.f32 %v5170_v37  ;;  %v5202_v11 = vmul.f32 -1.442695, %v6412_v0  ;;  %vm3274_vm3 = vmor %vm3272_vm13, %vm3273_vm0 }
 0x110   : > { %v3271_v16 = vadd.f32 %v5386_v44, %v3270_v5  ;;  %v3749_v18 = vsub.f32 1.0, %v3748_v6  ;;  %v3756_v19 = vand.u32 2147483647, %v6365_v23  ;;  %v6426_v20 = vadd.f32 %v6197_v35, %v1467_v1  ;;  %v1470_v60 = vpop.f32.mrf.mxu0 }
 0x111   : > { %v4245_v21 = vmul.f32 %v2800_v3, %v6225_v53  ;;  %v3758_v52 = vand.u32 2147483648, %v6365_v23  ;;  %5395 = vpow2.f32 %v5202_v11  ;;  %v6436_v22 = vadd.f32 %v6197_v35, %v1547_v7 }
 0x112   : > { %v5390_v24 = vpop.eup %5389  ;;  %v3275_v25 = vsel %vm3274_vm3, %v5386_v44, %v3271_v16  ;;  %v3750_v26 = vmul.f32 %v5388_v49, %v3749_v18  ;;  %vm3753_vm4 = vweird.f32 %v5388_v49  ;;  %v5107_v53 = vmul.f32 -1.442695, %v6426_v20 }
 0x113   : > { %v5392_v27 = vpop.eup %5391  ;;  %v4564_v14 = vsel %vm4341_vm14, %v4308_v59, 0.0  ;;  %v4343_v42 = vsel %vm4341_vm14, %v4213_v51, 0.0  ;;  %v3280_v12 = vsel %vm6402_vm15, %v3279_v63, %v3275_v25  ;;  %v6445_v28 = vadd.f32 1.0, %v5390_v24  ;;  %vm3754_vm5 = vmor %vm3752_vm1, %vm3753_vm4 }
 0x114   : > { %v4277_v31 = vmul.f32 %v3280_v12, %v6240_v2  ;;  %v3751_v33 = vadd.f32 %v5388_v49, %v3750_v26  ;;  %v6448_v34 = vadd.f32 1.0, %v5392_v27  ;;  %5397 = vpow2.f32 %v5107_v53 }
 0x115   : > { %v5394_v39 = vpop.eup %5393  ;;  %vm3757_vm6 = vcmp.eq.f32.partialorder %v3756_v19, 8.507059e+37  ;;  %v3759_v43 = vor.u32 1.1754944e-38, %v3758_v52  ;;  %5399 = vrcp.f32 %v6445_v28  ;;  %v5139_v40 = vmul.f32 -1.442695, %v6436_v22  ;;  %v1550_v52 = vpop.f32.mrf.mxu1 }
 0x116   : > { %v4417_v15 = vsel %vm4341_vm14, %v4245_v21, 0.0  ;;  %v3755_v41 = vsel %vm3754_vm5, %v5388_v49, %v3751_v33  ;;  %5401 = vrcp.f32 %v6448_v34  ;;  %v6457_v2 = vadd.f32 %v6197_v35, %v1627_v30 }
 0x117   : > { %v5396_v44 = vpop.eup %5395  ;;  %v6460_v48 = vadd.f32 %v4343_v42, %v6382_v45  ;;  %v3760_v23 = vsel %vm3757_vm6, %v3759_v43, %v3755_v41  ;;  %v2333_v47 = vand.u32 2147483648, %v6445_v28  ;;  %v6464_v50 = vadd.f32 %v6197_v35, %v1707_v38 }
 0x118   : > { %v4491_v54 = vsel %vm4341_vm14, %v4277_v31, 0.0  ;;  %v4309_v55 = vmul.f32 %v3760_v23, %v6246_v8  ;;  %v2331_v56 = vand.u32 2147483647, %v6445_v28  ;;  %v6469_v57 = vadd.f32 1.0, %v5394_v39 }
 0x119   : > { %v6472_v59 = vadd.f32 %v4417_v15, %v6385_v46  ;;  %v2811_v45 = vand.u32 2147483647, %v6448_v34  ;;  %v6475_v36 = vadd.f32 1.0, %v5396_v44  ;;  %5403 = vpow2.f32 %v5139_v40 }
 0x11a   : > { %v5398_v61 = vpop.eup %5397  ;;  %vm2327_vm7 = vweird.f32 %v6445_v28  ;;  %v2813_v62 = vand.u32 2147483648, %v6448_v34  ;;  %5405 = vrcp.f32 %v6469_v57  ;;  %v5171_v8 = vmul.f32 -1.442695, %v6457_v2 }
 0x11b   : > { %v5400_v49 = vpop.eup %5399  ;;  %v6482_v63 = vadd.f32 %v4491_v54, %v6396_v58  ;;  %v4565_v46 = vsel %vm4341_vm14, %v4309_v55, 0.0  ;;  %v2334_v37 = vor.u32 1.1754944e-38, %v2333_v47  ;;  %vm2807_vm8 = vweird.f32 %v6448_v34 }
 0x11c   : > { %v5402_v1 = vpop.eup %5401  ;;  %v2323_v3 = vmul.f32 %v5400_v49, %v6445_v28  ;;  %vm6487_vm9 = vcmp.eq.f32.partialorder %v2331_v56, 8.507059e+37  ;;  %v3293_v6 = vand.u32 2147483648, %v6469_v57  ;;  %5407 = vrcp.f32 %v6475_v36 }
 0x11d   : > { %v6494_v7 = vmul.f32 -1.442695, %v6464_v50  ;;  %v2803_v58 = vmul.f32 %v5402_v1, %v6448_v34  ;;  %vm6497_vm10 = vcmp.eq.f32.partialorder %v2811_v45, 8.507059e+37  ;;  %v3291_v9 = vand.u32 2147483647, %v6469_v57 }
 0x11e   : > { %v6503_v10 = vadd.f32 %v6197_v35, %v1470_v60  ;;  %v6505_v51 = vadd.f32 %v4565_v46, %v4564_v14  ;;  %v2324_v11 = vsub.f32 1.0, %v2323_v3  ;;  %v2814_v13 = vor.u32 1.1754944e-38, %v2813_v62 }
 0x11f   : > { %v6507_v16 = vadd.f32 1.0, %v5398_v61  ;;  %v5404_v18 = vpop.eup %5403  ;;  %vm2328_vm11 = vweird.f32 %v5400_v49  ;;  %v2804_v19 = vsub.f32 1.0, %v2803_v58  ;;  %vm3287_vm12 = vweird.f32 %v6469_v57 }
 0x120   : > { %v3771_v21 = vand.u32 2147483647, %v6475_v36  ;;  %v5406_v24 = vpop.eup %5405  ;;  %v2325_v25 = vmul.f32 %v5400_v49, %v2324_v11  ;;  %vm2808_vm13 = vweird.f32 %v5402_v1  ;;  %v3294_v26 = vor.u32 1.1754944e-38, %v3293_v6  ;;  %vm2329_vm1 = vmor %vm2327_vm7, %vm2328_vm11 }
 0x121   : > { %5409 = vrcp.f32 %v6507_v16  ;;  %v2805_v53 = vmul.f32 %v5402_v1, %v2804_v19  ;;  %v3283_v27 = vmul.f32 %v5406_v24, %v6469_v57  ;;  %vm6513_vm15 = vcmp.eq.f32.partialorder %v3291_v9, 8.507059e+37  ;;  %vm2809_vm4 = vmor %vm2807_vm8, %vm2808_vm13 }
 0x122   : > { %vm3767_vm0 = vweird.f32 %v6475_v36  ;;  %v3773_v42 = vand.u32 2147483648, %v6475_v36  ;;  %5411 = vpow2.f32 %v5171_v8  ;;  %v5408_v12 = vpop.eup %5407  ;;  %v2326_v30 = vadd.f32 %v5400_v49, %v2325_v25 }
 0x123   : > { %v6519_v31 = vadd.f32 1.0, %v5404_v18  ;;  %v5108_v33 = vmul.f32 -1.442695, %v6503_v10  ;;  %v6523_v38 = vadd.f32 %v6197_v35, %v1550_v52  ;;  %v2806_v39 = vadd.f32 %v5402_v1, %v2805_v53 }
 0x124   : > { %v3284_v43 = vsub.f32 1.0, %v3283_v27  ;;  %v3763_v40 = vmul.f32 %v5408_v12, %v6475_v36  ;;  %vm6529_vm3 = vcmp.eq.f32.partialorder %v3771_v21, 8.507059e+37  ;;  %v2330_v41 = vsel %vm2329_vm1, %v5400_v49, %v2326_v30 }
 0x125   : > { %vm3288_vm5 = vweird.f32 %v5406_v24  ;;  %v2346_v44 = vand.u32 2147483647, %v6507_v16  ;;  %5413 = vrcp.f32 %v6519_v31  ;;  %v2335_v28 = vsel %vm6487_vm9, %v2334_v37, %v2330_v41 }
 0x126   : > { %v2810_v23 = vsel %vm2809_vm4, %v5402_v1, %v2806_v39  ;;  %v3285_v47 = vmul.f32 %v5406_v24, %v3284_v43  ;;  %v3764_v54 = vsub.f32 1.0, %v3763_v40  ;;  %v4214_v56 = vmul.f32 %v2335_v28, %v6261_v17  ;;  %vm3289_vm7 = vmor %vm3287_vm12, %vm3288_vm5  ;;  %v1710_v39 = vpop.f32.mrf.mxu3  ;;  %v1472_v28 = vpop.f32.mrf.mxu0  ;;  %v5273_v17 = vld [vmem:[%s6124_s11 + $0xd8] sm:$0xff] }
 0x127   : > { %v5410_v55 = vpop.eup %5409  ;;  %v2815_v45 = vsel %vm6497_vm10, %v2814_v13, %v2810_v23  ;;  %vm3768_vm6 = vweird.f32 %v5408_v12  ;;  %v3774_v34 = vor.u32 1.1754944e-38, %v3773_v42  ;;  %vm2342_vm8 = vweird.f32 %v6507_v16  ;;  %5067 = vmatmul.msk.bf16.gmra.mxu1 %vm1254_vm2, %v5273_v17 }
 0x128   : > { %v5412_v61 = vpop.eup %5411  ;;  %v4246_v62 = vmul.f32 %v2815_v45, %v6281_v29  ;;  %v3286_v8 = vadd.f32 %v5406_v24, %v3285_v47  ;;  %v3765_v60 = vmul.f32 %v5408_v12, %v3764_v54  ;;  %v2338_v49 = vmul.f32 %v5410_v55, %v6507_v16  ;;  %vm3769_vm10 = vmor %vm3767_vm0, %vm3768_vm6 }
 0x129   : > { %v4345_v46 = vsel %vm4341_vm14, %v4214_v56, 0.0  ;;  %vm6550_vm9 = vcmp.eq.f32.partialorder %v2346_v44, 8.507059e+37  ;;  %v2348_v37 = vand.u32 2147483648, %v6507_v16  ;;  %v2826_v9 = vand.u32 2147483647, %v6519_v31 }
 0x12a   : > { %v6556_v29 = vadd.f32 %v4345_v46, %v6460_v48  ;;  %v4419_v1 = vsel %vm4341_vm14, %v4246_v62, 0.0  ;;  %v3290_v3 = vsel %vm3289_vm7, %v5406_v24, %v3286_v8  ;;  %v3766_v5 = vadd.f32 %v5408_v12, %v3765_v60  ;;  %v1630_v24 = vpop.f32.mrf.mxu2  ;;  %v5257_v46 = vld [vmem:[%s6124_s11 + $0x58] sm:$0xff] }
 0x12b   : > { %v5414_v6 = vpop.eup %5413  ;;  %v6560_v58 = vadd.f32 %v4419_v1, %v6472_v59  ;;  %v3295_v57 = vsel %vm6513_vm15, %v3294_v26, %v3290_v3  ;;  %v2339_v32 = vsub.f32 1.0, %v2338_v49  ;;  %vm2343_vm11 = vweird.f32 %v5410_v55  ;;  %5051 = vmatmul.msk.bf16.gmra.mxu0 %vm1254_vm2, %v5257_v46 }
 0x12c   : > { %v4278_v48 = vmul.f32 %v3295_v57, %v6345_v4  ;;  %v3770_v11 = vsel %vm3769_vm10, %v5408_v12, %v3766_v5  ;;  %v2818_v13 = vmul.f32 %v5414_v6, %v6519_v31  ;;  %v6572_v19 = vadd.f32 1.0, %v5412_v61  ;;  %vm2344_vm12 = vmor %vm2342_vm8, %vm2343_vm11  ;;  %v5305_v57 = vld [vmem:[%s6124_s11 + $0x1d8] sm:$0xff] }
 0x12d   : > { %v3775_v59 = vsel %vm6529_vm3, %v3774_v34, %v3770_v11  ;;  %v2340_v18 = vmul.f32 %v5410_v55, %v2339_v32  ;;  %5415 = vpow2.f32 %v6494_v7  ;;  %v2828_v26 = vand.u32 2147483648, %v6519_v31  ;;  %5099 = vmatmul.msk.bf16.gmra.mxu3 %vm1254_vm2, %v5305_v57 }
 0x12e   : > { %v4493_v36 = vsel %vm4341_vm14, %v4278_v48, 0.0  ;;  %v4310_v21 = vmul.f32 %v3775_v59, %v6412_v0  ;;  %v2819_v52 = vsub.f32 1.0, %v2818_v13  ;;  %5417 = vpow2.f32 %v5108_v33 }
 0x12f   : > { %v6578_v4 = vadd.f32 %v4493_v36, %v6482_v63  ;;  %v2341_v25 = vadd.f32 %v5410_v55, %v2340_v18  ;;  %5419 = vrcp.f32 %v6572_v19  ;;  %v2349_v7 = vor.u32 1.1754944e-38, %v2348_v37 }
 0x130   : > { %v4567_v53 = vsel %vm4341_vm14, %v4310_v21, 0.0  ;;  %v2820_v27 = vmul.f32 %v5414_v6, %v2819_v52  ;;  %vm2823_vm13 = vweird.f32 %v5414_v6  ;;  %v5140_v63 = vmul.f32 -1.442695, %v6523_v38 }
 0x131   : > { %v6587_v0 = vadd.f32 %v4567_v53, %v6505_v51  ;;  %v2345_v14 = vsel %vm2344_vm12, %v5410_v55, %v2341_v25  ;;  %v6591_v42 = vadd.f32 %v6197_v35, %v1630_v24  ;;  %vm2822_vm15 = vweird.f32 %v6519_v31 }
 0x132   : > { %v2350_v12 = vsel %vm6550_vm9, %v2349_v7, %v2345_v14  ;;  %v2821_v30 = vadd.f32 %v5414_v6, %v2820_v27  ;;  %vm2824_vm0 = vmor %vm2822_vm15, %vm2823_vm13  ;;  %vm2827_vm1 = vcmp.eq.f32.partialorder %v2826_v9, 8.507059e+37  ;;  %v2829_v33 = vor.u32 1.1754944e-38, %v2828_v26  ;;  %v1632_v59 = vpop.f32.mrf.mxu2 }
 0x133   : > { %v5416_v16 = vpop.eup %5415  ;;  %5421 = vpow2.f32 %v5140_v63  ;;  %v5172_v51 = vmul.f32 -1.442695, %v6591_v42  ;;  %v4215_v40 = vmul.f32 %v2350_v12, %v6426_v20  ;;  %v3306_v41 = vand.u32 2147483647, %v6572_v19 }
 0x134   : > { %v5418_v43 = vpop.eup %5417  ;;  %v2825_v15 = vsel %vm2824_vm0, %v5414_v6, %v2821_v30  ;;  %v6599_v44 = vadd.f32 1.0, %v5416_v16  ;;  %v3308_v31 = vand.u32 2147483648, %v6572_v19  ;;  %v6607_v20 = vadd.f32 %v6197_v35, %v1710_v39  ;;  %v5289_v6 = vld [vmem:[%s6124_s11 + $0x158] sm:$0xff] }
 0x135   : > { %v5420_v23 = vpop.eup %5419  ;;  %v2830_v47 = vsel %vm2827_vm1, %v2829_v33, %v2825_v15  ;;  %v6602_v54 = vadd.f32 1.0, %v5418_v43  ;;  %5423 = vpow2.f32 %v5172_v51  ;;  %v6611_v45 = vadd.f32 %v6197_v35, %v1472_v28  ;;  %5083 = vmatmul.msk.bf16.gmra.mxu2 %vm1254_vm2, %v5289_v6 }
 0x136   : > { %v4247_v55 = vmul.f32 %v2830_v47, %v6436_v22  ;;  %v3298_v56 = vmul.f32 %v5420_v23, %v6572_v19  ;;  %5425 = vrcp.f32 %v6599_v44  ;;  %v4347_v34 = vsel %vm4341_vm14, %v4215_v40, 0.0  ;;  %v1552_v22 = vpop.f32.mrf.mxu1 }
 0x137   : > { %vm3302_vm3 = vweird.f32 %v6572_v19  ;;  %5427 = vrcp.f32 %v6602_v54  ;;  %vm3303_vm4 = vweird.f32 %v5420_v23  ;;  %vm6616_vm5 = vcmp.eq.f32.partialorder %v3306_v41, 8.507059e+37 }
 0x138   : > { %v3299_v61 = vsub.f32 1.0, %v3298_v56  ;;  %v3309_v60 = vor.u32 1.1754944e-38, %v3308_v31  ;;  %v3786_v49 = vand.u32 2147483647, %v6599_v44  ;;  %v4421_v37 = vsel %vm4341_vm14, %v4247_v55, 0.0  ;;  %vm3304_vm7 = vmor %vm3302_vm3, %vm3303_vm4 }
 0x139   : > { %v5422_v62 = vpop.eup %5421  ;;  %v5204_v5 = vmul.f32 -1.442695, %v6607_v20  ;;  %v6630_v9 = vadd.f32 %v4347_v34, %v6556_v29  ;;  %v3788_v48 = vand.u32 2147483648, %v6599_v44  ;;  %v5109_v11 = vmul.f32 -1.442695, %v6611_v45 }
 0x13a   : > { %v3300_v1 = vmul.f32 %v5420_v23, %v3299_v61  ;;  %v6624_v3 = vadd.f32 1.0, %v5422_v62  ;;  %v6635_v13 = vadd.f32 %v6197_v35, %v1552_v22  ;;  %vm3782_vm6 = vweird.f32 %v6599_v44 }
 0x13b   : > { %v5424_v32 = vpop.eup %5423  ;;  %v2361_v36 = vand.u32 2147483647, %v6602_v54  ;;  %v6645_v21 = vadd.f32 %v4421_v37, %v6560_v58  ;;  %vm2357_vm8 = vweird.f32 %v6602_v54  ;;  %v2363_v52 = vand.u32 2147483648, %v6602_v54 }
 0x13c   : > { %v3301_v18 = vadd.f32 %v5420_v23, %v3300_v1  ;;  %5429 = vrcp.f32 %v6624_v3  ;;  %v5426_v29 = vpop.eup %5425  ;;  %v6652_v24 = vadd.f32 1.0, %v5424_v32  ;;  %vm6655_vm9 = vcmp.eq.f32.partialorder %v3786_v49, 8.507059e+37 }
 0x13d   : > { %5431 = vpow2.f32 %v5204_v5  ;;  %v5428_v25 = vpop.eup %5427  ;;  %v3778_v53 = vmul.f32 %v5426_v29, %v6599_v44  ;;  %v6660_v58 = vadd.f32 %v6197_v35, %v1632_v59  ;;  %v3789_v27 = vor.u32 1.1754944e-38, %v3788_v48 }
 0x13e   : > { %v3305_v26 = vsel %vm3304_vm7, %v5420_v23, %v3301_v18  ;;  %5433 = vpow2.f32 %v5109_v11  ;;  %v2353_v14 = vmul.f32 %v5428_v25, %v6602_v54  ;;  %v2841_v63 = vand.u32 2147483647, %v6624_v3 }
 0x13f   : > { %v3310_v19 = vsel %vm6616_vm5, %v3309_v60, %v3305_v26  ;;  %v3779_v12 = vsub.f32 1.0, %v3778_v53  ;;  %vm6666_vm10 = vcmp.eq.f32.partialorder %v2361_v36, 8.507059e+37  ;;  %5435 = vrcp.f32 %v6652_v24 }
 0x140   : > { %v5141_v16 = vmul.f32 -1.442695, %v6635_v13  ;;  %v4279_v35 = vmul.f32 %v3310_v19, %v6457_v2  ;;  %v2354_v33 = vsub.f32 1.0, %v2353_v14  ;;  %v2364_v51 = vor.u32 1.1754944e-38, %v2363_v52 }
 0x141   : > { %vm2837_vm11 = vweird.f32 %v6624_v3  ;;  %v3780_v43 = vmul.f32 %v5426_v29, %v3779_v12  ;;  %vm3783_vm12 = vweird.f32 %v5426_v29  ;;  %v2843_v40 = vand.u32 2147483648, %v6624_v3 }
 0x142   : > { %v5430_v39 = vpop.eup %5429  ;;  %v5173_v15 = vmul.f32 -1.442695, %v6660_v58  ;;  %v2355_v28 = vmul.f32 %v5428_v25, %v2354_v33  ;;  %vm2358_vm13 = vweird.f32 %v5428_v25  ;;  %vm6677_vm15 = vcmp.eq.f32.partialorder %v2841_v63, 8.507059e+37  ;;  %vm3784_vm0 = vmor %vm3782_vm6, %vm3783_vm12  ;;  %v1475_v33 = vpop.f32.mrf.mxu0 }
 0x143   : > { %v5432_v41 = vpop.eup %5431  ;;  %v2833_v23 = vmul.f32 %v5430_v39, %v6624_v3  ;;  %v3781_v31 = vadd.f32 %v5426_v29, %v3780_v43  ;;  %v3321_v55 = vand.u32 2147483647, %v6652_v24  ;;  %5437 = vpow2.f32 %v5141_v16  ;;  %vm2359_vm1 = vmor %vm2357_vm8, %vm2358_vm13 }
 0x144   : > { %v5434_v2 = vpop.eup %5433  ;;  %v6682_v56 = vadd.f32 1.0, %v5432_v41  ;;  %v4495_v34 = vsel %vm4341_vm14, %v4279_v35, 0.0  ;;  %v2356_v61 = vadd.f32 %v5428_v25, %v2355_v28  ;;  %5439 = vpow2.f32 %v5173_v15  ;;  %v6747_v28 = vld [vmem:[%s9757_s2] ss:$0 sm:$0xff] }
 0x145   : > { %v2834_v22 = vsub.f32 1.0, %v2833_v23  ;;  %v5436_v62 = vpop.eup %5435  ;;  %v3785_v8 = vsel %vm3784_vm0, %v5426_v29, %v3781_v31  ;;  %vm2838_vm3 = vweird.f32 %v5430_v39  ;;  %v6691_v60 = vadd.f32 1.0, %v5434_v2 }
 0x146   : > { %5441 = vrcp.f32 %v6682_v56  ;;  %v3790_v49 = vsel %vm6655_vm9, %v3789_v27, %v3785_v8  ;;  %v2360_v46 = vsel %vm2359_vm1, %v5428_v25, %v2356_v61  ;;  %v3313_v17 = vmul.f32 %v5436_v62, %v6652_v24  ;;  %vm2839_vm5 = vmor %vm2837_vm11, %vm2838_vm3 }
 0x147   : > { %v2835_v44 = vmul.f32 %v5430_v39, %v2834_v22  ;;  %v2365_v37 = vsel %vm6666_vm10, %v2364_v51, %v2360_v46  ;;  %v2844_v1 = vor.u32 1.1754944e-38, %v2843_v40  ;;  %vm3317_vm4 = vweird.f32 %v6652_v24  ;;  %v1635_v46 = vpop.f32.mrf.mxu2 }
 0x148   : > { %v3323_v54 = vand.u32 2147483648, %v6652_v24  ;;  %v4216_v5 = vmul.f32 %v2365_v37, %v6503_v10  ;;  %v3314_v57 = vsub.f32 1.0, %v3313_v17  ;;  %v3801_v32 = vand.u32 2147483647, %v6682_v56 }
 0x149   : > { %v2836_v6 = vadd.f32 %v5430_v39, %v2835_v44  ;;  %v5438_v48 = vpop.eup %5437  ;;  %v4496_v11 = vadd.f32 %v4495_v34, %v6578_v4  ;;  %v4311_v59 = vmul.f32 %v3790_v49, %v6464_v50  ;;  %vm6707_vm6 = vcmp.eq.f32.partialorder %v3321_v55, 8.507059e+37  ;;  %v1555_v34 = vpop.f32.mrf.mxu1 }
 0x14a   : > { %5443 = vrcp.f32 %v6691_v60  ;;  %v5440_v10 = vpop.eup %5439  ;;  %v4349_v36 = vsel %vm4341_vm14, %v4216_v5, 0.0  ;;  %v3315_v52 = vmul.f32 %v5436_v62, %v3314_v57  ;;  %vm3318_vm7 = vweird.f32 %v5436_v62 }
 0x14b   : > { %v2840_v29 = vsel %vm2839_vm5, %v5430_v39, %v2836_v6  ;;  %v6714_v4 = vadd.f32 %v4349_v36, %v6630_v9  ;;  %v3324_v3 = vor.u32 1.1754944e-38, %v3323_v54  ;;  %vm3797_vm8 = vweird.f32 %v6682_v56  ;;  %vm3319_vm10 = vmor %vm3317_vm4, %vm3318_vm7 }
 0x14c   : > { %v5442_v25 = vpop.eup %5441  ;;  %v2845_v50 = vsel %vm6677_vm15, %v2844_v1, %v2840_v29  ;;  %v3316_v53 = vadd.f32 %v5436_v62, %v3315_v52  ;;  %vm6721_vm9 = vcmp.eq.f32.partialorder %v3801_v32, 8.507059e+37  ;;  %v3803_v27 = vand.u32 2147483648, %v6682_v56  ;;  %v1477_v29 = vpop.f32.mrf.mxu0 }
 0x14d   : > { %v4248_v26 = vmul.f32 %v2845_v50, %v6523_v38  ;;  %v3793_v7 = vmul.f32 %v5442_v25, %v6682_v56  ;;  %v4569_v9 = vsel %vm4341_vm14, %v4311_v59, 0.0  ;;  %v2376_v14 = vand.u32 2147483647, %v6691_v60  ;;  %v1712_v38 = vpop.f32.mrf.mxu3 }
 0x14e   : > { %v6730_v63 = vadd.f32 1.0, %v5438_v48  ;;  %v6732_v12 = vadd.f32 1.0, %v5440_v10  ;;  %v3320_v16 = vsel %vm3319_vm10, %v5436_v62, %v3316_v53  ;;  %vm3798_vm11 = vweird.f32 %v5442_v25 }
 0x14f   : > { %v4423_v30 = vsel %vm4341_vm14, %v4248_v26, 0.0  ;;  %v3794_v35 = vsub.f32 1.0, %v3793_v7  ;;  %v3325_v24 = vsel %vm6707_vm6, %v3324_v3, %v3320_v16  ;;  %v2378_v43 = vand.u32 2147483648, %v6691_v60  ;;  %vm3799_vm13 = vmor %vm3797_vm8, %vm3798_vm11 }
 0x150   : > { %v5444_v51 = vpop.eup %5443  ;;  %v6736_v39 = vadd.f32 %v4423_v30, %v6645_v21  ;;  %5445 = vrcp.f32 %v6730_v63  ;;  %v4280_v40 = vmul.f32 %v3325_v24, %v6591_v42  ;;  %v6750_v21 = vadd.f32 %v6747_v28, %v1712_v38 }
 0x151   : > { %v3795_v15 = vmul.f32 %v5442_v25, %v3794_v35  ;;  %v2368_v41 = vmul.f32 %v5444_v51, %v6691_v60  ;;  %v4570_v23 = vadd.f32 %v4569_v9, %v6587_v0  ;;  %vm2372_vm12 = vweird.f32 %v6691_v60  ;;  %v5258_v0 = vld [vmem:[%s6124_s11 + $0x60] sm:$0xff] }
 0x152   : > { %5447 = vrcp.f32 %v6732_v12  ;;  %v6756_v47 = vadd.f32 %v6747_v28, %v1475_v33  ;;  %v4497_v42 = vsel %vm4341_vm14, %v4280_v40, 0.0  ;;  %v3804_v31 = vor.u32 1.1754944e-38, %v3803_v27  ;;  %5052 = vmatmul.msk.bf16.gmra.mxu0 %vm1254_vm2, %v5258_v0 }
 0x153   : > { %v3796_v2 = vadd.f32 %v5442_v25, %v3795_v15  ;;  %v2369_v55 = vsub.f32 1.0, %v2368_v41  ;;  %v6759_v61 = vadd.f32 %v4497_v42, %v4496_v11  ;;  %vm2373_vm15 = vweird.f32 %v5444_v51 }
 0x154   : > { %vm6764_vm0 = vcmp.eq.f32.partialorder %v2376_v14, 8.507059e+37  ;;  %v2379_v22 = vor.u32 1.1754944e-38, %v2378_v43  ;;  %vm2852_vm1 = vweird.f32 %v6730_v63  ;;  %v5205_v49 = vmul.f32 -1.442695, %v6750_v21  ;;  %vm6783_vm3 = vmor %vm2372_vm12, %vm2373_vm15 }
 0x155   : > { %v3800_v62 = vsel %vm3799_vm13, %v5442_v25, %v3796_v2  ;;  %v2370_v8 = vmul.f32 %v5444_v51, %v2369_v55  ;;  %v2856_v56 = vand.u32 2147483647, %v6730_v63  ;;  %v5110_v37 = vmul.f32 -1.442695, %v6756_v47  ;;  %v1715_v36 = vpop.f32.mrf.mxu3 }
 0x156   : > { %v5446_v44 = vpop.eup %5445  ;;  %v3805_v17 = vsel %vm6721_vm9, %v3804_v31, %v3800_v62  ;;  %v6775_v1 = vadd.f32 %v6747_v28, %v1555_v34  ;;  %v2858_v57 = vand.u32 2147483648, %v6730_v63  ;;  %vm3332_vm4 = vweird.f32 %v6732_v12 }
 0x157   : > { %v4312_v54 = vmul.f32 %v3805_v17, %v6607_v20  ;;  %v2371_v5 = vadd.f32 %v5444_v51, %v2370_v8  ;;  %v2848_v6 = vmul.f32 %v5446_v44, %v6730_v63  ;;  %5449 = vpow2.f32 %v5205_v49 }
 0x158   : > { %v5448_v32 = vpop.eup %5447  ;;  %v5142_v11 = vmul.f32 -1.442695, %v6775_v1  ;;  %v6790_v20 = vadd.f32 %v6747_v28, %v1635_v46  ;;  %vm2853_vm5 = vweird.f32 %v5446_v44  ;;  %vm6798_vm6 = vcmp.eq.f32.partialorder %v2856_v56, 8.507059e+37 }
 0x159   : > { %v4571_v59 = vsel %vm4341_vm14, %v4312_v54, 0.0  ;;  %v2375_v18 = vsel %vm6783_vm3, %v5444_v51, %v2371_v5  ;;  %v2849_v10 = vsub.f32 1.0, %v2848_v6  ;;  %v3328_v60 = vmul.f32 %v5448_v32, %v6732_v12  ;;  %vm2854_vm8 = vmor %vm2852_vm1, %vm2853_vm5  ;;  %v1557_v51 = vpop.f32.mrf.mxu1 }
 0x15a   : > { %v6796_v52 = vadd.f32 %v4571_v59, %v4570_v23  ;;  %5451 = vpow2.f32 %v5110_v37  ;;  %v2380_v50 = vsel %vm6764_vm0, %v2379_v22, %v2375_v18  ;;  %v3338_v53 = vand.u32 2147483648, %v6732_v12  ;;  %v5290_v22 = vld [vmem:[%s6124_s11 + $0x160] sm:$0xff] }
 0x15b   : > { %v2850_v3 = vmul.f32 %v5446_v44, %v2849_v10  ;;  %v3329_v26 = vsub.f32 1.0, %v3328_v60  ;;  %5453 = vpow2.f32 %v5142_v11  ;;  %v5174_v7 = vmul.f32 -1.442695, %v6790_v20  ;;  %5084 = vmatmul.msk.bf16.gmra.mxu2 %vm1254_vm2, %v5290_v22 }
 0x15c   : > { %v6807_v19 = vadd.f32 %v6747_v28, %v1715_v36  ;;  %v6810_v27 = vadd.f32 %v6747_v28, %v1477_v29  ;;  %v2859_v14 = vor.u32 1.1754944e-38, %v2858_v57  ;;  %vm3333_vm7 = vweird.f32 %v5448_v32 }
 0x15d   : > { %v2851_v9 = vadd.f32 %v5446_v44, %v2850_v3  ;;  %v3330_v38 = vmul.f32 %v5448_v32, %v3329_v26  ;;  %v5450_v30 = vpop.eup %5449  ;;  %v4217_v16 = vmul.f32 %v2380_v50, %v6611_v45  ;;  %v3336_v35 = vand.u32 2147483647, %v6732_v12  ;;  %v1637_v45 = vpop.f32.mrf.mxu2  ;;  %vm6826_vm9 = vmor %vm3332_vm4, %vm3333_vm7  ;;  %v5274_v12 = vld [vmem:[%s6124_s11 + $0xe0] sm:$0xff] }
 0x15e   : > { %5455 = vpow2.f32 %v5174_v7  ;;  %v5206_v33 = vmul.f32 -1.442695, %v6807_v19  ;;  %v6818_v40 = vadd.f32 1.0, %v5450_v30  ;;  %v5111_v15 = vmul.f32 -1.442695, %v6810_v27  ;;  %v1717_v17 = vpop.f32.mrf.mxu3  ;;  %5068 = vmatmul.msk.bf16.gmra.mxu1 %vm1254_vm2, %v5274_v12 }
 0x15f   : > { %v2855_v24 = vsel %vm2854_vm8, %v5446_v44, %v2851_v9  ;;  %v3331_v43 = vadd.f32 %v5448_v32, %v3330_v38  ;;  %v3339_v42 = vor.u32 1.1754944e-38, %v3338_v53  ;;  %v6835_v34 = vadd.f32 %v6747_v28, %v1557_v51 }
 0x160   : > { %v5452_v41 = vpop.eup %5451  ;;  %v2860_v63 = vsel %vm6798_vm6, %v2859_v14, %v2855_v24  ;;  %5457 = vpow2.f32 %v5206_v33  ;;  %v4351_v62 = vsel %vm4341_vm14, %v4217_v16, 0.0  ;;  %vm3337_vm10 = vcmp.eq.f32.partialorder %v3336_v35, 8.507059e+37 }
 0x161   : > { %v5454_v2 = vpop.eup %5453  ;;  %v4249_v31 = vmul.f32 %v2860_v63, %v6635_v13  ;;  %v3335_v55 = vsel %vm6826_vm9, %v5448_v32, %v3331_v43  ;;  %5459 = vrcp.f32 %v6818_v40  ;;  %v6841_v8 = vadd.f32 1.0, %v5452_v41  ;;  %v5306_v13 = vld [vmem:[%s6124_s11 + $0x1e0] sm:$0xff] }
 0x162   : > { %v6844_v49 = vadd.f32 %v6747_v28, %v1637_v45  ;;  %v3340_v46 = vsel %vm3337_vm10, %v3339_v42, %v3335_v55  ;;  %v6847_v44 = vadd.f32 1.0, %v5454_v2  ;;  %5461 = vpow2.f32 %v5111_v15  ;;  %5100 = vmatmul.msk.bf16.gmra.mxu3 %vm1254_vm2, %v5306_v13 }
 0x163   : > { %v3816_v37 = vand.u32 2147483647, %v6818_v40  ;;  %5463 = vrcp.f32 %v6841_v8  ;;  %v6856_v54 = vadd.f32 %v4351_v62, %v6714_v4  ;;  %v4425_v5 = vsel %vm4341_vm14, %v4249_v31, 0.0 }
 0x164   : > { %v5456_v56 = vpop.eup %5455  ;;  %v3818_v6 = vand.u32 2147483648, %v6818_v40  ;;  %v5143_v57 = vmul.f32 -1.442695, %v6835_v34  ;;  %v4281_v48 = vmul.f32 %v3340_v46, %v6660_v58  ;;  %5465 = vrcp.f32 %v6847_v44 }
 0x165   : > { %v6864_v11 = vmul.f32 -1.442695, %v6844_v49  ;;  %v6867_v59 = vadd.f32 %v6747_v28, %v1717_v17  ;;  %vm3812_vm11 = vweird.f32 %v6818_v40  ;;  %v2391_v4 = vand.u32 2147483647, %v6841_v8 }
 0x166   : > { %v5458_v32 = vpop.eup %5457  ;;  %v2393_v10 = vand.u32 2147483648, %v6841_v8  ;;  %v6872_v60 = vadd.f32 1.0, %v5456_v56  ;;  %v6875_v36 = vadd.f32 %v4425_v5, %v6736_v39  ;;  %vm6878_vm12 = vcmp.eq.f32.partialorder %v3816_v37, 8.507059e+37 }
 0x167   : > { %v5460_v18 = vpop.eup %5459  ;;  %v6882_v25 = vadd.f32 1.0, %v5458_v32  ;;  %v3819_v3 = vor.u32 1.1754944e-38, %v3818_v6  ;;  %v2871_v26 = vand.u32 2147483647, %v6847_v44  ;;  %v2873_v53 = vand.u32 2147483648, %v6847_v44 }
 0x168   : > { %v3808_v58 = vmul.f32 %v5460_v18, %v6818_v40  ;;  %v5462_v50 = vpop.eup %5461  ;;  %5467 = vrcp.f32 %v6872_v60  ;;  %v6888_v39 = vsel %vm4341_vm14, %v4281_v48, 0.0  ;;  %vm2387_vm13 = vweird.f32 %v6841_v8 }
 0x169   : > { %v5464_v7 = vpop.eup %5463  ;;  %5469 = vrcp.f32 %v6882_v25  ;;  %vm3813_vm15 = vweird.f32 %v5460_v18  ;;  %vm6893_vm0 = vcmp.eq.f32.partialorder %v2391_v4, 8.507059e+37  ;;  %v2394_v30 = vor.u32 1.1754944e-38, %v2393_v10 }
 0x16a   : > { %v3809_v9 = vsub.f32 1.0, %v3808_v58  ;;  %v2383_v14 = vmul.f32 %v5464_v7, %v6841_v8  ;;  %vm2867_vm1 = vweird.f32 %v6847_v44  ;;  %v3353_v16 = vand.u32 2147483648, %v6872_v60  ;;  %v5466_v35 = vpop.eup %5465  ;;  %vm3814_vm6 = vmor %vm3812_vm11, %vm3813_vm15 }
 0x16b   : > { %v3351_v51 = vand.u32 2147483647, %v6872_v60  ;;  %v3833_v24 = vand.u32 2147483648, %v6882_v25  ;;  %v6901_v43 = vadd.f32 1.0, %v5462_v50  ;;  %v2863_v45 = vmul.f32 %v5466_v35, %v6847_v44 }
 0x16c   : > { %v3810_v33 = vmul.f32 %v5460_v18, %v3809_v9  ;;  %v2384_v15 = vsub.f32 1.0, %v2383_v14  ;;  %vm6904_vm3 = vcmp.eq.f32.partialorder %v2871_v26, 8.507059e+37  ;;  %v2874_v63 = vor.u32 1.1754944e-38, %v2873_v53 }
 0x16d   : > { %v3831_v23 = vand.u32 2147483647, %v6882_v25  ;;  %vm2388_vm4 = vweird.f32 %v5464_v7  ;;  %vm3347_vm5 = vweird.f32 %v6872_v60  ;;  %5471 = vrcp.f32 %v6901_v43 }
 0x16e   : > { %v3811_v42 = vadd.f32 %v5460_v18, %v3810_v33  ;;  %v5468_v2 = vpop.eup %5467  ;;  %v2385_v31 = vmul.f32 %v5464_v7, %v2384_v15  ;;  %v2864_v55 = vsub.f32 1.0, %v2863_v45  ;;  %vm2868_vm7 = vweird.f32 %v5466_v35  ;;  %vm2389_vm11 = vmor %vm2387_vm13, %vm2388_vm4 }
 0x16f   : > { %v3354_v0 = vor.u32 1.1754944e-38, %v3353_v16  ;;  %vm3827_vm8 = vweird.f32 %v6882_v25  ;;  %v5470_v12 = vpop.eup %5469  ;;  %v3343_v62 = vmul.f32 %v5468_v2, %v6872_v60  ;;  %vm6916_vm9 = vcmp.eq.f32.partialorder %v3351_v51, 8.507059e+37  ;;  %vm2869_vm15 = vmor %vm2867_vm1, %vm2868_vm7 }
 0x170   : > { %v3815_v22 = vsel %vm3814_vm6, %v5460_v18, %v3811_v42  ;;  %v3834_v46 = vor.u32 1.1754944e-38, %v3833_v24  ;;  %5473 = vpow2.f32 %v5143_v57  ;;  %v2386_v17 = vadd.f32 %v5464_v7, %v2385_v31 }
 0x171   : > { %v3820_v40 = vsel %vm6878_vm12, %v3819_v3, %v3815_v22  ;;  %v2865_v56 = vmul.f32 %v5466_v35, %v2864_v55  ;;  %v3823_v37 = vmul.f32 %v5470_v12, %v6882_v25  ;;  %vm6923_vm10 = vcmp.eq.f32.partialorder %v3831_v23, 8.507059e+37 }
 0x172   : > { %v4313_v6 = vmul.f32 %v3820_v40, %v6750_v21  ;;  %v3344_v32 = vsub.f32 1.0, %v3343_v62  ;;  %v2406_v57 = vand.u32 2147483647, %v6901_v43  ;;  %v2408_v48 = vand.u32 2147483648, %v6901_v43  ;;  %v1720_v62 = vpop.f32.mrf.mxu3 }
 0x173   : > { %v2390_v18 = vsel %vm2389_vm11, %v5464_v7, %v2386_v17  ;;  %v2866_v4 = vadd.f32 %v5466_v35, %v2865_v56  ;;  %vm3348_vm12 = vweird.f32 %v5468_v2  ;;  %v3824_v10 = vsub.f32 1.0, %v3823_v37  ;;  %v5472_v58 = vpop.eup %5471 }
 0x174   : > { %v2395_v29 = vsel %vm6893_vm0, %v2394_v30, %v2390_v18  ;;  %v3345_v21 = vmul.f32 %v5468_v2, %v3344_v32  ;;  %vm3828_vm6 = vweird.f32 %v5470_v12  ;;  %5475 = vpow2.f32 %v6864_v11  ;;  %vm3349_vm0 = vmor %vm3347_vm5, %vm3348_vm12  ;;  %v1480_v30 = vpop.f32.mrf.mxu0 }
 0x175   : > { %v4573_v8 = vsel %vm4341_vm14, %v4313_v6, 0.0  ;;  %v4218_v50 = vmul.f32 %v2395_v29, %v6756_v47  ;;  %v2870_v3 = vsel %vm2869_vm15, %v5466_v35, %v2866_v4  ;;  %v3825_v26 = vmul.f32 %v5470_v12, %v3824_v10  ;;  %vm3829_vm1 = vmor %vm3827_vm8, %vm3828_vm6 }
 0x176   : > { %v5474_v53 = vpop.eup %5473  ;;  %v2875_v7 = vsel %vm6904_vm3, %v2874_v63, %v2870_v3  ;;  %v3346_v9 = vadd.f32 %v5468_v2, %v3345_v21  ;;  %v2398_v14 = vmul.f32 %v5472_v58, %v6901_v43  ;;  %vm2403_vm13 = vweird.f32 %v5472_v58 }
 0x177   : > { %v4353_v44 = vsel %vm4341_vm14, %v4218_v50, 0.0  ;;  %v4250_v38 = vmul.f32 %v2875_v7, %v6775_v1  ;;  %v3826_v11 = vadd.f32 %v5470_v12, %v3825_v26  ;;  %v6949_v47 = vadd.f32 1.0, %v5474_v53 }
 0x178   : > { %v6952_v16 = vadd.f32 %v4353_v44, %v6856_v54  ;;  %v3350_v35 = vsel %vm3349_vm0, %v5468_v2, %v3346_v9  ;;  %v2399_v33 = vsub.f32 1.0, %v2398_v14  ;;  %v5207_v51 = vmul.f32 -1.442695, %v6867_v59  ;;  %v5259_v14 = vld [vmem:[%s6124_s11 + $0x68] sm:$0xff] }
 0x179   : > { %v4427_v1 = vsel %vm4341_vm14, %v4250_v38, 0.0  ;;  %v3355_v60 = vsel %vm6916_vm9, %v3354_v0, %v3350_v35  ;;  %v3830_v24 = vsel %vm3829_vm1, %v5470_v12, %v3826_v11  ;;  %5477 = vrcp.f32 %v6949_v47  ;;  %v5275_v44 = vld [vmem:[%s6124_s11 + $0xe8] sm:$0xff]  ;;  %5053 = vmatmul.msk.bf16.gmra.mxu0 %vm1254_vm2, %v5259_v14 }
 0x17a   : > { %v5476_v15 = vpop.eup %5475  ;;  %v6963_v54 = vadd.f32 %v4427_v1, %v6875_v36  ;;  %v4282_v45 = vmul.f32 %v3355_v60, %v6790_v20  ;;  %v3835_v25 = vsel %vm6923_vm10, %v3834_v46, %v3830_v24  ;;  %v2400_v41 = vmul.f32 %v5472_v58, %v2399_v33  ;;  %v1560_v20 = vpop.f32.mrf.mxu1  ;;  %v5291_v33 = vld [vmem:[%s6124_s11 + $0x168] sm:$0xff]  ;;  %5069 = vmatmul.msk.bf16.gmra.mxu1 %vm1254_vm2, %v5275_v44 }
 0x17b   : > { %v4500_v63 = vadd.f32 %v6888_v39, %v6759_v61  ;;  %v4574_v23 = vadd.f32 %v4573_v8, %v6796_v52  ;;  %v4314_v42 = vmul.f32 %v3835_v25, %v6807_v19  ;;  %vm2402_vm3 = vweird.f32 %v6901_v43  ;;  %v1640_v39 = vpop.f32.mrf.mxu2  ;;  %5085 = vmatmul.msk.bf16.gmra.mxu2 %vm1254_vm2, %v5291_v33 }
 0x17c   : > { %v4501_v2 = vsel %vm4341_vm14, %v4282_v45, 0.0  ;;  %v2401_v31 = vadd.f32 %v5472_v58, %v2400_v41  ;;  %v6974_v36 = vadd.f32 1.0, %v5476_v15  ;;  %5479 = vpow2.f32 %v5207_v51  ;;  %vm2404_vm4 = vmor %vm2402_vm3, %vm2403_vm13  ;;  %v1482_v5 = vpop.f32.mrf.mxu0  ;;  %v5307_v51 = vld [vmem:[%s6124_s11 + $0x1e8] sm:$0xff] }
 0x17d   : > { %v6976_v55 = vadd.f32 %v4501_v2, %v4500_v63  ;;  %v4575_v0 = vsel %vm4341_vm14, %v4314_v42, 0.0  ;;  %v2409_v61 = vor.u32 1.1754944e-38, %v2408_v48  ;;  %vm2407_vm5 = vcmp.eq.f32.partialorder %v2406_v57, 8.507059e+37  ;;  %5101 = vmatmul.msk.bf16.gmra.mxu3 %vm1254_vm2, %v5307_v51 }
 0x17e   : > { %v6980_v52 = vadd.f32 %v4575_v0, %v4574_v23  ;;  %v2405_v19 = vsel %vm2404_vm4, %v5472_v58, %v2401_v31  ;;  %5481 = vrcp.f32 %v6974_v36  ;;  %v6984_v22 = vadd.f32 %v6747_v28, %v1480_v30 }
 0x17f   : > { %v5478_v43 = vpop.eup %5477  ;;  %v2410_v12 = vsel %vm2407_vm5, %v2409_v61, %v2405_v19  ;;  %vm2882_vm7 = vweird.f32 %v6949_v47  ;;  %v6989_v46 = vadd.f32 %v6747_v28, %v1560_v20  ;;  %v2886_v40 = vand.u32 2147483647, %v6949_v47 }
 0x180   : > { %v2878_v13 = vmul.f32 %v5478_v43, %v6949_v47  ;;  %v2888_v17 = vand.u32 2147483648, %v6949_v47  ;;  %v5112_v56 = vmul.f32 -1.442695, %v6984_v22  ;;  %v6995_v37 = vadd.f32 %v6747_v28, %v1640_v39 }
 0x181   : > { %v4219_v32 = vmul.f32 %v2410_v12, %v6810_v27  ;;  %v5144_v48 = vmul.f32 -1.442695, %v6989_v46  ;;  %v7000_v18 = vadd.f32 %v6747_v28, %v1720_v62  ;;  %vm2883_vm8 = vweird.f32 %v5478_v43 }
 0x182   : > { %v5480_v6 = vpop.eup %5479  ;;  %v2879_v57 = vsub.f32 1.0, %v2878_v13  ;;  %5483 = vpow2.f32 %v5112_v56  ;;  %v5176_v10 = vmul.f32 -1.442695, %v6995_v37  ;;  %v7007_v27 = vadd.f32 %v6747_v28, %v1482_v5  ;;  %v1562_v9 = vpop.f32.mrf.mxu1  ;;  %vm2884_vm11 = vmor %vm2882_vm7, %vm2883_vm8 }
 0x183   : > { %v7002_v4 = vadd.f32 1.0, %v5480_v6  ;;  %5485 = vpow2.f32 %v5144_v48  ;;  %v5208_v21 = vmul.f32 -1.442695, %v7000_v18  ;;  %vm7009_vm9 = vcmp.eq.f32.partialorder %v2886_v40, 8.507059e+37  ;;  %v1642_v35 = vpop.f32.mrf.mxu2 }
 0x184   : > { %v5482_v58 = vpop.eup %5481  ;;  %v2880_v29 = vmul.f32 %v5478_v43, %v2879_v57  ;;  %v2889_v50 = vor.u32 1.1754944e-38, %v2888_v17  ;;  %vm3362_vm10 = vweird.f32 %v6974_v36  ;;  %v3366_v53 = vand.u32 2147483647, %v6974_v36  ;;  %v1485_v5 = vpop.f32.mrf.mxu0 }
 0x185   : > { %v3358_v3 = vmul.f32 %v5482_v58, %v6974_v36  ;;  %5487 = vrcp.f32 %v7002_v4  ;;  %v3368_v7 = vand.u32 2147483648, %v6974_v36  ;;  %v4355_v38 = vsel %vm4341_vm14, %v4219_v32, 0.0 }
 0x186   : > { %v2881_v26 = vadd.f32 %v5478_v43, %v2880_v29  ;;  %5489 = vpow2.f32 %v5176_v10  ;;  %v5113_v30 = vmul.f32 -1.442695, %v7007_v27  ;;  %vm3363_vm12 = vweird.f32 %v5482_v58 }
 0x187   : > { %v3359_v11 = vsub.f32 1.0, %v3358_v3  ;;  %v3846_v60 = vand.u32 2147483647, %v7002_v4  ;;  %5491 = vpow2.f32 %v5208_v21  ;;  %v3848_v45 = vand.u32 2147483648, %v7002_v4  ;;  %vm3364_vm6 = vmor %vm3362_vm10, %vm3363_vm12 }
 0x188   : > { %v2885_v1 = vsel %vm2884_vm11, %v5478_v43, %v2881_v26  ;;  %v5484_v24 = vpop.eup %5483  ;;  %v7034_v25 = vadd.f32 %v6747_v28, %v1562_v9  ;;  %vm7038_vm15 = vcmp.eq.f32.partialorder %v3366_v53, 8.507059e+37  ;;  %5493 = vpow2.f32 %v5113_v30  ;;  %v1722_v43 = vpop.f32.mrf.mxu3 }
 0x189   : > { %v2890_v47 = vsel %vm7009_vm9, %v2889_v50, %v2885_v1  ;;  %v3360_v15 = vmul.f32 %v5482_v58, %v3359_v11  ;;  %v5486_v41 = vpop.eup %5485  ;;  %v7042_v23 = vadd.f32 1.0, %v5484_v24  ;;  %v7045_v42 = vadd.f32 %v6747_v28, %v1642_v35 }
 0x18a   : > { %v4251_v31 = vmul.f32 %v2890_v47, %v6835_v34  ;;  %v3369_v0 = vor.u32 1.1754944e-38, %v3368_v7  ;;  %v7048_v61 = vadd.f32 1.0, %v5486_v41  ;;  %v7051_v39 = vadd.f32 %v4355_v38, %v6952_v16 }
 0x18b   : > { %v5488_v2 = vpop.eup %5487  ;;  %v3361_v20 = vadd.f32 %v5482_v58, %v3360_v15  ;;  %vm3842_vm13 = vweird.f32 %v7002_v4  ;;  %5495 = vrcp.f32 %v7042_v23  ;;  %vm7059_vm0 = vcmp.eq.f32.partialorder %v3846_v60, 8.507059e+37 }
 0x18c   : > { %v3838_v19 = vmul.f32 %v5488_v2, %v7002_v4  ;;  %v5490_v12 = vpop.eup %5489  ;;  %v3849_v13 = vor.u32 1.1754944e-38, %v3848_v45  ;;  %v5145_v16 = vmul.f32 -1.442695, %v7034_v25  ;;  %5497 = vrcp.f32 %v7048_v61 }
 0x18d   : > { %v3365_v34 = vsel %vm3364_vm6, %v5482_v58, %v3361_v20  ;;  %v5492_v40 = vpop.eup %5491  ;;  %v7068_v56 = vmul.f32 -1.442695, %v7045_v42  ;;  %v4429_v6 = vsel %vm4341_vm14, %v4251_v31, 0.0  ;;  %v2421_v57 = vand.u32 2147483647, %v7042_v23 }
 0x18e   : > { %v3370_v36 = vsel %vm7038_vm15, %v3369_v0, %v3365_v34  ;;  %v3839_v17 = vsub.f32 1.0, %v3838_v19  ;;  %v7074_v48 = vadd.f32 %v6747_v28, %v1722_v43  ;;  %v5494_v10 = vpop.eup %5493  ;;  %vm3843_vm1 = vweird.f32 %v5488_v2 }
 0x18f   : > { %v4283_v32 = vmul.f32 %v3370_v36, %v6844_v49  ;;  %v2423_v29 = vand.u32 2147483648, %v7042_v23  ;;  %v7077_v21 = vadd.f32 1.0, %v5490_v12  ;;  %v2901_v8 = vand.u32 2147483647, %v7048_v61  ;;  %vm3844_vm4 = vmor %vm3842_vm13, %vm3843_vm1 }
 0x190   : > { %v3840_v58 = vmul.f32 %v5488_v2, %v3839_v17  ;;  %v7080_v50 = vadd.f32 1.0, %v5492_v40  ;;  %5499 = vpow2.f32 %v5145_v16  ;;  %v7083_v3 = vadd.f32 %v6747_v28, %v1485_v5 }
 0x191   : > { %v5496_v49 = vpop.eup %5495  ;;  %v7086_v26 = vadd.f32 %v4429_v6, %v6963_v54  ;;  %vm2417_vm3 = vweird.f32 %v7042_v23  ;;  %5501 = vrcp.f32 %v7077_v21  ;;  %v4503_v7 = vsel %vm4341_vm14, %v4283_v32, 0.0 }
 0x192   : > { %v3841_v53 = vadd.f32 %v5488_v2, %v3840_v58  ;;  %v2413_v9 = vmul.f32 %v5496_v49, %v7042_v23  ;;  %vm7094_vm5 = vcmp.eq.f32.partialorder %v2421_v57, 8.507059e+37  ;;  %vm2897_vm7 = vweird.f32 %v7048_v61  ;;  %v5498_v44 = vpop.eup %5497 }
 0x193   : > { %v7099_v54 = vadd.f32 1.0, %v5494_v10  ;;  %v2424_v11 = vor.u32 1.1754944e-38, %v2423_v29  ;;  %v2903_v30 = vand.u32 2147483648, %v7048_v61  ;;  %5503 = vrcp.f32 %v7080_v50 }
 0x194   : > { %v3845_v38 = vsel %vm3844_vm4, %v5488_v2, %v3841_v53  ;;  %v2414_v35 = vsub.f32 1.0, %v2413_v9  ;;  %v2893_v33 = vmul.f32 %v5498_v44, %v7048_v61  ;;  %vm7106_vm8 = vcmp.eq.f32.partialorder %v2901_v8, 8.507059e+37 }
 0x195   : > { %v3850_v4 = vsel %vm7059_vm0, %v3849_v13, %v3845_v38  ;;  %v3381_v1 = vand.u32 2147483647, %v7077_v21  ;;  %v7112_v60 = vadd.f32 %v4503_v7, %v6976_v55  ;;  %vm2418_vm9 = vweird.f32 %v5496_v49  ;;  %v5308_v38 = vld [vmem:[%s6124_s11 + $0x1f0] sm:$0xff] }
 0x196   : > { %v4315_v24 = vmul.f32 %v3850_v4, %v6867_v59  ;;  %v3383_v47 = vand.u32 2147483648, %v7077_v21  ;;  %v5500_v15 = vpop.eup %5499  ;;  %v2415_v45 = vmul.f32 %v5496_v49, %v2414_v35  ;;  %v2894_v41 = vsub.f32 1.0, %v2893_v33  ;;  %vm2419_vm6 = vmor %vm2417_vm3, %vm2418_vm9  ;;  %5102 = vmatmul.msk.bf16.gmra.mxu3 %vm1254_vm2, %v5308_v38 }
 0x197   : > { %v3861_v63 = vand.u32 2147483647, %v7080_v50  ;;  %5505 = vrcp.f32 %v7099_v54  ;;  %v5502_v2 = vpop.eup %5501  ;;  %vm2898_vm10 = vweird.f32 %v5498_v44  ;;  %v2904_v20 = vor.u32 1.1754944e-38, %v2903_v30 }
 0x198   : > { %v4577_v31 = vsel %vm4341_vm14, %v4315_v24, 0.0  ;;  %vm3377_vm11 = vweird.f32 %v7077_v21  ;;  %v2416_v55 = vadd.f32 %v5496_v49, %v2415_v45  ;;  %v2895_v0 = vmul.f32 %v5498_v44, %v2894_v41  ;;  %vm2899_vm0 = vmor %vm2897_vm7, %vm2898_vm10  ;;  %v1565_v24 = vpop.f32.mrf.mxu1 }
 0x199   : > { %v3373_v59 = vmul.f32 %v5502_v2, %v7077_v21  ;;  %vm7121_vm12 = vcmp.eq.f32.partialorder %v3381_v1, 8.507059e+37  ;;  %vm3857_vm15 = vweird.f32 %v7080_v50  ;;  %v5504_v43 = vpop.eup %5503  ;;  %v7127_v12 = vadd.f32 %v4577_v31, %v6980_v52 }
 0x19a   : > { %v3384_v34 = vor.u32 1.1754944e-38, %v3383_v47  ;;  %v3863_v62 = vand.u32 2147483648, %v7080_v50  ;;  %v2436_v13 = vand.u32 2147483647, %v7099_v54  ;;  %v2420_v16 = vsel %vm2419_vm6, %v5496_v49, %v2416_v55 }
 0x19b   : > { %v2896_v40 = vadd.f32 %v5498_v44, %v2895_v0  ;;  %v3374_v36 = vsub.f32 1.0, %v3373_v59  ;;  %v3853_v17 = vmul.f32 %v5504_v43, %v7080_v50  ;;  %vm7135_vm13 = vcmp.eq.f32.partialorder %v3861_v63, 8.507059e+37  ;;  %v1725_v0 = vpop.f32.mrf.mxu3 }
 0x19c   : > { %v2425_v52 = vsel %vm7094_vm5, %v2424_v11, %v2420_v16  ;;  %vm3378_vm1 = vweird.f32 %v5502_v2  ;;  %vm2432_vm3 = vweird.f32 %v7099_v54  ;;  %v2438_v23 = vand.u32 2147483648, %v7099_v54 }
 0x19d   : > { %v7146_v6 = vadd.f32 1.0, %v5500_v15  ;;  %v5506_v32 = vpop.eup %5505  ;;  %v4220_v57 = vmul.f32 %v2425_v52, %v6984_v22  ;;  %v2900_v10 = vsel %vm2899_vm0, %v5498_v44, %v2896_v40  ;;  %v3375_v58 = vmul.f32 %v5502_v2, %v3374_v36  ;;  %vm3379_vm5 = vmor %vm3377_vm11, %vm3378_vm1 }
 0x19e   : > { %v3854_v29 = vsub.f32 1.0, %v3853_v17  ;;  %v2905_v8 = vsel %vm7106_vm8, %v2904_v20, %v2900_v10  ;;  %vm3858_vm4 = vweird.f32 %v5504_v43  ;;  %v2428_v61 = vmul.f32 %v5506_v32, %v7099_v54  ;;  %v1487_v17 = vpop.f32.mrf.mxu0 }
 0x19f   : > { %5507 = vrcp.f32 %v7146_v6  ;;  %v4357_v49 = vsel %vm4341_vm14, %v4220_v57, 0.0  ;;  %v4252_v53 = vmul.f32 %v2905_v8, %v6989_v46  ;;  %v3376_v7 = vadd.f32 %v5502_v2, %v3375_v58  ;;  %vm3859_vm8 = vmor %vm3857_vm15, %vm3858_vm4 }
 0x1a0   : > { %v3855_v9 = vmul.f32 %v5504_v43, %v3854_v29  ;;  %v4358_v14 = vadd.f32 %v4357_v49, %v7051_v39  ;;  %v3864_v22 = vor.u32 1.1754944e-38, %v3863_v62  ;;  %v2429_v44 = vsub.f32 1.0, %v2428_v61  ;;  %v1567_v29 = vpop.f32.mrf.mxu1 }
 0x1a1   : > { %vm7159_vm7 = vcmp.eq.f32.partialorder %v2436_v13, 8.507059e+37  ;;  %v4431_v11 = vsel %vm4341_vm14, %v4252_v53, 0.0  ;;  %v3380_v30 = vsel %vm3379_vm5, %v5502_v2, %v3376_v7  ;;  %v2439_v35 = vor.u32 1.1754944e-38, %v2438_v23  ;;  %v1645_v2 = vpop.f32.mrf.mxu2  ;;  %v5260_v53 = vld [vmem:[%s6124_s11 + $0x70] sm:$0xff] }
 0x1a2   : > { %v3856_v4 = vadd.f32 %v5504_v43, %v3855_v9  ;;  %v7165_v46 = vadd.f32 %v4431_v11, %v7086_v26  ;;  %v3385_v39 = vsel %vm7121_vm12, %v3384_v34, %v3380_v30  ;;  %v2430_v21 = vmul.f32 %v5506_v32, %v2429_v44  ;;  %v5276_v7 = vld [vmem:[%s6124_s11 + $0xf0] sm:$0xff]  ;;  %5054 = vmatmul.msk.bf16.gmra.mxu0 %vm1254_vm2, %v5260_v53 }
 0x1a3   : > { %vm2433_vm9 = vweird.f32 %v5506_v32  ;;  %v4284_v33 = vmul.f32 %v3385_v39, %v6995_v37  ;;  %v2916_v1 = vand.u32 2147483647, %v7146_v6  ;;  %5509 = vpow2.f32 %v7068_v56  ;;  %v5292_v9 = vld [vmem:[%s6124_s11 + $0x170] sm:$0xff]  ;;  %5070 = vmatmul.msk.bf16.gmra.mxu1 %vm1254_vm2, %v5276_v7 }
 0x1a4   : > { %v3860_v51 = vsel %vm3859_vm8, %v5504_v43, %v3856_v4  ;;  %v2431_v15 = vadd.f32 %v5506_v32, %v2430_v21  ;;  %v5209_v45 = vmul.f32 -1.442695, %v7074_v48  ;;  %v5114_v50 = vmul.f32 -1.442695, %v7083_v3  ;;  %vm2434_vm10 = vmor %vm2432_vm3, %vm2433_vm9  ;;  %5086 = vmatmul.msk.bf16.gmra.mxu2 %vm1254_vm2, %v5292_v9 }
 0x1a5   : > { %v5508_v47 = vpop.eup %5507  ;;  %v3865_v26 = vsel %vm7135_vm13, %v3864_v22, %v3860_v51  ;;  %v4505_v41 = vsel %vm4341_vm14, %v4284_v33, 0.0  ;;  %v2918_v56 = vand.u32 2147483648, %v7146_v6  ;;  %v7189_v55 = vadd.f32 %v6747_v28, %v1565_v24 }
 0x1a6   : > { %v4316_v63 = vmul.f32 %v3865_v26, %v7000_v18  ;;  %v2908_v37 = vmul.f32 %v5508_v47, %v7146_v6  ;;  %v7186_v31 = vadd.f32 %v4505_v41, %v7112_v60  ;;  %v2435_v20 = vsel %vm2434_vm10, %v5506_v32, %v2431_v15 }
 0x1a7   : > { %5511 = vpow2.f32 %v5209_v45  ;;  %v2440_v18 = vsel %vm7159_vm7, %v2439_v35, %v2435_v20  ;;  %v5146_v60 = vmul.f32 -1.442695, %v7189_v55  ;;  %v7200_v34 = vadd.f32 %v6747_v28, %v1645_v2 }
 0x1a8   : > { %v4579_v59 = vsel %vm4341_vm14, %v4316_v63, 0.0  ;;  %v2909_v54 = vsub.f32 1.0, %v2908_v37  ;;  %5513 = vpow2.f32 %v5114_v50  ;;  %v4221_v43 = vmul.f32 %v2440_v18, %v7007_v27 }
 0x1a9   : > { %v7195_v19 = vadd.f32 %v4579_v59, %v7127_v12  ;;  %v5510_v62 = vpop.eup %5509  ;;  %vm2913_vm11 = vweird.f32 %v5508_v47  ;;  %v7203_v16 = vadd.f32 %v6747_v28, %v1725_v0  ;;  %5515 = vpow2.f32 %v5146_v60  ;;  %v1647_v41 = vpop.f32.mrf.mxu2 }
 0x1aa   : > { %v2910_v13 = vmul.f32 %v5508_v47, %v2909_v54  ;;  %v4359_v40 = vsel %vm4341_vm14, %v4221_v43, 0.0  ;;  %v7206_v36 = vadd.f32 1.0, %v5510_v62  ;;  %v5178_v12 = vmul.f32 -1.442695, %v7200_v34  ;;  %v1727_v0 = vpop.f32.mrf.mxu3 }
 0x1ab   : > { %v7209_v27 = vadd.f32 %v4359_v40, %v4358_v14  ;;  %vm2912_vm12 = vweird.f32 %v7146_v6  ;;  %vm2917_vm6 = vcmp.eq.f32.partialorder %v2916_v1, 8.507059e+37  ;;  %v2919_v23 = vor.u32 1.1754944e-38, %v2918_v56  ;;  %v7277_v40 = vld [vmem:[%s9757_s2] ss:$0 sm:$0xff] }
 0x1ac   : > { %v2911_v5 = vadd.f32 %v5508_v47, %v2910_v13  ;;  %vm2914_vm15 = vmor %vm2912_vm12, %vm2913_vm11  ;;  %5517 = vrcp.f32 %v7206_v36  ;;  %v7216_v58 = vadd.f32 %v6747_v28, %v1487_v17  ;;  %v5210_v61 = vmul.f32 -1.442695, %v7203_v16 }
 0x1ad   : > { %v5512_v52 = vpop.eup %5511  ;;  %5519 = vpow2.f32 %v5178_v12  ;;  %v3396_v22 = vand.u32 2147483647, %v7206_v36  ;;  %v7229_v44 = vadd.f32 %v6747_v28, %v1567_v29  ;;  %v3398_v30 = vand.u32 2147483648, %v7206_v36 }
 0x1ae   : > { %v5514_v32 = vpop.eup %5513  ;;  %v2915_v57 = vsel %vm2914_vm15, %v5508_v47, %v2911_v5  ;;  %v7213_v10 = vadd.f32 1.0, %v5512_v52  ;;  %vm3392_vm13 = vweird.f32 %v7206_v36  ;;  %v7280_v12 = vadd.f32 %v7277_v40, %v1647_v41 }
 0x1af   : > { %v2920_v6 = vsel %vm2917_vm6, %v2919_v23, %v2915_v57  ;;  %v7218_v8 = vadd.f32 1.0, %v5514_v32  ;;  %v5516_v14 = vpop.eup %5515  ;;  %vm7251_vm0 = vcmp.eq.f32.partialorder %v3396_v22, 8.507059e+37  ;;  %v5147_v26 = vmul.f32 -1.442695, %v7229_v44 }
 0x1b0   : > { %v4253_v49 = vmul.f32 %v2920_v6, %v7034_v25  ;;  %5521 = vrcp.f32 %v7213_v10  ;;  %v7234_v4 = vadd.f32 1.0, %v5516_v14  ;;  %v5115_v25 = vmul.f32 -1.442695, %v7216_v58 }
 0x1b1   : > { %5523 = vrcp.f32 %v7218_v8  ;;  %v3876_v28 = vand.u32 2147483647, %v7213_v10  ;;  %v3878_v21 = vand.u32 2147483648, %v7213_v10  ;;  %v2451_v1 = vand.u32 2147483647, %v7218_v8 }
 0x1b2   : > { %v4433_v11 = vsel %vm4341_vm14, %v4253_v49, 0.0  ;;  %v5518_v35 = vpop.eup %5517  ;;  %5525 = vpow2.f32 %v5210_v61  ;;  %v2453_v24 = vand.u32 2147483648, %v7218_v8  ;;  %v3399_v50 = vor.u32 1.1754944e-38, %v3398_v30 }
 0x1b3   : > { %v7240_v39 = vadd.f32 %v4433_v11, %v7165_v46  ;;  %v5520_v33 = vpop.eup %5519  ;;  %v3388_v51 = vmul.f32 %v5518_v35, %v7206_v36  ;;  %5527 = vrcp.f32 %v7234_v4  ;;  %vm3872_vm1 = vweird.f32 %v7213_v10 }
 0x1b4   : > { %v7255_v47 = vadd.f32 1.0, %v5520_v33  ;;  %vm2447_vm3 = vweird.f32 %v7218_v8  ;;  %vm3393_vm4 = vweird.f32 %v5518_v35  ;;  %vm7261_vm5 = vcmp.eq.f32.partialorder %v3876_v28, 8.507059e+37 }
 0x1b5   : > { %v3389_v45 = vsub.f32 1.0, %v3388_v51  ;;  %v3879_v2 = vor.u32 1.1754944e-38, %v3878_v21  ;;  %v2931_v20 = vand.u32 2147483647, %v7234_v4  ;;  %vm7267_vm7 = vcmp.eq.f32.partialorder %v2451_v1, 8.507059e+37  ;;  %vm3394_vm9 = vmor %vm3392_vm13, %vm3393_vm4 }
 0x1b6   : > { %v5522_v15 = vpop.eup %5521  ;;  %v2454_v43 = vor.u32 1.1754944e-38, %v2453_v24  ;;  %5529 = vrcp.f32 %v7255_v47  ;;  %vm2927_vm8 = vweird.f32 %v7234_v4  ;;  %v2933_v13 = vand.u32 2147483648, %v7234_v4 }
 0x1b7   : > { %v5524_v63 = vpop.eup %5523  ;;  %v3868_v37 = vmul.f32 %v5522_v15, %v7213_v10  ;;  %v3390_v59 = vmul.f32 %v5518_v35, %v3389_v45  ;;  %5531 = vpow2.f32 %v5115_v25  ;;  %v7285_v32 = vadd.f32 %v7277_v40, %v1727_v0 }
 0x1b8   : > { %v2443_v18 = vmul.f32 %v5524_v63, %v7218_v8  ;;  %v5526_v60 = vpop.eup %5525  ;;  %vm3873_vm10 = vweird.f32 %v5522_v15  ;;  %vm7291_vm11 = vcmp.eq.f32.partialorder %v2931_v20, 8.507059e+37  ;;  %vm2448_vm12 = vweird.f32 %v5524_v63 }
 0x1b9   : > { %v3869_v62 = vsub.f32 1.0, %v3868_v37  ;;  %v5528_v17 = vpop.eup %5527  ;;  %v3391_v5 = vadd.f32 %v5518_v35, %v3390_v59  ;;  %v7282_v23 = vadd.f32 1.0, %v5526_v60  ;;  %v2934_v36 = vor.u32 1.1754944e-38, %v2933_v13  ;;  %vm3874_vm15 = vmor %vm3872_vm1, %vm3873_vm10 }
 0x1ba   : > { %v2444_v52 = vsub.f32 1.0, %v2443_v18  ;;  %v2923_v29 = vmul.f32 %v5528_v17, %v7234_v4  ;;  %vm3407_vm6 = vweird.f32 %v7255_v47  ;;  %v3411_v11 = vand.u32 2147483647, %v7255_v47  ;;  %vm2449_vm13 = vmor %vm2447_vm3, %vm2448_vm12 }
 0x1bb   : > { %v3870_v57 = vmul.f32 %v5522_v15, %v3869_v62  ;;  %v3395_v61 = vsel %vm3394_vm9, %v5518_v35, %v3391_v5  ;;  %5533 = vrcp.f32 %v7282_v23  ;;  %v3413_v33 = vand.u32 2147483648, %v7255_v47 }
 0x1bc   : > { %v2445_v49 = vmul.f32 %v5524_v63, %v2444_v52  ;;  %v3400_v53 = vsel %vm7251_vm0, %v3399_v50, %v3395_v61  ;;  %v2924_v9 = vsub.f32 1.0, %v2923_v29  ;;  %v5530_v14 = vpop.eup %5529  ;;  %5535 = vpow2.f32 %v5147_v26 }
 0x1bd   : > { %v3871_v7 = vadd.f32 %v5522_v15, %v3870_v57  ;;  %v4285_v22 = vmul.f32 %v3400_v53, %v7045_v42  ;;  %v5532_v30 = vpop.eup %5531  ;;  %vm2928_vm0 = vweird.f32 %v5528_v17  ;;  %v3403_v28 = vmul.f32 %v5530_v14, %v7255_v47 }
 0x1be   : > { %v2446_v38 = vadd.f32 %v5524_v63, %v2445_v49  ;;  %v2925_v35 = vmul.f32 %v5528_v17, %v2924_v9  ;;  %vm2929_vm1 = vmor %vm2927_vm8, %vm2928_vm0  ;;  %v3891_v45 = vand.u32 2147483647, %v7282_v23  ;;  %v7319_v50 = vadd.f32 1.0, %v5532_v30  ;;  %v1650_v9 = vpop.f32.mrf.mxu2  ;;  %v1730_v30 = vpop.f32.mrf.mxu3 }
 0x1bf   : > { %v3875_v25 = vsel %vm3874_vm15, %v5522_v15, %v3871_v7  ;;  %v4507_v42 = vsel %vm4341_vm14, %v4285_v22, 0.0  ;;  %v3404_v15 = vsub.f32 1.0, %v3403_v28  ;;  %vm3408_vm3 = vweird.f32 %v5530_v14 }
 0x1c0   : > { %v3880_v10 = vsel %vm7261_vm5, %v3879_v2, %v3875_v25  ;;  %v2450_v21 = vsel %vm2449_vm13, %v5524_v63, %v2446_v38  ;;  %v4508_v51 = vadd.f32 %v4507_v42, %v7186_v31  ;;  %v2926_v24 = vadd.f32 %v5528_v17, %v2925_v35  ;;  %vm3409_vm5 = vmor %vm3407_vm6, %vm3408_vm3 }
 0x1c1   : > { %v4317_v1 = vmul.f32 %v3880_v10, %v7074_v48  ;;  %v2455_v8 = vsel %vm7267_vm7, %v2454_v43, %v2450_v21  ;;  %v5534_v46 = vpop.eup %5533  ;;  %v3405_v4 = vmul.f32 %v5530_v14, %v3404_v15  ;;  %5537 = vrcp.f32 %v7319_v50 }
 0x1c2   : > { %v4222_v26 = vmul.f32 %v2455_v8, %v7083_v3  ;;  %v2930_v31 = vsel %vm2929_vm1, %v5528_v17, %v2926_v24  ;;  %v3883_v48 = vmul.f32 %v5534_v46, %v7282_v23  ;;  %v5536_v63 = vpop.eup %5535  ;;  %v3414_v18 = vor.u32 1.1754944e-38, %v3413_v33  ;;  %v1570_v17 = vpop.f32.mrf.mxu1 }
 0x1c3   : > { %v4581_v41 = vsel %vm4341_vm14, %v4317_v1, 0.0  ;;  %v2935_v3 = vsel %vm7291_vm11, %v2934_v36, %v2930_v31  ;;  %v3406_v59 = vadd.f32 %v5530_v14, %v3405_v4  ;;  %vm3888_vm4 = vweird.f32 %v5534_v46 }
 0x1c4   : > { %v4582_v37 = vadd.f32 %v4581_v41, %v7195_v19  ;;  %v4361_v56 = vsel %vm4341_vm14, %v4222_v26, 0.0  ;;  %v4254_v20 = vmul.f32 %v2935_v3, %v7189_v55  ;;  %v3884_v0 = vsub.f32 1.0, %v3883_v48  ;;  %v1490_v19 = vpop.f32.mrf.mxu0 }
 0x1c5   : > { %v7328_v2 = vadd.f32 %v4361_v56, %v7209_v27  ;;  %v3893_v54 = vand.u32 2147483648, %v7282_v23  ;;  %v7337_v27 = vadd.f32 1.0, %v5536_v63  ;;  %v5179_v55 = vmul.f32 -1.442695, %v7280_v12 }
 0x1c6   : > { %v4435_v43 = vsel %vm4341_vm14, %v4254_v20, 0.0  ;;  %v3885_v60 = vmul.f32 %v5534_v46, %v3884_v0  ;;  %v3410_v13 = vsel %vm3409_vm5, %v5530_v14, %v3406_v59  ;;  %vm3412_vm7 = vcmp.eq.f32.partialorder %v3411_v11, 8.507059e+37 }
 0x1c7   : > { %v7341_v62 = vadd.f32 %v4435_v43, %v7240_v39  ;;  %vm3887_vm8 = vweird.f32 %v7282_v23  ;;  %v3415_v5 = vsel %vm3412_vm7, %v3414_v18, %v3410_v13  ;;  %vm3892_vm9 = vcmp.eq.f32.partialorder %v3891_v45, 8.507059e+37  ;;  %v5538_v39 = vpop.eup %5537 }
 0x1c8   : > { %v3886_v52 = vadd.f32 %v5534_v46, %v3885_v60  ;;  %5539 = vrcp.f32 %v7337_v27  ;;  %v4286_v47 = vmul.f32 %v3415_v5, %v7200_v34  ;;  %vm3889_vm10 = vmor %vm3887_vm8, %vm3888_vm4  ;;  %v3894_v57 = vor.u32 1.1754944e-38, %v3893_v54 }
 0x1c9   : > { %v2466_v29 = vand.u32 2147483647, %v7319_v50  ;;  %5541 = vpow2.f32 %v5179_v55  ;;  %v5211_v61 = vmul.f32 -1.442695, %v7285_v32  ;;  %v7350_v23 = vadd.f32 %v7277_v40, %v1490_v19 }
 0x1ca   : > { %v3890_v6 = vsel %vm3889_vm10, %v5534_v46, %v3886_v52  ;;  %v7353_v49 = vadd.f32 %v7277_v40, %v1570_v17  ;;  %v4509_v53 = vsel %vm4341_vm14, %v4286_v47, 0.0  ;;  %v2458_v34 = vmul.f32 %v5538_v39, %v7319_v50  ;;  %v1572_v3 = vpop.f32.mrf.mxu1 }
 0x1cb   : > { %v3895_v7 = vsel %vm3892_vm9, %v3894_v57, %v3890_v6  ;;  %v7357_v36 = vadd.f32 %v4509_v53, %v4508_v51  ;;  %vm2462_vm11 = vweird.f32 %v7319_v50  ;;  %5543 = vpow2.f32 %v5211_v61  ;;  %v5261_v57 = vld [vmem:[%s6124_s11 + $0x78] sm:$0xff] }
 0x1cc   : > { %v4318_v14 = vmul.f32 %v3895_v7, %v7203_v16  ;;  %v2459_v22 = vsub.f32 1.0, %v2458_v34  ;;  %v5116_v38 = vmul.f32 -1.442695, %v7350_v23  ;;  %v5148_v11 = vmul.f32 -1.442695, %v7353_v49  ;;  %v1492_v1 = vpop.f32.mrf.mxu0  ;;  %5055 = vmatmul.msk.bf16.gmra.mxu0 %vm1254_vm2, %v5261_v57 }
 0x1cd   : > { %vm7364_vm12 = vcmp.eq.f32.partialorder %v2466_v29, 8.507059e+37  ;;  %v2468_v42 = vand.u32 2147483648, %v7319_v50  ;;  %v7370_v16 = vadd.f32 %v7277_v40, %v1650_v9  ;;  %vm2463_vm15 = vweird.f32 %v5538_v39  ;;  %v5277_v29 = vld [vmem:[%s6124_s11 + $0xf8] sm:$0xff] }
 0x1ce   : > { %v5540_v25 = vpop.eup %5539  ;;  %v4583_v35 = vsel %vm4341_vm14, %v4318_v14, 0.0  ;;  %v2460_v33 = vmul.f32 %v5538_v39, %v2459_v22  ;;  %5545 = vpow2.f32 %v5116_v38  ;;  %v7379_v46 = vadd.f32 %v7277_v40, %v1730_v30  ;;  %vm2464_vm6 = vmor %vm2462_vm11, %vm2463_vm15  ;;  %5071 = vmatmul.msk.bf16.gmra.mxu1 %vm1254_vm2, %v5277_v29 }
 0x1cf   : > { %v5542_v10 = vpop.eup %5541  ;;  %v7372_v21 = vadd.f32 %v4583_v35, %v4582_v37  ;;  %v2938_v51 = vmul.f32 %v5540_v25, %v7337_v27  ;;  %v5180_v24 = vmul.f32 -1.442695, %v7370_v16  ;;  %v2946_v45 = vand.u32 2147483647, %v7337_v27 }
 0x1d0   : > { %v7375_v8 = vadd.f32 1.0, %v5542_v10  ;;  %v2461_v26 = vadd.f32 %v5538_v39, %v2460_v33  ;;  %5547 = vpow2.f32 %v5148_v11  ;;  %v2469_v41 = vor.u32 1.1754944e-38, %v2468_v42 }
 0x1d1   : > { %v2939_v15 = vsub.f32 1.0, %v2938_v51  ;;  %v2948_v31 = vand.u32 2147483648, %v7337_v27  ;;  %v7387_v48 = vadd.f32 %v7277_v40, %v1492_v1  ;;  %v5544_v63 = vpop.eup %5543  ;;  %vm2943_vm13 = vweird.f32 %v5540_v25 }
 0x1d2   : > { %5549 = vrcp.f32 %v7375_v8  ;;  %v2465_v37 = vsel %vm2464_vm6, %v5538_v39, %v2461_v26  ;;  %vm2942_vm0 = vweird.f32 %v7337_v27  ;;  %v7392_v50 = vadd.f32 1.0, %v5544_v63  ;;  %v5293_v39 = vld [vmem:[%s6124_s11 + $0x178] sm:$0xff] }
 0x1d3   : > { %v2940_v56 = vmul.f32 %v5540_v25, %v2939_v15  ;;  %5551 = vpow2.f32 %v5180_v24  ;;  %v2470_v4 = vsel %vm7364_vm12, %v2469_v41, %v2465_v37  ;;  %v5212_v20 = vmul.f32 -1.442695, %v7379_v46  ;;  %vm2944_vm3 = vmor %vm2942_vm0, %vm2943_vm13  ;;  %5087 = vmatmul.msk.bf16.gmra.mxu2 %vm1254_vm2, %v5293_v39 }
 0x1d4   : > { %v4223_v0 = vmul.f32 %v2470_v4, %v7216_v58  ;;  %vm2947_vm1 = vcmp.eq.f32.partialorder %v2946_v45, 8.507059e+37  ;;  %v3426_v18 = vand.u32 2147483647, %v7375_v8  ;;  %v5546_v54 = vpop.eup %5545  ;;  %v2949_v19 = vor.u32 1.1754944e-38, %v2948_v31 }
 0x1d5   : > { %v2941_v59 = vadd.f32 %v5540_v25, %v2940_v56  ;;  %5553 = vrcp.f32 %v7392_v50  ;;  %v5117_v43 = vmul.f32 -1.442695, %v7387_v48  ;;  %v7400_v60 = vadd.f32 %v7277_v40, %v1572_v3 }
 0x1d6   : > { %v5548_v27 = vpop.eup %5547  ;;  %v4363_v58 = vsel %vm4341_vm14, %v4223_v0, 0.0  ;;  %vm3422_vm4 = vweird.f32 %v7375_v8  ;;  %v7404_v13 = vadd.f32 1.0, %v5546_v54  ;;  %v3428_v47 = vand.u32 2147483648, %v7375_v8 }
 0x1d7   : > { %v2945_v55 = vsel %vm2944_vm3, %v5540_v25, %v2941_v59  ;;  %v7407_v5 = vadd.f32 %v4363_v58, %v7328_v2  ;;  %5555 = vpow2.f32 %v5212_v20  ;;  %vm7415_vm5 = vcmp.eq.f32.partialorder %v3426_v18, 8.507059e+37  ;;  %v5309_v2 = vld [vmem:[%s6124_s11 + $0x1f8] sm:$0xff] }
 0x1d8   : > { %v5550_v17 = vpop.eup %5549  ;;  %v2950_v52 = vsel %vm2947_vm1, %v2949_v19, %v2945_v55  ;;  %5557 = vrcp.f32 %v7404_v13  ;;  %v3906_v34 = vand.u32 2147483647, %v7392_v50  ;;  %v3908_v9 = vand.u32 2147483648, %v7392_v50  ;;  %5103 = vmatmul.msk.bf16.gmra.mxu3 %vm1254_vm2, %v5309_v2 }
 0x1d9   : > { %v5552_v6 = vpop.eup %5551  ;;  %v4255_v61 = vmul.f32 %v2950_v52, %v7229_v44  ;;  %v3418_v53 = vmul.f32 %v5550_v17, %v7375_v8  ;;  %v7423_v14 = vadd.f32 1.0, %v5548_v27  ;;  %v5149_v22 = vmul.f32 -1.442695, %v7400_v60 }
 0x1da   : > { %v7429_v11 = vadd.f32 1.0, %v5552_v6  ;;  %5559 = vpow2.f32 %v5117_v43  ;;  %v2481_v35 = vand.u32 2147483647, %v7404_v13  ;;  %v2483_v28 = vand.u32 2147483648, %v7404_v13  ;;  %v1652_v6 = vpop.f32.mrf.mxu2 }
 0x1db   : > { %v4437_v44 = vsel %vm4341_vm14, %v4255_v61, 0.0  ;;  %v3419_v38 = vsub.f32 1.0, %v3418_v53  ;;  %v5554_v30 = vpop.eup %5553  ;;  %5561 = vrcp.f32 %v7423_v14  ;;  %vm3423_vm7 = vweird.f32 %v5550_v17 }
 0x1dc   : > { %v7434_v25 = vadd.f32 %v4437_v44, %v7341_v62  ;;  %v3429_v10 = vor.u32 1.1754944e-38, %v3428_v47  ;;  %v3898_v33 = vmul.f32 %v5554_v30, %v7392_v50  ;;  %vm3902_vm8 = vweird.f32 %v7392_v50  ;;  %vm3424_vm10 = vmor %vm3422_vm4, %vm3423_vm7 }
 0x1dd   : > { %v3420_v42 = vmul.f32 %v5550_v17, %v3419_v38  ;;  %v5556_v51 = vpop.eup %5555  ;;  %vm7441_vm9 = vcmp.eq.f32.partialorder %v3906_v34, 8.507059e+37  ;;  %v3909_v62 = vor.u32 1.1754944e-38, %v3908_v9  ;;  %5563 = vrcp.f32 %v7429_v11 }
 0x1de   : > { %v5558_v24 = vpop.eup %5557  ;;  %v3899_v15 = vsub.f32 1.0, %v3898_v33  ;;  %vm2477_vm2 = vweird.f32 %v7404_v13  ;;  %5565 = vpow2.f32 %v5149_v22  ;;  %vm3903_vm11 = vweird.f32 %v5554_v30 }
 0x1df   : > { %v3421_v26 = vadd.f32 %v5550_v17, %v3420_v42  ;;  %v2473_v45 = vmul.f32 %v5558_v24, %v7404_v13  ;;  %vm7450_vm12 = vcmp.eq.f32.partialorder %v2481_v35, 8.507059e+37  ;;  %v2484_v31 = vor.u32 1.1754944e-38, %v2483_v28  ;;  %vm3904_vm0 = vmor %vm3902_vm8, %vm3903_vm11  ;;  %v1732_v35 = vpop.f32.mrf.mxu3 }
 0x1e0   : > { %v2961_v63 = vand.u32 2147483647, %v7423_v14  ;;  %v5560_v37 = vpop.eup %5559  ;;  %v3900_v3 = vmul.f32 %v5554_v30, %v3899_v15  ;;  %vm2957_vm15 = vweird.f32 %v7423_v14  ;;  %v2963_v4 = vand.u32 2147483648, %v7423_v14 }
 0x1e1   : > { %v3425_v56 = vsel %vm3424_vm10, %v5550_v17, %v3421_v26  ;;  %v3441_v8 = vand.u32 2147483647, %v7429_v11  ;;  %v5562_v20 = vpop.eup %5561  ;;  %v2474_v59 = vsub.f32 1.0, %v2473_v45  ;;  %v3443_v18 = vand.u32 2147483648, %v7429_v11 }
 0x1e2   : > { %v3430_v0 = vsel %vm7415_vm5, %v3429_v10, %v3425_v56  ;;  %v7461_v54 = vadd.f32 1.0, %v5556_v51  ;;  %v3901_v43 = vadd.f32 %v5554_v30, %v3900_v3  ;;  %vm2478_vm6 = vweird.f32 %v5558_v24 }
 0x1e3   : > { %v4287_v19 = vmul.f32 %v3430_v0, %v7280_v12  ;;  %v2953_v27 = vmul.f32 %v5562_v20, %v7423_v14  ;;  %vm3437_vm13 = vweird.f32 %v7429_v11  ;;  %v5564_v58 = vpop.eup %5563  ;;  %v2475_v55 = vmul.f32 %v5558_v24, %v2474_v59  ;;  %vm2479_vm3 = vmor %vm2477_vm2, %vm2478_vm6 }
 0x1e4   : > { %vm7469_vm1 = vcmp.eq.f32.partialorder %v2961_v63, 8.507059e+37  ;;  %5567 = vrcp.f32 %v7461_v54  ;;  %v7474_v52 = vadd.f32 1.0, %v5560_v37  ;;  %v5566_v12 = vpop.eup %5565  ;;  %v3905_v57 = vsel %vm3904_vm0, %v5554_v30, %v3901_v43 }
 0x1e5   : > { %v4511_v47 = vsel %vm4341_vm14, %v4287_v19, 0.0  ;;  %v2954_v29 = vsub.f32 1.0, %v2953_v27  ;;  %v3433_v39 = vmul.f32 %v5564_v58, %v7429_v11  ;;  %v3910_v61 = vsel %vm7441_vm9, %v3909_v62, %v3905_v57 }
 0x1e6   : > { %v4512_v50 = vadd.f32 %v4511_v47, %v7357_v36  ;;  %v2476_v53 = vadd.f32 %v5558_v24, %v2475_v55  ;;  %v2964_v7 = vor.u32 1.1754944e-38, %v2963_v4  ;;  %v4319_v2 = vmul.f32 %v3910_v61, %v7285_v32 }
 0x1e7   : > { %v2955_v34 = vmul.f32 %v5562_v20, %v2954_v29  ;;  %vm2958_vm4 = vweird.f32 %v5562_v20  ;;  %v3434_v9 = vsub.f32 1.0, %v3433_v39  ;;  %vm3438_vm5 = vweird.f32 %v5564_v58  ;;  %v1735_v57 = vpop.f32.mrf.mxu3 }
 0x1e8   : > { %v2480_v22 = vsel %vm2479_vm3, %v5558_v24, %v2476_v53  ;;  %v3921_v44 = vand.u32 2147483647, %v7461_v54  ;;  %5569 = vrcp.f32 %v7474_v52  ;;  %v4585_v36 = vsel %vm4341_vm14, %v4319_v2, 0.0  ;;  %vm2959_vm7 = vmor %vm2957_vm15, %vm2958_vm4 }
 0x1e9   : > { %v2485_v38 = vsel %vm7450_vm12, %v2484_v31, %v2480_v22  ;;  %v2956_v30 = vadd.f32 %v5562_v20, %v2955_v34  ;;  %v3435_v32 = vmul.f32 %v5564_v58, %v3434_v9  ;;  %v7491_v13 = vadd.f32 %v4585_v36, %v7372_v21  ;;  %vm3439_vm2 = vmor %vm3437_vm13, %vm3438_vm5  ;;  %v1495_v31 = vpop.f32.mrf.mxu0 }
 0x1ea   : > { %v5568_v28 = vpop.eup %5567  ;;  %v4224_v42 = vmul.f32 %v2485_v38, %v7350_v23  ;;  %vm7496_vm8 = vcmp.eq.f32.partialorder %v3441_v8, 8.507059e+37  ;;  %v3444_v33 = vor.u32 1.1754944e-38, %v3443_v18  ;;  %vm3917_vm9 = vweird.f32 %v7461_v54  ;;  %v1575_v8 = vpop.f32.mrf.mxu1 }
 0x1eb   : > { %v2960_v51 = vsel %vm2959_vm7, %v5562_v20, %v2956_v30  ;;  %v3436_v1 = vadd.f32 %v5564_v58, %v3435_v32  ;;  %v3913_v62 = vmul.f32 %v5568_v28, %v7461_v54  ;;  %vm7508_vm10 = vcmp.eq.f32.partialorder %v3921_v44, 8.507059e+37  ;;  %v1655_v20 = vpop.f32.mrf.mxu2 }
 0x1ec   : > { %v4365_v24 = vsel %vm4341_vm14, %v4224_v42, 0.0  ;;  %v2965_v21 = vsel %vm7469_vm1, %v2964_v7, %v2960_v51  ;;  %v3923_v14 = vand.u32 2147483648, %v7461_v54  ;;  %vm3918_vm11 = vweird.f32 %v5568_v28 }
 0x1ed   : > { %v7514_v26 = vadd.f32 %v4365_v24, %v7407_v5  ;;  %v4256_v15 = vmul.f32 %v2965_v21, %v7353_v49  ;;  %v3440_v45 = vsel %vm3439_vm2, %v5564_v58, %v3436_v1  ;;  %v3914_v41 = vsub.f32 1.0, %v3913_v62  ;;  %vm3919_vm15 = vmor %vm3917_vm9, %vm3918_vm11 }
 0x1ee   : > { %v5570_v63 = vpop.eup %5569  ;;  %v3445_v37 = vsel %vm7496_vm8, %v3444_v33, %v3440_v45  ;;  %v7519_v11 = vadd.f32 1.0, %v5566_v12  ;;  %v7522_v56 = vadd.f32 %v7277_v40, %v1652_v6  ;;  %vm2492_vm12 = vweird.f32 %v7474_v52 }
 0x1ef   : > { %v4439_v3 = vsel %vm4341_vm14, %v4256_v15, 0.0  ;;  %v4288_v5 = vmul.f32 %v3445_v37, %v7370_v16  ;;  %v3915_v4 = vmul.f32 %v5568_v28, %v3914_v41  ;;  %v2488_v49 = vmul.f32 %v5570_v63, %v7474_v52 }
 0x1f0   : > { %v7528_v0 = vadd.f32 %v4439_v3, %v7434_v25  ;;  %v2496_v59 = vand.u32 2147483647, %v7474_v52  ;;  %5571 = vrcp.f32 %v7519_v11  ;;  %v3924_v43 = vor.u32 1.1754944e-38, %v3923_v14 }
 0x1f1   : > { %v4513_v18 = vsel %vm4341_vm14, %v4288_v5, 0.0  ;;  %v3916_v19 = vadd.f32 %v5568_v28, %v3915_v4  ;;  %v2489_v27 = vsub.f32 1.0, %v2488_v49  ;;  %v2498_v25 = vand.u32 2147483648, %v7474_v52  ;;  %v1497_v38 = vpop.f32.mrf.mxu0  ;;  %v1737_v4 = vpop.f32.mrf.mxu3 }
 0x1f2   : > { %v7534_v16 = vadd.f32 %v4513_v18, %v4512_v50  ;;  %v5181_v58 = vmul.f32 -1.442695, %v7522_v56  ;;  %v7542_v55 = vadd.f32 %v7277_v40, %v1732_v35  ;;  %vm2493_vm6 = vweird.f32 %v5570_v63  ;;  %v1577_v33 = vpop.f32.mrf.mxu1 }
 0x1f3   : > { %v3920_v17 = vsel %vm3919_vm15, %v5568_v28, %v3916_v19  ;;  %v2490_v12 = vmul.f32 %v5570_v63, %v2489_v27  ;;  %v7545_v47 = vadd.f32 %v7277_v40, %v1495_v31  ;;  %vm7549_vm13 = vcmp.eq.f32.partialorder %v2496_v59, 8.507059e+37  ;;  %vm2494_vm0 = vmor %vm2492_vm12, %vm2493_vm6  ;;  %v1657_v51 = vpop.f32.mrf.mxu2 }
 0x1f4   : > { %v3925_v29 = vsel %vm7508_vm10, %v3924_v43, %v3920_v17  ;;  %5573 = vpow2.f32 %v5181_v58  ;;  %v5213_v39 = vmul.f32 -1.442695, %v7542_v55  ;;  %v7557_v53 = vadd.f32 %v7277_v40, %v1575_v8 }
 0x1f5   : > { %v4320_v6 = vmul.f32 %v3925_v29, %v7379_v46  ;;  %v2491_v50 = vadd.f32 %v5570_v63, %v2490_v12  ;;  %v5118_v61 = vmul.f32 -1.442695, %v7545_v47  ;;  %v2499_v2 = vor.u32 1.1754944e-38, %v2498_v25 }
 0x1f6   : > { %v5572_v7 = vpop.eup %5571  ;;  %5575 = vpow2.f32 %v5213_v39  ;;  %v7562_v34 = vadd.f32 %v7277_v40, %v1655_v20  ;;  %v7565_v9 = vadd.f32 %v7277_v40, %v1735_v57  ;;  %v2976_v36 = vand.u32 2147483647, %v7519_v11 }
 0x1f7   : > { %v4587_v46 = vsel %vm4341_vm14, %v4320_v6, 0.0  ;;  %v2495_v22 = vsel %vm2494_vm0, %v5570_v63, %v2491_v50  ;;  %v2968_v44 = vmul.f32 %v5572_v7, %v7519_v11  ;;  %5577 = vpow2.f32 %v5118_v61 }
 0x1f8   : > { %v7571_v30 = vadd.f32 %v4587_v46, %v7491_v13  ;;  %v2500_v52 = vsel %vm7549_vm13, %v2499_v2, %v2495_v22  ;;  %v5150_v32 = vmul.f32 -1.442695, %v7557_v53  ;;  %v2978_v42 = vand.u32 2147483648, %v7519_v11 }
 0x1f9   : > { %v4225_v35 = vmul.f32 %v2500_v52, %v7387_v48  ;;  %v2969_v28 = vsub.f32 1.0, %v2968_v44  ;;  %v5182_v10 = vmul.f32 -1.442695, %v7562_v34  ;;  %vm2973_vm1 = vweird.f32 %v5572_v7 }
 0x1fa   : > { %v5574_v1 = vpop.eup %5573  ;;  %5579 = vpow2.f32 %v5150_v32  ;;  %v5214_v13 = vmul.f32 -1.442695, %v7565_v9  ;;  %v7581_v62 = vadd.f32 %v7277_v40, %v1497_v38  ;;  %v7590_v15 = vadd.f32 %v7277_v40, %v1577_v33 }
 0x1fb   : > { %v4367_v24 = vsel %vm4341_vm14, %v4225_v35, 0.0  ;;  %v2970_v21 = vmul.f32 %v5572_v7, %v2969_v28  ;;  %v7584_v23 = vadd.f32 1.0, %v5574_v1  ;;  %5581 = vpow2.f32 %v5182_v10 }
 0x1fc   : > { %v5576_v48 = vpop.eup %5575  ;;  %v7587_v14 = vadd.f32 %v4367_v24, %v7514_v26  ;;  %v7593_v45 = vadd.f32 %v7277_v40, %v1657_v51  ;;  %vm2972_vm3 = vweird.f32 %v7519_v11  ;;  %v2979_v63 = vor.u32 1.1754944e-38, %v2978_v42 }
 0x1fd   : > { %v2971_v41 = vadd.f32 %v5572_v7, %v2970_v21  ;;  %5583 = vrcp.f32 %v7584_v23  ;;  %v5578_v31 = vpop.eup %5577  ;;  %vm2974_vm4 = vmor %vm2972_vm3, %vm2973_vm1  ;;  %v7598_v37 = vadd.f32 1.0, %v5576_v48  ;;  %v5119_v26 = vmul.f32 -1.442695, %v7581_v62 }
 0x1fe   : > { %vm2977_vm5 = vcmp.eq.f32.partialorder %v2976_v36, 8.507059e+37  ;;  %v7601_v5 = vadd.f32 1.0, %v5578_v31  ;;  %5585 = vpow2.f32 %v5214_v13  ;;  %v5151_v11 = vmul.f32 -1.442695, %v7590_v15 }
 0x1ff   : > { %v2975_v3 = vsel %vm2974_vm4, %v5572_v7, %v2971_v41  ;;  %5587 = vrcp.f32 %v7598_v37  ;;  %v7606_v20 = vmul.f32 -1.442695, %v7593_v45  ;;  %v3456_v19 = vand.u32 2147483647, %v7584_v23 }
 0x200   : > { %v5580_v49 = vpop.eup %5579  ;;  %v2980_v8 = vsel %vm2977_vm5, %v2979_v63, %v2975_v3  ;;  %v3458_v43 = vand.u32 2147483648, %v7584_v23  ;;  %5589 = vrcp.f32 %v7601_v5  ;;  %vm3452_vm7 = vweird.f32 %v7584_v23 }
 0x201   : > { %v5582_v59 = vpop.eup %5581  ;;  %v4257_v18 = vmul.f32 %v2980_v8, %v7400_v60  ;;  %v7613_v27 = vadd.f32 1.0, %v5580_v49  ;;  %5591 = vpow2.f32 %v5119_v26  ;;  %v7616_v25 = vadd.f32 %v7277_v40, %v1737_v4  ;;  %v1580_v8 = vpop.f32.mrf.mxu1 }
 0x202   : > { %v3936_v12 = vand.u32 2147483647, %v7598_v37  ;;  %v3938_v60 = vand.u32 2147483648, %v7598_v37  ;;  %v7621_v57 = vadd.f32 1.0, %v5582_v59  ;;  %v2511_v39 = vand.u32 2147483647, %v7601_v5 }
 0x203   : > { %v5584_v58 = vpop.eup %5583  ;;  %v4441_v17 = vsel %vm4341_vm14, %v4257_v18, 0.0  ;;  %5593 = vpow2.f32 %v5151_v11  ;;  %vm7628_vm8 = vcmp.eq.f32.partialorder %v3456_v19, 8.507059e+37  ;;  %v3459_v61 = vor.u32 1.1754944e-38, %v3458_v43 }
 0x204   : > { %v7624_v29 = vadd.f32 %v4441_v17, %v7528_v0  ;;  %v3448_v54 = vmul.f32 %v5584_v58, %v7584_v23  ;;  %v5586_v6 = vpop.eup %5585  ;;  %v2513_v7 = vand.u32 2147483648, %v7601_v5  ;;  %5595 = vrcp.f32 %v7613_v27 }
 0x205   : > { %v5588_v2 = vpop.eup %5587  ;;  %vm3932_vm9 = vweird.f32 %v7598_v37  ;;  %vm2507_vm2 = vweird.f32 %v7601_v5  ;;  %5597 = vrcp.f32 %v7621_v57  ;;  %vm3453_vm10 = vweird.f32 %v5584_v58 }
 0x206   : > { %v3449_v46 = vsub.f32 1.0, %v3448_v54  ;;  %v5590_v0 = vpop.eup %5589  ;;  %v3928_v22 = vmul.f32 %v5588_v2, %v7598_v37  ;;  %vm7638_vm11 = vcmp.eq.f32.partialorder %v3936_v12, 8.507059e+37  ;;  %v3939_v36 = vor.u32 1.1754944e-38, %v3938_v60  ;;  %vm3454_vm0 = vmor %vm3452_vm7, %vm3453_vm10 }
 0x207   : > { %v2993_v38 = vand.u32 2147483648, %v7613_v27  ;;  %v5592_v52 = vpop.eup %5591  ;;  %v2503_v35 = vmul.f32 %v5590_v0, %v7601_v5  ;;  %vm7644_vm12 = vcmp.eq.f32.partialorder %v2511_v39, 8.507059e+37  ;;  %v2991_v42 = vand.u32 2147483647, %v7613_v27 }
 0x208   : > { %v3450_v32 = vmul.f32 %v5584_v58, %v3449_v46  ;;  %v3929_v10 = vsub.f32 1.0, %v3928_v22  ;;  %v2514_v33 = vor.u32 1.1754944e-38, %v2513_v7  ;;  %v3471_v51 = vand.u32 2147483647, %v7621_v57 }
 0x209   : > { %v7650_v1 = vadd.f32 1.0, %v5586_v6  ;;  %v5594_v13 = vpop.eup %5593  ;;  %vm3933_vm15 = vweird.f32 %v5588_v2  ;;  %v2504_v21 = vsub.f32 1.0, %v2503_v35  ;;  %vm2508_vm6 = vweird.f32 %v5590_v0 }
 0x20a   : > { %v3451_v24 = vadd.f32 %v5584_v58, %v3450_v32  ;;  %vm2987_vm13 = vweird.f32 %v7613_v27  ;;  %v5596_v48 = vpop.eup %5595  ;;  %v3930_v41 = vmul.f32 %v5588_v2, %v3929_v10  ;;  %v2994_v31 = vor.u32 1.1754944e-38, %v2993_v38  ;;  %vm3934_vm5 = vmor %vm3932_vm9, %vm3933_vm15 }
 0x20b   : > { %vm3467_vm1 = vweird.f32 %v7621_v57  ;;  %5599 = vrcp.f32 %v7650_v1  ;;  %v7658_v63 = vadd.f32 1.0, %v5592_v52  ;;  %v5598_v26 = vpop.eup %5597  ;;  %v2505_v4 = vmul.f32 %v5590_v0, %v2504_v21 }
 0x20c   : > { %v3455_v3 = vsel %vm3454_vm0, %v5584_v58, %v3451_v24  ;;  %v2983_v49 = vmul.f32 %v5596_v48, %v7613_v27  ;;  %vm7661_vm3 = vcmp.eq.f32.partialorder %v2991_v42, 8.507059e+37  ;;  %v3473_v23 = vand.u32 2147483648, %v7621_v57 }
 0x20d   : > { %v3460_v11 = vsel %vm7628_vm8, %v3459_v61, %v3455_v3  ;;  %v3931_v59 = vadd.f32 %v5588_v2, %v3930_v41  ;;  %v3463_v18 = vmul.f32 %v5598_v26, %v7621_v57  ;;  %vm7669_vm4 = vcmp.eq.f32.partialorder %v3471_v51, 8.507059e+37  ;;  %vm2509_vm8 = vmor %vm2507_vm2, %vm2508_vm6 }
 0x20e   : > { %v7673_v43 = vadd.f32 1.0, %v5594_v13  ;;  %v4289_v58 = vmul.f32 %v3460_v11, %v7522_v56  ;;  %v2506_v17 = vadd.f32 %v5590_v0, %v2505_v4  ;;  %v2984_v12 = vsub.f32 1.0, %v2983_v49 }
 0x20f   : > { %vm2988_vm7 = vweird.f32 %v5596_v48  ;;  %v3935_v60 = vsel %vm3934_vm5, %v5588_v2, %v3931_v59  ;;  %v3464_v54 = vsub.f32 1.0, %v3463_v18  ;;  %vm3468_vm10 = vweird.f32 %v5598_v26 }
 0x210   : > { %5601 = vrcp.f32 %v7658_v63  ;;  %v4515_v39 = vsel %vm4341_vm14, %v4289_v58, 0.0  ;;  %v3940_v56 = vsel %vm7638_vm11, %v3939_v36, %v3935_v60  ;;  %v2510_v6 = vsel %vm2509_vm8, %v5590_v0, %v2506_v17  ;;  %vm2989_vm9 = vmor %vm2987_vm13, %vm2988_vm7 }
 0x211   : > { %v2985_v37 = vmul.f32 %v5596_v48, %v2984_v12  ;;  %v5600_v50 = vpop.eup %5599  ;;  %v4516_v61 = vadd.f32 %v4515_v39, %v7534_v16  ;;  %v4321_v7 = vmul.f32 %v3940_v56, %v7542_v55  ;;  %v2515_v5 = vsel %vm7644_vm12, %v2514_v33, %v2510_v6  ;;  %vm3469_vm2 = vmor %vm3467_vm1, %vm3468_vm10 }
 0x212   : > { %v3465_v2 = vmul.f32 %v5598_v26, %v3464_v54  ;;  %v4226_v46 = vmul.f32 %v2515_v5, %v7545_v47  ;;  %v3474_v38 = vor.u32 1.1754944e-38, %v3473_v23  ;;  %v3943_v52 = vmul.f32 %v5600_v50, %v7650_v1  ;;  %v1660_v23 = vpop.f32.mrf.mxu2  ;;  %v1740_v54 = vpop.f32.mrf.mxu3 }
 0x213   : > { %v2986_v22 = vadd.f32 %v5596_v48, %v2985_v37  ;;  %v4589_v44 = vsel %vm4341_vm14, %v4321_v7, 0.0  ;;  %v3951_v16 = vand.u32 2147483647, %v7650_v1  ;;  %v3953_v55 = vand.u32 2147483648, %v7650_v1 }
 0x214   : > { %v3466_v0 = vadd.f32 %v5598_v26, %v3465_v2  ;;  %v4590_v36 = vadd.f32 %v4589_v44, %v7571_v30  ;;  %v4369_v32 = vsel %vm4341_vm14, %v4226_v46, 0.0  ;;  %v3944_v35 = vsub.f32 1.0, %v3943_v52 }
 0x215   : > { %v2990_v47 = vsel %vm2989_vm9, %v5596_v48, %v2986_v22  ;;  %v4370_v42 = vadd.f32 %v4369_v32, %v7587_v14  ;;  %vm3948_vm11 = vweird.f32 %v5600_v50  ;;  %vm3947_vm12 = vweird.f32 %v7650_v1 }
 0x216   : > { %v5602_v28 = vpop.eup %5601  ;;  %v2995_v27 = vsel %vm7661_vm3, %v2994_v31, %v2990_v47  ;;  %v3470_v10 = vsel %vm3469_vm2, %v5598_v26, %v3466_v0  ;;  %v3945_v51 = vmul.f32 %v5600_v50, %v3944_v35  ;;  %vm7712_vm15 = vcmp.eq.f32.partialorder %v3951_v16, 8.507059e+37  ;;  %vm3949_vm6 = vmor %vm3947_vm12, %vm3948_vm11  ;;  %v1500_v26 = vpop.f32.mrf.mxu0 }
 0x217   : > { %v4258_v33 = vmul.f32 %v2995_v27, %v7557_v53  ;;  %v3475_v30 = vsel %vm7669_vm4, %v3474_v38, %v3470_v10  ;;  %v2518_v13 = vmul.f32 %v5602_v28, %v7658_v63  ;;  %v3954_v14 = vor.u32 1.1754944e-38, %v3953_v55 }
 0x218   : > { %v4290_v57 = vmul.f32 %v3475_v30, %v7562_v34  ;;  %v3946_v48 = vadd.f32 %v5600_v50, %v3945_v51  ;;  %5603 = vrcp.f32 %v7673_v43  ;;  %v2526_v34 = vand.u32 2147483647, %v7658_v63 }
 0x219   : > { %v4443_v21 = vsel %vm4341_vm14, %v4258_v33, 0.0  ;;  %v2519_v41 = vsub.f32 1.0, %v2518_v13  ;;  %v2528_v1 = vand.u32 2147483648, %v7658_v63  ;;  %vm2523_vm13 = vweird.f32 %v5602_v28 }
 0x21a   : > { %v7719_v53 = vadd.f32 %v4443_v21, %v7624_v29  ;;  %v4517_v31 = vsel %vm4341_vm14, %v4290_v57, 0.0  ;;  %v3950_v4 = vsel %vm3949_vm6, %v5600_v50, %v3946_v48  ;;  %vm2522_vm0 = vweird.f32 %v7658_v63 }
 0x21b   : > { %v7725_v3 = vadd.f32 %v4517_v31, %v4516_v61  ;;  %v2520_v49 = vmul.f32 %v5602_v28, %v2519_v41  ;;  %v3955_v29 = vsel %vm7712_vm15, %v3954_v14, %v3950_v4  ;;  %5605 = vpow2.f32 %v7606_v20  ;;  %vm2524_vm1 = vmor %vm2522_vm0, %vm2523_vm13 }
 0x21c   : > { %v4322_v11 = vmul.f32 %v3955_v29, %v7565_v9  ;;  %v5215_v18 = vmul.f32 -1.442695, %v7616_v25  ;;  %v7734_v19 = vadd.f32 %v7277_v40, %v1500_v26  ;;  %vm2527_vm3 = vcmp.eq.f32.partialorder %v2526_v34, 8.507059e+37 }
 0x21d   : > { %v2521_v59 = vadd.f32 %v5602_v28, %v2520_v49  ;;  %v2529_v58 = vor.u32 1.1754944e-38, %v2528_v1  ;;  %v7737_v17 = vadd.f32 %v7277_v40, %v1580_v8  ;;  %v7740_v12 = vadd.f32 %v7277_v40, %v1660_v23 }
 0x21e   : > { %v5604_v63 = vpop.eup %5603  ;;  %v4591_v20 = vsel %vm4341_vm14, %v4322_v11, 0.0  ;;  %5607 = vpow2.f32 %v5215_v18  ;;  %v5120_v9 = vmul.f32 -1.442695, %v7734_v19  ;;  %v3008_v5 = vand.u32 2147483648, %v7673_v43 }
 0x21f   : > { %v2525_v60 = vsel %vm2524_vm1, %v5602_v28, %v2521_v59  ;;  %v7744_v39 = vadd.f32 %v4591_v20, %v4590_v36  ;;  %v2998_v6 = vmul.f32 %v5604_v63, %v7673_v43  ;;  %v5152_v50 = vmul.f32 -1.442695, %v7737_v17 }
 0x220   : > { %v2530_v56 = vsel %vm2527_vm3, %v2529_v58, %v2525_v60  ;;  %5609 = vpow2.f32 %v5120_v9  ;;  %v7751_v2 = vadd.f32 %v7277_v40, %v1740_v54  ;;  %v5184_v38 = vmul.f32 -1.442695, %v7740_v12 }
 0x221   : > { %v4227_v37 = vmul.f32 %v2530_v56, %v7581_v62  ;;  %v5606_v61 = vpop.eup %5605  ;;  %v2999_v7 = vsub.f32 1.0, %v2998_v6  ;;  %5611 = vpow2.f32 %v5152_v50  ;;  %vm3003_vm4 = vweird.f32 %v5604_v63 }
 0x222   : > { %v2243_v22 = vadd.f32 1.0, %v5606_v61  ;;  %v3006_v62 = vand.u32 2147483647, %v7673_v43  ;;  %vm3002_vm5 = vweird.f32 %v7673_v43  ;;  %v5216_v40 = vmul.f32 -1.442695, %v7751_v2  ;;  %v1502_v43 = vpop.f32.mrf.mxu0 }
 0x223   : > { %v4371_v46 = vsel %vm4341_vm14, %v4227_v37, 0.0  ;;  %v3000_v44 = vmul.f32 %v5604_v63, %v2999_v7  ;;  %vm3004_vm7 = vmor %vm3002_vm5, %vm3003_vm4  ;;  %v3009_v32 = vor.u32 1.1754944e-38, %v3008_v5  ;;  %v1582_v7 = vpop.f32.mrf.mxu1 }
 0x224   : > { %v7755_v52 = vadd.f32 %v4371_v46, %v4370_v42  ;;  %v5608_v0 = vpop.eup %5607  ;;  %5613 = vrcp.f32 %v2243_v22  ;;  %vm3007_vm8 = vcmp.eq.f32.partialorder %v3006_v62, 8.507059e+37  ;;  %v3488_v24 = vand.u32 2147483648, %v2243_v22 }
 0x225   : > { %v3001_v16 = vadd.f32 %v5604_v63, %v3000_v44  ;;  %v7759_v55 = vadd.f32 1.0, %v5608_v0  ;;  %5615 = vpow2.f32 %v5184_v38  ;;  %vm3482_vm10 = vweird.f32 %v2243_v22 }
 0x226   : > { %v5610_v36 = vpop.eup %5609  ;;  %v3489_v26 = vor.u32 1.1754944e-38, %v3488_v24 }
 0x227   : > { %v3005_v47 = vsel %vm3004_vm7, %v5604_v63, %v3001_v16  ;;  %5617 = vrcp.f32 %v7759_v55  ;;  %v5612_v35 = vpop.eup %5611  ;;  %v7763_v42 = vadd.f32 1.0, %v5610_v36  ;;  %v3966_v29 = vand.u32 2147483647, %v7759_v55 }
 0x228   : > { %v3010_v28 = vsel %vm3007_vm8, %v3009_v32, %v3005_v47  ;;  %v7766_v10 = vadd.f32 1.0, %v5612_v35  ;;  %5619 = vpow2.f32 %v5216_v40  ;;  %v3968_v11 = vand.u32 2147483648, %v7759_v55 }
 0x229   : > { %v4259_v27 = vmul.f32 %v3010_v28, %v7590_v15  ;;  %5621 = vrcp.f32 %v7763_v42  ;;  %v7777_v15 = vld [vmem:[%s9757_s2] ss:$0 sm:$0xff]  ;;  %vm3962_vm15 = vweird.f32 %v7759_v55  ;;  %vm3967_vm13 = vcmp.eq.f32.partialorder %v3966_v29, 8.507059e+37 }
 0x22a   : > { %v5614_v33 = vpop.eup %5613  ;;  %5623 = vrcp.f32 %v7766_v10  ;;  %v7780_v14 = vadd.f32 %v7777_v15, %v1502_v43  ;;  %v3969_v37 = vor.u32 1.1754944e-38, %v3968_v11  ;;  %v2543_v16 = vand.u32 2147483648, %v7763_v42 }
 0x22b   : > { %v4445_v30 = vsel %vm4341_vm14, %v4259_v27, 0.0  ;;  %v3478_v51 = vmul.f32 %v5614_v33, %v2243_v22  ;;  %v5616_v13 = vpop.eup %5615  ;;  %vm3483_vm9 = vweird.f32 %v5614_v33  ;;  %vm2537_vm1 = vweird.f32 %v7763_v42 }
 0x22c   : > { %v7771_v57 = vadd.f32 %v4445_v30, %v7719_v53  ;;  %v3486_v53 = vand.u32 2147483647, %v2243_v22  ;;  %v7785_v49 = vadd.f32 1.0, %v5616_v13  ;;  %v5121_v8 = vmul.f32 -1.442695, %v7780_v14  ;;  %vm3484_vm2 = vmor %vm3482_vm10, %vm3483_vm9 }
 0x22d   : > { %v5618_v21 = vpop.eup %5617  ;;  %v3479_v48 = vsub.f32 1.0, %v3478_v51  ;;  %v2541_v40 = vand.u32 2147483647, %v7763_v42  ;;  %v3021_v35 = vand.u32 2147483647, %v7766_v10  ;;  %v3023_v27 = vand.u32 2147483648, %v7766_v10 }
 0x22e   : > { %v3958_v41 = vmul.f32 %v5618_v21, %v7759_v55  ;;  %v5620_v31 = vpop.eup %5619  ;;  %vm3963_vm11 = vweird.f32 %v5618_v21  ;;  %5625 = vrcp.f32 %v7785_v49  ;;  %vm3487_vm12 = vcmp.eq.f32.partialorder %v3486_v53, 8.507059e+37  ;;  %v1742_v53 = vpop.f32.mrf.mxu3 }
 0x22f   : > { %v3480_v34 = vmul.f32 %v5614_v33, %v3479_v48  ;;  %v7783_v1 = vpop.eup %5621  ;;  %v7795_v63 = vadd.f32 1.0, %v5620_v31  ;;  %5627 = vpow2.f32 %v5121_v8  ;;  %vm3964_vm6 = vmor %vm3962_vm15, %vm3963_vm11  ;;  %v7815_v55 = vadd.f32 %v7777_v15, %v1582_v7 }
 0x230   : > { %v3959_v4 = vsub.f32 1.0, %v3958_v41  ;;  %v2533_v59 = vmul.f32 %v7783_v1, %v7763_v42  ;;  %v7792_v18 = vpop.eup %5623  ;;  %vm2538_vm0 = vweird.f32 %v7783_v1  ;;  %v2544_v51 = vor.u32 1.1754944e-38, %v2543_v16 }
 0x231   : > { %v3481_v23 = vadd.f32 %v5614_v33, %v3480_v34  ;;  %v3013_v9 = vmul.f32 %v7792_v18, %v7766_v10  ;;  %5629 = vrcp.f32 %v7795_v63  ;;  %vm7824_vm3 = vmor %vm2537_vm1, %vm2538_vm0  ;;  %vm3018_vm4 = vweird.f32 %v7792_v18 }
 0x232   : > { %v3960_v58 = vmul.f32 %v5618_v21, %v3959_v4  ;;  %v2534_v60 = vsub.f32 1.0, %v2533_v59  ;;  %vm3017_vm5 = vweird.f32 %v7766_v10  ;;  %v5153_v13 = vmul.f32 -1.442695, %v7815_v55 }
 0x233   : > { %v3485_v20 = vsel %vm3484_vm2, %v5614_v33, %v3481_v23  ;;  %v3014_v61 = vsub.f32 1.0, %v3013_v9  ;;  %v1662_v33 = vpop.f32.mrf.mxu2  ;;  %vm2542_vm7 = vcmp.eq.f32.partialorder %v2541_v40, 8.507059e+37  ;;  %vm7840_vm8 = vmor %vm3017_vm5, %vm3018_vm4  ;;  %vm3022_vm10 = vcmp.eq.f32.partialorder %v3021_v35, 8.507059e+37 }
 0x234   : > { %v3490_v54 = vsel %vm3487_vm12, %v3489_v26, %v3485_v20  ;;  %v3961_v56 = vadd.f32 %v5618_v21, %v3960_v58  ;;  %v2535_v50 = vmul.f32 %v7783_v1, %v2534_v60  ;;  %v3024_v31 = vor.u32 1.1754944e-38, %v3023_v27 }
 0x235   : > { %v4291_v6 = vmul.f32 %v3490_v54, %v7593_v45  ;;  %v3015_v44 = vmul.f32 %v7792_v18, %v3014_v61  ;;  %v7807_v45 = vpop.eup %5625  ;;  %v3503_v34 = vand.u32 2147483648, %v7785_v49  ;;  %vm3497_vm2 = vweird.f32 %v7785_v49 }
 0x236   : > { %v3965_v5 = vsel %vm3964_vm6, %v5618_v21, %v3961_v56  ;;  %v2536_v38 = vadd.f32 %v7783_v1, %v2535_v50  ;;  %v3493_v36 = vmul.f32 %v7807_v45, %v7785_v49  ;;  %v5628_v32 = vpop.eup %5627  ;;  %vm3498_vm9 = vweird.f32 %v7807_v45  ;;  %v1585_v50 = vpop.f32.mrf.mxu1 }
 0x237   : > { %v4519_v46 = vsel %vm4341_vm14, %v4291_v6, 0.0  ;;  %v3970_v22 = vsel %vm3967_vm13, %v3969_v37, %v3965_v5  ;;  %v5630_v30 = vpop.eup %5629  ;;  %v7853_v26 = vadd.f32 1.0, %v5628_v32  ;;  %5631 = vpow2.f32 %v5153_v13  ;;  %vm7860_vm11 = vmor %vm3497_vm2, %vm3498_vm9 }
 0x238   : > { %v7810_v62 = vadd.f32 %v4519_v46, %v7725_v3  ;;  %v4323_v0 = vmul.f32 %v3970_v22, %v7616_v25  ;;  %v3016_v25 = vadd.f32 %v7792_v18, %v3015_v44  ;;  %v2540_v42 = vsel %vm7824_vm3, %v7783_v1, %v2536_v38  ;;  %v1745_v3 = vpop.f32.mrf.mxu3 }
 0x239   : > { %v3494_v43 = vsub.f32 1.0, %v3493_v36  ;;  %v2545_v21 = vsel %vm2542_vm7, %v2544_v51, %v2540_v42  ;;  %v3973_v41 = vmul.f32 %v5630_v30, %v7795_v63  ;;  %v3501_v23 = vand.u32 2147483647, %v7785_v49 }
 0x23a   : > { %v4593_v47 = vsel %vm4341_vm14, %v4323_v0, 0.0  ;;  %v3020_v48 = vsel %vm7840_vm8, %v7792_v18, %v3016_v25  ;;  %v4228_v4 = vmul.f32 %v2545_v21, %v7734_v19  ;;  %v7858_v29 = vadd.f32 %v7777_v15, %v1662_v33  ;;  %v1505_v18 = vpop.f32.mrf.mxu0 }
 0x23b   : > { %v7832_v28 = vadd.f32 %v4593_v47, %v7744_v39  ;;  %v3495_v39 = vmul.f32 %v7807_v45, %v3494_v43  ;;  %v3974_v1 = vsub.f32 1.0, %v3973_v41  ;;  %v3025_v8 = vsel %vm3022_vm10, %v3024_v31, %v3020_v48  ;;  %v1665_v61 = vpop.f32.mrf.mxu2 }
 0x23c   : > { %vm3978_vm12 = vweird.f32 %v5630_v30  ;;  %5633 = vrcp.f32 %v7853_v26  ;;  %v3504_v19 = vor.u32 1.1754944e-38, %v3503_v34  ;;  %v3981_v20 = vand.u32 2147483647, %v7795_v63 }
 0x23d   : > { %v3496_v10 = vadd.f32 %v7807_v45, %v3495_v39  ;;  %v3975_v59 = vmul.f32 %v5630_v30, %v3974_v1  ;;  %v3983_v49 = vand.u32 2147483648, %v7795_v63  ;;  %v4260_v60 = vmul.f32 %v3025_v8, %v7737_v17  ;;  %v5632_v7 = vpop.eup %5631 }
 0x23e   : > { %vm3977_vm15 = vweird.f32 %v7795_v63  ;;  %v5185_v54 = vmul.f32 -1.442695, %v7858_v29  ;;  %v7874_v56 = vsel %vm4341_vm14, %v4228_v4, 0.0  ;;  %vm3502_vm6 = vcmp.eq.f32.partialorder %v3501_v23, 8.507059e+37 }
 0x23f   : > { %v3500_v58 = vsel %vm7860_vm11, %v7807_v45, %v3496_v10  ;;  %v3976_v9 = vadd.f32 %v5630_v30, %v3975_v59  ;;  %vm7876_vm13 = vmor %vm3977_vm15, %vm3978_vm12  ;;  %v7881_v37 = vadd.f32 %v7777_v15, %v1742_v53  ;;  %v7886_v5 = vadd.f32 %v7777_v15, %v1505_v18 }
 0x240   : > { %v3505_v17 = vsel %vm3502_vm6, %v3504_v19, %v3500_v58  ;;  %5635 = vpow2.f32 %v5185_v54  ;;  %vm3982_vm0 = vcmp.eq.f32.partialorder %v3981_v20, 8.507059e+37  ;;  %v3984_v46 = vor.u32 1.1754944e-38, %v3983_v49  ;;  %v1587_v20 = vpop.f32.mrf.mxu1 }
 0x241   : > { %v3980_v63 = vsel %vm7876_vm13, %v5630_v30, %v3976_v9  ;;  %v7888_v22 = vadd.f32 1.0, %v5632_v7  ;;  %v5217_v38 = vmul.f32 -1.442695, %v7881_v37  ;;  %v7892_v45 = vsel %vm4341_vm14, %v4260_v60, 0.0 }
 0x242   : > { %v5634_v44 = vpop.eup %5633  ;;  %v5122_v0 = vmul.f32 -1.442695, %v7886_v5  ;;  %v7896_v16 = vadd.f32 %v7777_v15, %v1585_v50  ;;  %v7899_v40 = vadd.f32 %v7777_v15, %v1665_v61  ;;  %v4292_v36 = vmul.f32 %v3505_v17, %v7740_v12  ;;  %v1507_v13 = vpop.f32.mrf.mxu0 }
 0x243   : > { %v3985_v32 = vsel %vm3982_vm0, %v3984_v46, %v3980_v63  ;;  %v2548_v47 = vmul.f32 %v5634_v44, %v7853_v26  ;;  %5637 = vrcp.f32 %v7888_v22  ;;  %vm2552_vm1 = vweird.f32 %v7853_v26  ;;  %v1667_v9 = vpop.f32.mrf.mxu2 }
 0x244   : > { %v2556_v25 = vand.u32 2147483647, %v7853_v26  ;;  %v2558_v35 = vand.u32 2147483648, %v7853_v26  ;;  %5639 = vpow2.f32 %v5217_v38  ;;  %v5154_v27 = vmul.f32 -1.442695, %v7896_v16 }
 0x245   : > { %v2549_v42 = vsub.f32 1.0, %v2548_v47  ;;  %5641 = vpow2.f32 %v5122_v0  ;;  %v5186_v43 = vmul.f32 -1.442695, %v7899_v40  ;;  %v4324_v33 = vmul.f32 %v3985_v32, %v7751_v2 }
 0x246   : > { %v5636_v12 = vpop.eup %5635  ;;  %vm2553_vm3 = vweird.f32 %v5634_v44  ;;  %v3036_v30 = vand.u32 2147483647, %v7888_v22  ;;  %v7912_v51 = vadd.f32 %v7777_v15, %v1745_v3  ;;  %v3038_v39 = vand.u32 2147483648, %v7888_v22 }
 0x247   : > { %v2550_v24 = vmul.f32 %v5634_v44, %v2549_v42  ;;  %v7915_v21 = vadd.f32 1.0, %v5636_v12  ;;  %5643 = vpow2.f32 %v5154_v27  ;;  %v7918_v48 = vsel %vm4341_vm14, %v4292_v36, 0.0  ;;  %vm2554_vm5 = vmor %vm2552_vm1, %vm2553_vm3 }
 0x248   : > { %vm7920_vm4 = vcmp.eq.f32.partialorder %v2556_v25, 8.507059e+37  ;;  %5645 = vpow2.f32 %v5186_v43  ;;  %v5218_v2 = vmul.f32 -1.442695, %v7912_v51  ;;  %v2559_v34 = vor.u32 1.1754944e-38, %v2558_v35 }
 0x249   : > { %v5638_v31 = vpop.eup %5637  ;;  %v2551_v10 = vadd.f32 %v5634_v44, %v2550_v24  ;;  %5647 = vrcp.f32 %v7915_v21  ;;  %v7927_v53 = vadd.f32 %v7777_v15, %v1507_v13  ;;  %v7930_v4 = vsel %vm4341_vm14, %v4324_v33, 0.0 }
 0x24a   : > { %v5640_v1 = vpop.eup %5639  ;;  %v3028_v8 = vmul.f32 %v5638_v31, %v7888_v22  ;;  %vm3032_vm7 = vweird.f32 %v7888_v22  ;;  %vm7937_vm8 = vcmp.eq.f32.partialorder %v3036_v30, 8.507059e+37  ;;  %v3039_v18 = vor.u32 1.1754944e-38, %v3038_v39 }
 0x24b   : > { %v5642_v11 = vpop.eup %5641  ;;  %v2555_v59 = vsel %vm2554_vm5, %v5634_v44, %v2551_v10  ;;  %v3516_v58 = vand.u32 2147483647, %v7915_v21  ;;  %v7942_v19 = vadd.f32 1.0, %v5640_v1  ;;  %5649 = vpow2.f32 %v5218_v2 }
 0x24c   : > { %v2560_v26 = vsel %vm7920_vm4, %v2559_v34, %v2555_v59  ;;  %v3029_v49 = vsub.f32 1.0, %v3028_v8  ;;  %v7946_v60 = vadd.f32 1.0, %v5642_v11  ;;  %v3518_v50 = vand.u32 2147483648, %v7915_v21 }
 0x24d   : > { %v5644_v54 = vpop.eup %5643  ;;  %v4229_v6 = vmul.f32 %v2560_v26, %v7780_v14  ;;  %5651 = vrcp.f32 %v7942_v19  ;;  %v5123_v61 = vmul.f32 -1.442695, %v7927_v53  ;;  %vm3033_vm10 = vweird.f32 %v5638_v31 }
 0x24e   : > { %v5646_v7 = vpop.eup %5645  ;;  %v3030_v17 = vmul.f32 %v5638_v31, %v3029_v49  ;;  %5653 = vrcp.f32 %v7946_v60  ;;  %v7954_v63 = vadd.f32 %v7777_v15, %v1587_v20  ;;  %vm3512_vm9 = vweird.f32 %v7915_v21  ;;  %vm3034_vm11 = vmor %vm3032_vm7, %vm3033_vm10 }
 0x24f   : > { %v5648_v46 = vpop.eup %5647  ;;  %v4380_v38 = vsel %vm4341_vm14, %v4229_v6, 0.0  ;;  %v3996_v14 = vand.u32 2147483647, %v7942_v19  ;;  %v7960_v44 = vadd.f32 %v7777_v15, %v1667_v9  ;;  %vm7966_vm2 = vcmp.eq.f32.partialorder %v3516_v58, 8.507059e+37 }
 0x250   : > { %v7963_v0 = vadd.f32 %v4380_v38, %v7874_v56  ;;  %v3031_v36 = vadd.f32 %v5638_v31, %v3030_v17  ;;  %v3508_v32 = vmul.f32 %v5648_v46, %v7915_v21  ;;  %v3998_v3 = vand.u32 2147483648, %v7942_v19 }
 0x251   : > { %v3519_v25 = vor.u32 1.1754944e-38, %v3518_v50  ;;  %v2571_v35 = vand.u32 2147483647, %v7946_v60  ;;  %v7974_v42 = vadd.f32 1.0, %v5644_v54  ;;  %5655 = vpow2.f32 %v5123_v61  ;;  %v5650_v56 = vpop.eup %5649 }
 0x252   : > { %v3035_v27 = vsel %vm3034_vm11, %v5638_v31, %v3031_v36  ;;  %v3509_v43 = vsub.f32 1.0, %v3508_v32  ;;  %vm3992_vm12 = vweird.f32 %v7942_v19  ;;  %v7977_v12 = vadd.f32 1.0, %v5646_v7 }
 0x253   : > { %v5652_v33 = vpop.eup %5651  ;;  %v3040_v30 = vsel %vm7937_vm8, %v3039_v18, %v3035_v27  ;;  %vm3513_vm15 = vweird.f32 %v5648_v46  ;;  %vm2567_vm6 = vweird.f32 %v7946_v60  ;;  %v2573_v22 = vand.u32 2147483648, %v7946_v60 }
 0x254   : > { %5657 = vrcp.f32 %v7974_v42  ;;  %v5654_v13 = vpop.eup %5653  ;;  %v4261_v24 = vmul.f32 %v3040_v30, %v7815_v55  ;;  %v3510_v39 = vmul.f32 %v5648_v46, %v3509_v43  ;;  %v3988_v41 = vmul.f32 %v5652_v33, %v7942_v19  ;;  %vm3514_vm1 = vmor %vm3512_vm9, %vm3513_vm15 }
 0x255   : > { %vm7986_vm13 = vcmp.eq.f32.partialorder %v3996_v14, 8.507059e+37  ;;  %v3999_v31 = vor.u32 1.1754944e-38, %v3998_v3  ;;  %v2563_v10 = vmul.f32 %v5654_v13, %v7946_v60  ;;  %vm7991_vm0 = vcmp.eq.f32.partialorder %v2571_v35, 8.507059e+37 }
 0x256   : > { %v3051_v1 = vand.u32 2147483647, %v7974_v42  ;;  %v7996_v8 = vadd.f32 1.0, %v5650_v56  ;;  %v4454_v55 = vsel %vm4341_vm14, %v4261_v24, 0.0  ;;  %v3511_v23 = vadd.f32 %v5648_v46, %v3510_v39 }
 0x257   : > { %v3989_v11 = vsub.f32 1.0, %v3988_v41  ;;  %5659 = vrcp.f32 %v7977_v12  ;;  %v5656_v59 = vpop.eup %5655  ;;  %v8001_v18 = vadd.f32 %v4454_v55, %v7892_v45  ;;  %v2564_v58 = vsub.f32 1.0, %v2563_v10  ;;  %v1747_v55 = vpop.f32.mrf.mxu3 }
 0x258   : > { %v2574_v20 = vor.u32 1.1754944e-38, %v2573_v22  ;;  %v3053_v26 = vand.u32 2147483648, %v7974_v42  ;;  %v3515_v49 = vsel %vm3514_vm1, %v5648_v46, %v3511_v23  ;;  %vm3993_vm3 = vweird.f32 %v5652_v33 }
 0x259   : > { %v3990_v9 = vmul.f32 %v5652_v33, %v3989_v11  ;;  %vm3047_vm4 = vweird.f32 %v7974_v42  ;;  %v3520_v6 = vsel %vm7966_vm2, %v3519_v25, %v3515_v49  ;;  %v2565_v50 = vmul.f32 %v5654_v13, %v2564_v58  ;;  %vm3994_vm8 = vmor %vm3992_vm12, %vm3993_vm3 }
 0x25a   : > { %v5658_v54 = vpop.eup %5657  ;;  %vm2568_vm5 = vweird.f32 %v5654_v13  ;;  %5661 = vrcp.f32 %v7996_v8  ;;  %v4293_v45 = vmul.f32 %v3520_v6, %v7858_v29  ;;  %vm8013_vm7 = vcmp.eq.f32.partialorder %v3051_v1, 8.507059e+37 }
 0x25b   : > { %v3991_v21 = vadd.f32 %v5652_v33, %v3990_v9  ;;  %v3043_v61 = vmul.f32 %v5658_v54, %v7974_v42  ;;  %v2566_v17 = vadd.f32 %v5654_v13, %v2565_v50  ;;  %v3054_v46 = vor.u32 1.1754944e-38, %v3053_v26  ;;  %vm2569_vm9 = vmor %vm2567_vm6, %vm2568_vm5  ;;  %v1510_v42 = vpop.f32.mrf.mxu0 }
 0x25c   : > { %vm3527_vm10 = vweird.f32 %v7977_v12  ;;  %v3531_v38 = vand.u32 2147483647, %v7977_v12  ;;  %v4528_v36 = vsel %vm4341_vm14, %v4293_v45, 0.0  ;;  %v3533_v47 = vand.u32 2147483648, %v7977_v12 }
 0x25d   : > { %v5660_v14 = vpop.eup %5659  ;;  %v3995_v29 = vsel %vm3994_vm8, %v5652_v33, %v3991_v21  ;;  %v3044_v32 = vsub.f32 1.0, %v3043_v61  ;;  %v4529_v3 = vadd.f32 %v4528_v36, %v7918_v48  ;;  %v2570_v25 = vsel %vm2569_vm9, %v5654_v13, %v2566_v17 }
 0x25e   : > { %v4000_v19 = vsel %vm7986_vm13, %v3999_v31, %v3995_v29  ;;  %v3523_v35 = vmul.f32 %v5660_v14, %v7977_v12  ;;  %v2575_v27 = vsel %vm7991_vm0, %v2574_v20, %v2570_v25  ;;  %vm3048_vm2 = vweird.f32 %v5658_v54  ;;  %v1590_v20 = vpop.f32.mrf.mxu1 }
 0x25f   : > { %v4325_v56 = vmul.f32 %v4000_v19, %v7881_v37  ;;  %v3045_v43 = vmul.f32 %v5658_v54, %v3044_v32  ;;  %vm4007_vm11 = vweird.f32 %v7996_v8  ;;  %v4230_v33 = vmul.f32 %v2575_v27, %v7886_v5  ;;  %vm3049_vm6 = vmor %vm3047_vm4, %vm3048_vm2  ;;  %v1750_v27 = vpop.f32.mrf.mxu3 }
 0x260   : > { %v5662_v60 = vpop.eup %5661  ;;  %v3524_v30 = vsub.f32 1.0, %v3523_v35  ;;  %vm8034_vm12 = vcmp.eq.f32.partialorder %v3531_v38, 8.507059e+37  ;;  %v4011_v22 = vand.u32 2147483647, %v7996_v8  ;;  %vm3528_vm15 = vweird.f32 %v5660_v14 }
 0x261   : > { %v4602_v13 = vsel %vm4341_vm14, %v4325_v56, 0.0  ;;  %v3046_v37 = vadd.f32 %v5658_v54, %v3045_v43  ;;  %v4003_v24 = vmul.f32 %v5662_v60, %v7996_v8  ;;  %v4382_v41 = vsel %vm4341_vm14, %v4230_v33, 0.0  ;;  %vm3529_vm13 = vmor %vm3527_vm10, %vm3528_vm15 }
 0x262   : > { %v4603_v39 = vadd.f32 %v4602_v13, %v7930_v4  ;;  %v3525_v5 = vmul.f32 %v5660_v14, %v3524_v30  ;;  %v8045_v2 = vadd.f32 1.0, %v5656_v59  ;;  %v8048_v31 = vadd.f32 %v4382_v41, %v7963_v0 }
 0x263   : > { %v3050_v10 = vsel %vm3049_vm6, %v5658_v54, %v3046_v37  ;;  %v4004_v34 = vsub.f32 1.0, %v4003_v24  ;;  %v5155_v1 = vmul.f32 -1.442695, %v7954_v63  ;;  %v4013_v11 = vand.u32 2147483648, %v7996_v8 }
 0x264   : > { %v3055_v23 = vsel %vm8013_vm7, %v3054_v46, %v3050_v10  ;;  %v3526_v4 = vadd.f32 %v5660_v14, %v3525_v5  ;;  %5663 = vrcp.f32 %v8045_v2  ;;  %v3534_v0 = vor.u32 1.1754944e-38, %v3533_v47  ;;  %v1670_v46 = vpop.f32.mrf.mxu2 }
 0x265   : > { %v4262_v59 = vmul.f32 %v3055_v23, %v7896_v16  ;;  %v4005_v58 = vmul.f32 %v5662_v60, %v4004_v34  ;;  %vm4008_vm0 = vweird.f32 %v5662_v60  ;;  %5665 = vpow2.f32 %v5155_v1 }
 0x266   : > { %v3530_v26 = vsel %vm3529_vm13, %v5660_v14, %v3526_v4  ;;  %v5187_v49 = vmul.f32 -1.442695, %v7960_v44  ;;  %v8061_v9 = vadd.f32 %v7777_v15, %v1747_v55  ;;  %vm4012_vm1 = vcmp.eq.f32.partialorder %v4011_v22, 8.507059e+37  ;;  %vm4009_vm3 = vmor %vm4007_vm11, %vm4008_vm0  ;;  %v1592_v48 = vpop.f32.mrf.mxu1 }
 0x267   : > { %v4456_v54 = vsel %vm4341_vm14, %v4262_v59, 0.0  ;;  %v3535_v16 = vsel %vm8034_vm12, %v3534_v0, %v3530_v26  ;;  %v4006_v6 = vadd.f32 %v5662_v60, %v4005_v58  ;;  %v4014_v45 = vor.u32 1.1754944e-38, %v4013_v11 }
 0x268   : > { %v8067_v12 = vadd.f32 %v4456_v54, %v8001_v18  ;;  %v4294_v50 = vmul.f32 %v3535_v16, %v7899_v40  ;;  %5667 = vpow2.f32 %v5187_v49  ;;  %v5219_v61 = vmul.f32 -1.442695, %v8061_v9 }
 0x269   : > { %v4010_v21 = vsel %vm4009_vm3, %v5662_v60, %v4006_v6  ;;  %v8074_v7 = vadd.f32 %v7777_v15, %v1510_v42  ;;  %v8077_v17 = vadd.f32 %v7777_v15, %v1590_v20  ;;  %v8087_v19 = vadd.f32 %v7777_v15, %v1670_v46  ;;  %v1512_v60 = vpop.f32.mrf.mxu0 }
 0x26a   : > { %v5664_v38 = vpop.eup %5663  ;;  %v4530_v18 = vsel %vm4341_vm14, %v4294_v50, 0.0  ;;  %v4015_v14 = vsel %vm4012_vm1, %v4014_v45, %v4010_v21  ;;  %5669 = vpow2.f32 %v5219_v61  ;;  %v2588_v56 = vand.u32 2147483648, %v8045_v2 }
 0x26b   : > { %v8080_v40 = vadd.f32 %v4530_v18, %v4529_v3  ;;  %v4326_v8 = vmul.f32 %v4015_v14, %v7912_v51  ;;  %v2578_v36 = vmul.f32 %v5664_v38, %v8045_v2  ;;  %v5666_v29 = vpop.eup %5665  ;;  %v5124_v32 = vmul.f32 -1.442695, %v8074_v7 }
 0x26c   : > { %v5156_v47 = vmul.f32 -1.442695, %v8077_v17  ;;  %v8091_v3 = vadd.f32 1.0, %v5666_v29  ;;  %vm2583_vm4 = vweird.f32 %v5664_v38  ;;  %v2586_v30 = vand.u32 2147483647, %v8045_v2 }
 0x26d   : > { %v4604_v25 = vsel %vm4341_vm14, %v4326_v8, 0.0  ;;  %v2579_v35 = vsub.f32 1.0, %v2578_v36  ;;  %5671 = vpow2.f32 %v5124_v32  ;;  %v5188_v13 = vmul.f32 -1.442695, %v8087_v19 }
 0x26e   : > { %v5668_v51 = vpop.eup %5667  ;;  %v8093_v43 = vadd.f32 %v4604_v25, %v4603_v39  ;;  %5673 = vrcp.f32 %v8091_v3  ;;  %v8101_v37 = vadd.f32 %v7777_v15, %v1750_v27  ;;  %vm2582_vm5 = vweird.f32 %v8045_v2 }
 0x26f   : > { %v2580_v33 = vmul.f32 %v5664_v38, %v2579_v35  ;;  %v8097_v22 = vadd.f32 1.0, %v5668_v51  ;;  %5675 = vpow2.f32 %v5156_v47  ;;  %v2589_v39 = vor.u32 1.1754944e-38, %v2588_v56  ;;  %vm2584_vm7 = vmor %vm2582_vm5, %vm2583_vm4 }
 0x270   : > { %v8105_v41 = vadd.f32 %v7777_v15, %v1512_v60  ;;  %v5670_v5 = vpop.eup %5669  ;;  %v3066_v10 = vand.u32 2147483647, %v8091_v3  ;;  %v3068_v34 = vand.u32 2147483648, %v8091_v3  ;;  %v8111_v1 = vadd.f32 %v7777_v15, %v1592_v48 }
 0x271   : > { %v2581_v24 = vadd.f32 %v5664_v38, %v2580_v33  ;;  %5677 = vrcp.f32 %v8097_v22  ;;  %vm2587_vm8 = vcmp.eq.f32.partialorder %v2586_v30, 8.507059e+37  ;;  %v8113_v23 = vadd.f32 1.0, %v5670_v5 }
 0x272   : > { %5679 = vpow2.f32 %v5188_v13  ;;  %v5220_v11 = vmul.f32 -1.442695, %v8101_v37  ;;  %vm3062_vm10 = vweird.f32 %v8091_v3  ;;  %v5125_v0 = vmul.f32 -1.442695, %v8105_v41 }
 0x273   : > { %v2585_v55 = vsel %vm2584_vm7, %v5664_v38, %v2581_v24  ;;  %v5672_v2 = vpop.eup %5671  ;;  %5681 = vrcp.f32 %v8113_v23  ;;  %vm8121_vm9 = vcmp.eq.f32.partialorder %v3066_v10, 8.507059e+37  ;;  %v3069_v49 = vor.u32 1.1754944e-38, %v3068_v34  ;;  %v1672_v38 = vpop.f32.mrf.mxu2 }
 0x274   : > { %v2590_v4 = vsel %vm2587_vm8, %v2589_v39, %v2585_v55  ;;  %v5674_v42 = vpop.eup %5673  ;;  %v3546_v54 = vand.u32 2147483647, %v8097_v22  ;;  %v5157_v16 = vmul.f32 -1.442695, %v8111_v1  ;;  %v3548_v6 = vand.u32 2147483648, %v8097_v22 }
 0x275   : > { %v4231_v59 = vmul.f32 %v2590_v4, %v7927_v53  ;;  %v5676_v58 = vpop.eup %5675  ;;  %v3058_v20 = vmul.f32 %v5674_v42, %v8091_v3  ;;  %v8129_v50 = vadd.f32 1.0, %v5672_v2  ;;  %vm3542_vm2 = vweird.f32 %v8097_v22 }
 0x276   : > { %v8131_v45 = vadd.f32 1.0, %v5676_v58  ;;  %5683 = vpow2.f32 %v5220_v11  ;;  %v4026_v14 = vand.u32 2147483647, %v8113_v23  ;;  %v4028_v8 = vand.u32 2147483648, %v8113_v23 }
 0x277   : > { %v4384_v53 = vsel %vm4341_vm14, %v4231_v59, 0.0  ;;  %v5678_v21 = vpop.eup %5677  ;;  %v3059_v46 = vsub.f32 1.0, %v3058_v20  ;;  %5685 = vrcp.f32 %v8129_v50  ;;  %vm3063_vm11 = vweird.f32 %v5674_v42 }
 0x278   : > { %v8134_v61 = vadd.f32 %v4384_v53, %v8048_v31  ;;  %v3538_v18 = vmul.f32 %v5678_v21, %v8097_v22  ;;  %v5680_v36 = vpop.eup %5679  ;;  %vm8141_vm12 = vcmp.eq.f32.partialorder %v3546_v54, 8.507059e+37  ;;  %5687 = vrcp.f32 %v8131_v45  ;;  %vm3064_vm6 = vmor %vm3062_vm10, %vm3063_vm11 }
 0x279   : > { %v3060_v29 = vmul.f32 %v5674_v42, %v3059_v46  ;;  %v5682_v31 = vpop.eup %5681  ;;  %v3549_v25 = vor.u32 1.1754944e-38, %v3548_v6  ;;  %5689 = vpow2.f32 %v5125_v0  ;;  %v8147_v35 = vadd.f32 %v7777_v15, %v1672_v38 }
 0x27a   : > { %v3539_v47 = vsub.f32 1.0, %v3538_v18  ;;  %v4018_v27 = vmul.f32 %v5682_v31, %v8113_v23  ;;  %vm4022_vm15 = vweird.f32 %v8113_v23  ;;  %5691 = vpow2.f32 %v5157_v16 }
 0x27b   : > { %v3061_v56 = vadd.f32 %v5674_v42, %v3060_v29  ;;  %vm3543_vm13 = vweird.f32 %v5678_v21  ;;  %vm8153_vm0 = vcmp.eq.f32.partialorder %v4026_v14, 8.507059e+37  ;;  %v4029_v33 = vor.u32 1.1754944e-38, %v4028_v8 }
 0x27c   : > { %v3540_v51 = vmul.f32 %v5678_v21, %v3539_v47  ;;  %v5684_v30 = vpop.eup %5683  ;;  %v4019_v13 = vsub.f32 1.0, %v4018_v27  ;;  %vm2597_vm1 = vweird.f32 %v8129_v50  ;;  %v2601_v24 = vand.u32 2147483647, %v8129_v50  ;;  %vm3544_vm3 = vmor %vm3542_vm2, %vm3543_vm13 }
 0x27d   : > { %v3065_v48 = vsel %vm3064_vm6, %v5674_v42, %v3061_v56  ;;  %v8159_v39 = vadd.f32 1.0, %v5680_v36  ;;  %v5686_v5 = vpop.eup %5685  ;;  %v2603_v34 = vand.u32 2147483648, %v8129_v50  ;;  %v3081_v55 = vand.u32 2147483647, %v8131_v45 }
 0x27e   : > { %v3070_v3 = vsel %vm8121_vm9, %v3069_v49, %v3065_v48  ;;  %v3541_v10 = vadd.f32 %v5678_v21, %v3540_v51  ;;  %v5688_v2 = vpop.eup %5687  ;;  %v4020_v11 = vmul.f32 %v5682_v31, %v4019_v13  ;;  %vm4023_vm4 = vweird.f32 %v5682_v31 }
 0x27f   : > { %v4263_v4 = vmul.f32 %v3070_v3, %v7954_v63  ;;  %v2593_v42 = vmul.f32 %v5686_v5, %v8129_v50  ;;  %v5690_v59 = vpop.eup %5689  ;;  %v3073_v58 = vmul.f32 %v5688_v2, %v8131_v45  ;;  %5693 = vrcp.f32 %v8159_v39  ;;  %vm4024_vm5 = vmor %vm4022_vm15, %vm4023_vm4 }
 0x280   : > { %v3545_v0 = vsel %vm3544_vm3, %v5678_v21, %v3541_v10  ;;  %v8172_v20 = vadd.f32 1.0, %v5684_v30  ;;  %v5692_v26 = vpop.eup %5691  ;;  %v4021_v22 = vadd.f32 %v5682_v31, %v4020_v11  ;;  %v3083_v21 = vand.u32 2147483648, %v8131_v45 }
 0x281   : > { %v4458_v49 = vsel %vm4341_vm14, %v4263_v4, 0.0  ;;  %v3550_v63 = vsel %vm8141_vm12, %v3549_v25, %v3545_v0  ;;  %v2594_v54 = vsub.f32 1.0, %v2593_v42  ;;  %v3074_v6 = vsub.f32 1.0, %v3073_v58 }
 0x282   : > { %v4459_v16 = vadd.f32 %v4458_v49, %v8067_v12  ;;  %v4295_v53 = vmul.f32 %v3550_v63, %v7960_v44  ;;  %v4025_v46 = vsel %vm4024_vm5, %v5682_v31, %v4021_v22  ;;  %vm2598_vm7 = vweird.f32 %v5686_v5 }
 0x283   : > { %v2595_v38 = vmul.f32 %v5686_v5, %v2594_v54  ;;  %vm3078_vm8 = vweird.f32 %v5688_v2  ;;  %v4030_v14 = vsel %vm8153_vm0, %v4029_v33, %v4025_v46  ;;  %v3075_v8 = vmul.f32 %v5688_v2, %v3074_v6  ;;  %vm2599_vm9 = vmor %vm2597_vm1, %vm2598_vm7 }
 0x284   : > { %v4532_v18 = vsel %vm4341_vm14, %v4295_v53, 0.0  ;;  %5695 = vrcp.f32 %v8172_v20  ;;  %v4327_v12 = vmul.f32 %v4030_v14, %v8061_v9  ;;  %vm3077_vm10 = vweird.f32 %v8131_v45  ;;  %v1595_v53 = vpop.f32.mrf.mxu1 }
 0x285   : > { %v8187_v44 = vadd.f32 %v4532_v18, %v8080_v40  ;;  %v2596_v23 = vadd.f32 %v5686_v5, %v2595_v38  ;;  %v5694_v36 = vpop.eup %5693  ;;  %vm2602_vm2 = vcmp.eq.f32.partialorder %v2601_v24, 8.507059e+37  ;;  %v2604_v29 = vor.u32 1.1754944e-38, %v2603_v34  ;;  %vm3079_vm11 = vmor %vm3077_vm10, %vm3078_vm8  ;;  %v1675_v38 = vpop.f32.mrf.mxu2 }
 0x286   : > { %v3076_v32 = vadd.f32 %v5688_v2, %v3075_v8  ;;  %v3084_v31 = vor.u32 1.1754944e-38, %v3083_v21  ;;  %v4606_v47 = vsel %vm4341_vm14, %v4327_v12, 0.0  ;;  %v3553_v40 = vmul.f32 %v5694_v36, %v8159_v39 }
 0x287   : > { %v2600_v25 = vsel %vm2599_vm9, %v5686_v5, %v2596_v23  ;;  %v8196_v56 = vadd.f32 1.0, %v5690_v59  ;;  %v8199_v9 = vadd.f32 %v4606_v47, %v8093_v43  ;;  %vm3082_vm12 = vcmp.eq.f32.partialorder %v3081_v55, 8.507059e+37 }
 0x288   : > { %v2605_v45 = vsel %vm2602_vm2, %v2604_v29, %v2600_v25  ;;  %v3080_v27 = vsel %vm3079_vm11, %v5688_v2, %v3076_v32  ;;  %v3554_v60 = vsub.f32 1.0, %v3553_v40  ;;  %v3561_v33 = vand.u32 2147483647, %v8159_v39  ;;  %v1752_v2 = vpop.f32.mrf.mxu3 }
 0x289   : > { %v4232_v50 = vmul.f32 %v2605_v45, %v8074_v7  ;;  %v3085_v51 = vsel %vm3082_vm12, %v3084_v31, %v3080_v27  ;;  %vm3558_vm15 = vweird.f32 %v5694_v36  ;;  %v3563_v13 = vand.u32 2147483648, %v8159_v39 }
 0x28a   : > { %v5696_v30 = vpop.eup %5695  ;;  %v4264_v48 = vmul.f32 %v3085_v51, %v8077_v17  ;;  %v8205_v24 = vadd.f32 1.0, %v5692_v26  ;;  %v3555_v5 = vmul.f32 %v5694_v36, %v3554_v60  ;;  %5697 = vrcp.f32 %v8196_v56 }
 0x28b   : > { %v4386_v43 = vsel %vm4341_vm14, %v4232_v50, 0.0  ;;  %v4033_v3 = vmul.f32 %v5696_v30, %v8172_v20  ;;  %vm3557_vm6 = vweird.f32 %v8159_v39  ;;  %vm3562_vm13 = vcmp.eq.f32.partialorder %v3561_v33, 8.507059e+37 }
 0x28c   : > { %v8211_v7 = vadd.f32 %v4386_v43, %v8134_v61  ;;  %v4460_v10 = vsel %vm4341_vm14, %v4264_v48, 0.0  ;;  %v3556_v34 = vadd.f32 %v5694_v36, %v3555_v5  ;;  %vm3559_vm0 = vmor %vm3557_vm6, %vm3558_vm15  ;;  %v3564_v4 = vor.u32 1.1754944e-38, %v3563_v13  ;;  %v1515_v61 = vpop.f32.mrf.mxu0 }
 0x28d   : > { %v8215_v17 = vadd.f32 %v4460_v10, %v4459_v16  ;;  %v4034_v55 = vsub.f32 1.0, %v4033_v3  ;;  %vm4038_vm1 = vweird.f32 %v5696_v30  ;;  %v4041_v11 = vand.u32 2147483647, %v8172_v20  ;;  %v1597_v10 = vpop.f32.mrf.mxu1 }
 0x28e   : > { %v4043_v42 = vand.u32 2147483648, %v8172_v20  ;;  %v3560_v59 = vsel %vm3559_vm0, %v5694_v36, %v3556_v34  ;;  %5699 = vrcp.f32 %v8205_v24  ;;  %v5189_v39 = vmul.f32 -1.442695, %v8147_v35 }
 0x28f   : > { %v4035_v0 = vmul.f32 %v5696_v30, %v4034_v55  ;;  %v3565_v58 = vsel %vm3562_vm13, %v3564_v4, %v3560_v59  ;;  %v8223_v26 = vadd.f32 %v7777_v15, %v1752_v2  ;;  %vm4037_vm3 = vweird.f32 %v8172_v20 }
 0x290   : > { %v8225_v49 = vpop.eup %5697  ;;  %v4296_v63 = vmul.f32 %v3565_v58, %v8087_v19  ;;  %vm4039_vm4 = vmor %vm4037_vm3, %vm4038_vm1  ;;  %v4044_v54 = vor.u32 1.1754944e-38, %v4043_v42  ;;  %5701 = vpow2.f32 %v5189_v39  ;;  %v8230_v16 = vadd.f32 %v7777_v15, %v1515_v61  ;;  %v1755_v47 = vpop.f32.mrf.mxu3 }
 0x291   : > { %v4036_v22 = vadd.f32 %v5696_v30, %v4035_v0  ;;  %vm4042_vm5 = vcmp.eq.f32.partialorder %v4041_v11, 8.507059e+37  ;;  %v5221_v46 = vmul.f32 -1.442695, %v8223_v26  ;;  %v2608_v20 = vmul.f32 %v8225_v49, %v8196_v56 }
 0x292   : > { %v4534_v6 = vsel %vm4341_vm14, %v4296_v63, 0.0  ;;  %v5126_v14 = vmul.f32 -1.442695, %v8230_v16  ;;  %v8244_v23 = vadd.f32 %v7777_v15, %v1595_v53  ;;  %v4373_v36 = vrot.slane %v7755_v52, 4 }
 0x293   : > { %v4040_v21 = vsel %vm4039_vm4, %v5696_v30, %v4036_v22  ;;  %v8235_v18 = vadd.f32 %v4534_v6, %v8187_v44  ;;  %v8250_v44 = vld [vmem:[%s9757_s2] ss:$0 sm:$0xff]  ;;  %v4447_v32 = vrot.slane %v7771_v57, 4  ;;  %5703 = vpow2.f32 %v5221_v46 }
 0x294   : > { %v4045_v19 = vsel %vm4042_vm5, %v4044_v54, %v4040_v21  ;;  %v8240_v8 = vpop.eup %5699  ;;  %v8253_v29 = vadd.f32 %v8250_v44, %v1675_v38  ;;  %v2609_v25 = vsub.f32 1.0, %v2608_v20  ;;  %5705 = vpow2.f32 %v5126_v14  ;;  %v1517_v45 = vpop.f32.mrf.mxu0 }
 0x295   : > { %v4328_v12 = vmul.f32 %v4045_v19, %v8101_v37  ;;  %v3088_v40 = vmul.f32 %v8240_v8, %v8205_v24  ;;  %v5158_v50 = vmul.f32 -1.442695, %v8244_v23  ;;  %v4374_v51 = vadd.f32 %v4373_v36, %v7755_v52 }
 0x296   : > { %v5702_v37 = vpop.eup %5701  ;;  %v5190_v60 = vmul.f32 -1.442695, %v8253_v29  ;;  %v8268_v33 = vadd.f32 %v8250_v44, %v1755_v47  ;;  %v8273_v30 = vadd.f32 %v8250_v44, %v1517_v45  ;;  %v2610_v48 = vmul.f32 %v8225_v49, %v2609_v25 }
 0x297   : > { %v4608_v31 = vsel %vm4341_vm14, %v4328_v12, 0.0  ;;  %v8262_v27 = vadd.f32 1.0, %v5702_v37  ;;  %v3089_v13 = vsub.f32 1.0, %v3088_v40  ;;  %v4375_v3 = vrot.slane %v4374_v51, 2 }
 0x298   : > { %v8258_v15 = vadd.f32 %v4608_v31, %v8199_v9  ;;  %v4448_v9 = vadd.f32 %v4447_v32, %v7771_v57  ;;  %v5222_v52 = vmul.f32 -1.442695, %v8268_v33  ;;  %v5127_v55 = vmul.f32 -1.442695, %v8273_v30 }
 0x299   : > { %5707 = vrcp.f32 %v8262_v27  ;;  %v5704_v43 = vpop.eup %5703  ;;  %v2611_v57 = vadd.f32 %v8225_v49, %v2610_v48  ;;  %vm2613_vm7 = vweird.f32 %v8225_v49  ;;  %v3090_v2 = vmul.f32 %v8240_v8, %v3089_v13 }
 0x29a   : > { %5709 = vpow2.f32 %v5158_v50  ;;  %v5706_v5 = vpop.eup %5705  ;;  %v4449_v34 = vrot.slane %v4448_v9, 2  ;;  %v8281_v4 = vadd.f32 1.0, %v5704_v43  ;;  %v2618_v42 = vand.u32 2147483648, %v8196_v56 }
 0x29b   : > { %5711 = vpow2.f32 %v5190_v60  ;;  %v8286_v61 = vadd.f32 1.0, %v5706_v5  ;;  %v8289_v59 = vadd.f32 %v8250_v44, %v1597_v10  ;;  %v4376_v0 = vadd.f32 %v4375_v3, %v4374_v51 }
 0x29c   : > { %vm2612_vm8 = vweird.f32 %v8196_v56  ;;  %v2616_v39 = vand.u32 2147483647, %v8196_v56  ;;  %5713 = vpow2.f32 %v5222_v52  ;;  %v4450_v63 = vadd.f32 %v4449_v34, %v4448_v9 }
 0x29d   : > { %v4521_v22 = vrot.slane %v7810_v62, 4  ;;  %vm8294_vm10 = vmor %vm2612_vm8, %vm2613_vm7  ;;  %5715 = vpow2.f32 %v5127_v55  ;;  %v3091_v56 = vadd.f32 %v8240_v8, %v3090_v2  ;;  %vm3093_vm9 = vweird.f32 %v8240_v8 }
 0x29e   : > { %v2615_v21 = vsel %vm8294_vm10, %v8225_v49, %v2611_v57  ;;  %5717 = vrcp.f32 %v8281_v4  ;;  %v2619_v46 = vor.u32 1.1754944e-38, %v2618_v42  ;;  %v3098_v38 = vand.u32 2147483648, %v8205_v24 }
 0x29f   : > { %v8283_v11 = vpop.eup %5707  ;;  %5719 = vrcp.f32 %v8286_v61  ;;  %v5159_v19 = vmul.f32 -1.442695, %v8289_v59  ;;  %vm2617_vm2 = vcmp.eq.f32.partialorder %v2616_v39, 8.507059e+37  ;;  %vm3092_vm11 = vweird.f32 %v8205_v24 }
 0x2a0   : > { %v5710_v58 = vpop.eup %5709  ;;  %v3568_v53 = vmul.f32 %v8283_v11, %v8262_v27  ;;  %v3096_v20 = vand.u32 2147483647, %v8205_v24  ;;  %v2620_v49 = vsel %vm2617_vm2, %v2619_v46, %v2615_v21  ;;  %vm8313_vm12 = vmor %vm3092_vm11, %vm3093_vm9  ;;  %v4522_v47 = vadd.f32 %v4521_v22, %v7810_v62 }
 0x2a1   : > { %v5712_v6 = vpop.eup %5711  ;;  %v8311_v14 = vadd.f32 1.0, %v5710_v58  ;;  %v4595_v37 = vrot.slane %v7832_v28, 4  ;;  %v3095_v25 = vsel %vm8313_vm12, %v8240_v8, %v3091_v56  ;;  %v4377_v40 = vrot.slane %v4376_v0, 1 }
 0x2a2   : > { %v3569_v36 = vsub.f32 1.0, %v3568_v53  ;;  %v8317_v32 = vadd.f32 1.0, %v5712_v6  ;;  %v5714_v31 = vpop.eup %5713  ;;  %v3099_v45 = vor.u32 1.1754944e-38, %v3098_v38  ;;  %5721 = vpow2.f32 %v5159_v19  ;;  %v1677_v38 = vpop.f32.mrf.mxu2 }
 0x2a3   : > { %v5716_v24 = vpop.eup %5715  ;;  %v4451_v51 = vrot.slane %v4450_v63, 1  ;;  %v4233_v60 = vmul.f32 %v2620_v49, %v8105_v41  ;;  %vm3097_vm15 = vcmp.eq.f32.partialorder %v3096_v20, 8.507059e+37  ;;  %5723 = vrcp.f32 %v8311_v14 }
 0x2a4   : > { %v8324_v50 = vpop.eup %5717  ;;  %v3100_v62 = vsel %vm3097_vm15, %v3099_v45, %v3095_v25  ;;  %v3570_v48 = vmul.f32 %v8283_v11, %v3569_v36  ;;  %5725 = vrcp.f32 %v8317_v32  ;;  %v8332_v8 = vadd.f32 1.0, %v5714_v31 }
 0x2a5   : > { %v8328_v9 = vpop.eup %5719  ;;  %v4523_v13 = vrot.slane %v4522_v47, 2  ;;  %v8335_v43 = vadd.f32 %v4595_v37, %v7832_v28  ;;  %v8337_v5 = vadd.f32 1.0, %v5716_v24  ;;  %v8339_v3 = vadd.f32 %v4377_v40, %v4376_v0 }
 0x2a6   : > { %v3576_v41 = vand.u32 2147483647, %v8262_v27  ;;  %v3578_v52 = vand.u32 2147483648, %v8262_v27  ;;  %v4388_v10 = vsel %vm4341_vm14, %v4233_v60, 0.0  ;;  %v4265_v34 = vmul.f32 %v3100_v62, %v8111_v1 }
 0x2a7   : > { %v4048_v55 = vmul.f32 %v8324_v50, %v8281_v4  ;;  %v2623_v57 = vmul.f32 %v8328_v9, %v8286_v61  ;;  %v8349_v2 = vadd.f32 %v4451_v51, %v4450_v63  ;;  %v3571_v42 = vadd.f32 %v8283_v11, %v3570_v48 }
 0x2a8   : > { %v5722_v28 = vpop.eup %5721  ;;  %vm3573_vm6 = vweird.f32 %v8283_v11  ;;  %5727 = vrcp.f32 %v8332_v8  ;;  %v8356_v39 = vadd.f32 %v4523_v13, %v4522_v47  ;;  %v4597_v1 = vrot.slane %v8335_v43, 2 }
 0x2a9   : > { %v8354_v0 = vpop.eup %5723  ;;  %vm3572_vm13 = vweird.f32 %v8262_v27  ;;  %5729 = vrcp.f32 %v8337_v5  ;;  %v8364_v63 = vadd.f32 %v4388_v10, %v8211_v7  ;;  %vm8366_vm0 = vcmp.eq.f32.partialorder %v3576_v41, 8.507059e+37  ;;  %v1757_v7 = vpop.f32.mrf.mxu3 }
 0x2aa   : > { %v8361_v58 = vpop.eup %5725  ;;  %v3579_v54 = vor.u32 1.1754944e-38, %v3578_v52  ;;  %v4058_v53 = vand.u32 2147483648, %v8281_v4  ;;  %v4462_v6 = vsel %vm4341_vm14, %v4265_v34, 0.0  ;;  %vm8372_vm1 = vmor %vm3572_vm13, %vm3573_vm6  ;;  %v4049_v27 = vsub.f32 1.0, %v4048_v55  ;;  %v1520_v41 = vpop.f32.mrf.mxu0 }
 0x2ab   : > { %v2624_v56 = vsub.f32 1.0, %v2623_v57  ;;  %v2633_v46 = vand.u32 2147483648, %v8286_v61  ;;  %v3575_v19 = vsel %vm8372_vm1, %v8283_v11, %v3571_v42  ;;  %vm4052_vm3 = vweird.f32 %v8281_v4 }
 0x2ac   : > { %v4056_v20 = vand.u32 2147483647, %v8281_v4  ;;  %v3103_v49 = vmul.f32 %v8354_v0, %v8311_v14  ;;  %vm2627_vm4 = vweird.f32 %v8286_v61  ;;  %v3113_v12 = vand.u32 2147483648, %v8311_v14 }
 0x2ad   : > { %v3583_v36 = vmul.f32 %v8361_v58, %v8317_v32  ;;  %v8388_v31 = vadd.f32 1.0, %v5722_v28  ;;  %v8393_v11 = vadd.f32 %v4462_v6, %v8215_v17  ;;  %v8395_v37 = vor.u32 1.1754944e-38, %v4058_v53 }
 0x2ae   : > { %v8390_v47 = vpop.eup %5727  ;;  %v2631_v25 = vand.u32 2147483647, %v8286_v61  ;;  %v8399_v24 = vadd.f32 %v8250_v44, %v1677_v38  ;;  %v3580_v45 = vsel %vm8366_vm0, %v3579_v54, %v3575_v19  ;;  %v4050_v51 = vmul.f32 %v8324_v50, %v4049_v27 }
 0x2af   : > { %v8401_v40 = vpop.eup %5729  ;;  %v2625_v60 = vmul.f32 %v8328_v9, %v2624_v56  ;;  %v8407_v62 = vor.u32 1.1754944e-38, %v2633_v46  ;;  %vm4053_vm5 = vweird.f32 %v8324_v50  ;;  %v3104_v17 = vsub.f32 1.0, %v3103_v49  ;;  %v1600_v46 = vpop.f32.mrf.mxu1 }
 0x2b0   : > { %v3111_v48 = vand.u32 2147483647, %v8311_v14  ;;  %v3593_v13 = vand.u32 2147483648, %v8317_v32  ;;  %vm2628_vm7 = vweird.f32 %v8328_v9  ;;  %v8413_v52 = vor.u32 1.1754944e-38, %v3113_v12  ;;  %vm8447_vm12 = vmor %vm4052_vm3, %vm4053_vm5  ;;  %v1680_v49 = vpop.f32.mrf.mxu2 }
 0x2b1   : > { %v3584_v10 = vsub.f32 1.0, %v3583_v36  ;;  %5731 = vrcp.f32 %v8388_v31  ;;  %v4297_v34 = vmul.f32 %v3580_v45, %v8147_v35  ;;  %vm8417_vm8 = vcmp.eq.f32.partialorder %v4056_v20, 8.507059e+37  ;;  %v1760_v12 = vpop.f32.mrf.mxu3  ;;  %vm8461_vm15 = vmor %vm2627_vm4, %vm2628_vm7 }
 0x2b2   : > { %vm8421_vm10 = vcmp.eq.f32.partialorder %v2631_v25, 8.507059e+37  ;;  %vm3107_vm9 = vweird.f32 %v8311_v14  ;;  %v4063_v28 = vmul.f32 %v8390_v47, %v8332_v8  ;;  %v2638_v42 = vmul.f32 %v8401_v40, %v8337_v5 }
 0x2b3   : > { %v5191_v22 = vmul.f32 -1.442695, %v8399_v24  ;;  %v4051_v35 = vadd.f32 %v8324_v50, %v4050_v51  ;;  %v2626_v54 = vadd.f32 %v8328_v9, %v2625_v60  ;;  %vm3587_vm2 = vweird.f32 %v8317_v32 }
 0x2b4   : > { %v3591_v53 = vand.u32 2147483647, %v8317_v32  ;;  %v8436_v6 = vadd.f32 %v8250_v44, %v1757_v7  ;;  %v3105_v21 = vmul.f32 %v8354_v0, %v3104_v17  ;;  %vm3108_vm11 = vweird.f32 %v8354_v0 }
 0x2b5   : > { %v8440_v27 = vor.u32 1.1754944e-38, %v3593_v13  ;;  %v4071_v56 = vand.u32 2147483647, %v8332_v8  ;;  %v3585_v7 = vmul.f32 %v8361_v58, %v3584_v10  ;;  %5733 = vpow2.f32 %v5191_v22  ;;  %vm8515_vm4 = vmor %vm3107_vm9, %vm3108_vm11 }
 0x2b6   : > { %v5223_v19 = vmul.f32 -1.442695, %v8436_v6  ;;  %v8454_v20 = vadd.f32 %v8250_v44, %v1520_v41  ;;  %v4536_v36 = vsel %vm4341_vm14, %v4297_v34, 0.0  ;;  %v4064_v25 = vsub.f32 1.0, %v4063_v28 }
 0x2b7   : > { %v4073_v45 = vand.u32 2147483648, %v8332_v8  ;;  %v2639_v51 = vsub.f32 1.0, %v2638_v42  ;;  %v8466_v60 = vpop.eup %5731  ;;  %v4055_v17 = vsel %vm8447_vm12, %v8324_v50, %v4051_v35  ;;  %v2630_v13 = vsel %vm8461_vm15, %v8328_v9, %v2626_v54 }
 0x2b8   : > { %vm4067_vm6 = vweird.f32 %v8332_v8  ;;  %5735 = vpow2.f32 %v5223_v19  ;;  %v5128_v61 = vmul.f32 -1.442695, %v8454_v20  ;;  %v3106_v41 = vadd.f32 %v8354_v0, %v3105_v21 }
 0x2b9   : > { %vm8477_vm13 = vcmp.eq.f32.partialorder %v3111_v48, 8.507059e+37  ;;  %vm8481_vm0 = vcmp.eq.f32.partialorder %v3591_v53, 8.507059e+37  ;;  %v8486_v50 = vadd.f32 %v8250_v44, %v1600_v46  ;;  %v8489_v9 = vadd.f32 %v8250_v44, %v1680_v49  ;;  %v1522_v53 = vpop.f32.mrf.mxu0 }
 0x2ba   : > { %v8492_v28 = vadd.f32 %v8250_v44, %v1760_v12  ;;  %v3586_v42 = vadd.f32 %v8361_v58, %v3585_v7  ;;  %vm3588_vm1 = vweird.f32 %v8361_v58  ;;  %vm2642_vm3 = vweird.f32 %v8337_v5 }
 0x2bb   : > { %5737 = vpow2.f32 %v5128_v61  ;;  %v4065_v48 = vmul.f32 %v8390_v47, %v4064_v25  ;;  %v2640_v22 = vmul.f32 %v8401_v40, %v2639_v51  ;;  %v3118_v35 = vmul.f32 %v8466_v60, %v8388_v31  ;;  %v5734_v21 = vpop.eup %5733  ;;  %vm8527_vm5 = vmor %vm3587_vm2, %vm3588_vm1 }
 0x2bc   : > { %v5160_v54 = vmul.f32 -1.442695, %v8486_v50  ;;  %v8503_v46 = vadd.f32 %v4536_v36, %v8235_v18  ;;  %v4060_v38 = vsel %vm8417_vm8, %v8395_v37, %v4055_v17  ;;  %v2635_v7 = vsel %vm8421_vm10, %v8407_v62, %v2630_v13 }
 0x2bd   : > { %v5192_v49 = vmul.f32 -1.442695, %v8489_v9  ;;  %v3110_v18 = vsel %vm8515_vm4, %v8354_v0, %v3106_v41  ;;  %vm4068_vm7 = vweird.f32 %v8390_v47  ;;  %v8532_v14 = vadd.f32 1.0, %v5734_v21 }
 0x2be   : > { %v5224_v62 = vmul.f32 -1.442695, %v8492_v28  ;;  %v5736_v55 = vpop.eup %5735  ;;  %v3590_v57 = vsel %vm8527_vm5, %v8361_v58, %v3586_v42  ;;  %vm2643_vm8 = vweird.f32 %v8401_v40  ;;  %5739 = vpow2.f32 %v5160_v54  ;;  %vm8554_vm10 = vmor %vm4067_vm6, %vm4068_vm7 }
 0x2bf   : > { %v8540_v32 = vadd.f32 %v8250_v44, %v1522_v53  ;;  %v4066_v0 = vadd.f32 %v8390_v47, %v4065_v48  ;;  %v2641_v12 = vadd.f32 %v8401_v40, %v2640_v22  ;;  %v3119_v36 = vsub.f32 1.0, %v3118_v35  ;;  %vm8571_vm9 = vmor %vm2642_vm3, %vm2643_vm8 }
 0x2c0   : > { %5741 = vrcp.f32 %v8532_v14  ;;  %v4329_v25 = vmul.f32 %v4060_v38, %v8223_v26  ;;  %v2648_v51 = vand.u32 2147483648, %v8337_v5  ;;  %v8547_v17 = vadd.f32 1.0, %v5736_v55  ;;  %v1602_v26 = vpop.f32.mrf.mxu1 }
 0x2c1   : > { %v5738_v4 = vpop.eup %5737  ;;  %5743 = vpow2.f32 %v5192_v49  ;;  %v4234_v58 = vmul.f32 %v2635_v7, %v8230_v16  ;;  %v2646_v61 = vand.u32 2147483647, %v8337_v5  ;;  %v3115_v42 = vsel %vm8477_vm13, %v8413_v52, %v3110_v18 }
 0x2c2   : > { %v8559_v41 = vadd.f32 1.0, %v5738_v4  ;;  %5745 = vpow2.f32 %v5224_v62  ;;  %v3595_v16 = vsel %vm8481_vm0, %v8440_v27, %v3590_v57  ;;  %v5129_v22 = vmul.f32 -1.442695, %v8540_v32 }
 0x2c3   : > { %5747 = vrcp.f32 %v8547_v17  ;;  %v4070_v52 = vsel %vm8554_vm10, %v8390_v47, %v4066_v0  ;;  %v2645_v27 = vsel %vm8571_vm9, %v8401_v40, %v2641_v12  ;;  %v3120_v10 = vmul.f32 %v8466_v60, %v3119_v36  ;;  %v1682_v36 = vpop.f32.mrf.mxu2 }
 0x2c4   : > { %5749 = vrcp.f32 %v8559_v41  ;;  %v5740_v5 = vpop.eup %5739  ;;  %v4610_v34 = vsel %vm4341_vm14, %v4329_v25, 0.0  ;;  %v4074_v35 = vor.u32 1.1754944e-38, %v4073_v45  ;;  %v2649_v54 = vor.u32 1.1754944e-38, %v2648_v51 }
 0x2c5   : > { %v8589_v53 = vadd.f32 %v8250_v44, %v1602_v26  ;;  %v4266_v47 = vmul.f32 %v3115_v42, %v8244_v23  ;;  %v4298_v40 = vmul.f32 %v3595_v16, %v8253_v29  ;;  %vm4072_vm2 = vcmp.eq.f32.partialorder %v4071_v56, 8.507059e+37 }
 0x2c6   : > { %v8591_v21 = vpop.eup %5741  ;;  %vm2647_vm11 = vcmp.eq.f32.partialorder %v2646_v61, 8.507059e+37  ;;  %v4075_v7 = vsel %vm4072_vm2, %v4074_v35, %v4070_v52  ;;  %5751 = vpow2.f32 %v5129_v22  ;;  %v4611_v18 = vadd.f32 %v4610_v34, %v8258_v15  ;;  %v1762_v35 = vpop.f32.mrf.mxu3 }
 0x2c7   : > { %v5744_v38 = vpop.eup %5743  ;;  %v2650_v19 = vsel %vm2647_vm11, %v2649_v54, %v2645_v27  ;;  %v3598_v45 = vmul.f32 %v8591_v21, %v8532_v14  ;;  %v3121_v37 = vadd.f32 %v8466_v60, %v3120_v10  ;;  %vm3122_vm12 = vweird.f32 %v8388_v31 }
 0x2c8   : > { %v5746_v49 = vpop.eup %5745  ;;  %vm3123_vm15 = vweird.f32 %v8466_v60  ;;  %v3126_v29 = vand.u32 2147483647, %v8388_v31  ;;  %v3128_v8 = vand.u32 2147483648, %v8388_v31  ;;  %v5161_v62 = vmul.f32 -1.442695, %v8589_v53 }
 0x2c9   : > { %v8603_v23 = vpop.eup %5747  ;;  %v3599_v56 = vsub.f32 1.0, %v3598_v45  ;;  %v4330_v57 = vmul.f32 %v4075_v7, %v8268_v33  ;;  %v4235_v15 = vmul.f32 %v2650_v19, %v8273_v30  ;;  %v8614_v12 = vadd.f32 1.0, %v5740_v5  ;;  %vm8623_vm6 = vmor %vm3122_vm12, %vm3123_vm15 }
 0x2ca   : > { %v8608_v55 = vpop.eup %5749  ;;  %v4078_v0 = vmul.f32 %v8603_v23, %v8547_v17  ;;  %v4390_v4 = vsel %vm4341_vm14, %v4234_v58, 0.0  ;;  %v4464_v25 = vsel %vm4341_vm14, %v4266_v47, 0.0  ;;  %v4538_v51 = vsel %vm4341_vm14, %v4298_v40, 0.0 }
 0x2cb   : > { %v8627_v30 = vadd.f32 1.0, %v5744_v38  ;;  %v3125_v13 = vsel %vm8623_vm6, %v8466_v60, %v3121_v37  ;;  %v3600_v58 = vmul.f32 %v8591_v21, %v3599_v56  ;;  %v2653_v61 = vmul.f32 %v8608_v55, %v8559_v41 }
 0x2cc   : > { %v8635_v26 = vadd.f32 1.0, %v5746_v49  ;;  %v5752_v42 = vpop.eup %5751  ;;  %v3129_v16 = vor.u32 1.1754944e-38, %v3128_v8  ;;  %v4079_v31 = vsub.f32 1.0, %v4078_v0  ;;  %5753 = vpow2.f32 %v5161_v62 }
 0x2cd   : > { %v8638_v48 = vadd.f32 %v8250_v44, %v1682_v36  ;;  %v4612_v22 = vsel %vm4341_vm14, %v4330_v57, 0.0  ;;  %v4392_v52 = vsel %vm4341_vm14, %v4235_v15, 0.0  ;;  %vm3127_vm13 = vcmp.eq.f32.partialorder %v3126_v29, 8.507059e+37 }
 0x2ce   : > { %5755 = vrcp.f32 %v8614_v12  ;;  %v3130_v60 = vsel %vm3127_vm13, %v3129_v16, %v3125_v13  ;;  %vm3603_vm0 = vweird.f32 %v8591_v21  ;;  %v3606_v27 = vand.u32 2147483647, %v8532_v14 }
 0x2cf   : > { %5757 = vrcp.f32 %v8627_v30  ;;  %v3601_v10 = vadd.f32 %v8591_v21, %v3600_v58  ;;  %v2654_v5 = vsub.f32 1.0, %v2653_v61  ;;  %v8648_v34 = vadd.f32 1.0, %v5752_v42 }
 0x2d0   : > { %5759 = vrcp.f32 %v8635_v26  ;;  %v4391_v54 = vadd.f32 %v4390_v4, %v8364_v63  ;;  %v3608_v47 = vand.u32 2147483648, %v8532_v14  ;;  %v4080_v40 = vmul.f32 %v8603_v23, %v4079_v31  ;;  %v1525_v31 = vpop.f32.mrf.mxu0 }
 0x2d1   : > { %v5193_v38 = vmul.f32 -1.442695, %v8638_v48  ;;  %v4525_v7 = vrot.slane %v8356_v39, 1  ;;  %v4465_v19 = vadd.f32 %v4464_v25, %v8393_v11  ;;  %v4267_v45 = vmul.f32 %v3130_v60, %v8289_v59 }
 0x2d2   : > { %vm3602_vm1 = vweird.f32 %v8532_v14  ;;  %v5754_v49 = vpop.eup %5753  ;;  %v8659_v37 = vadd.f32 %v4538_v51, %v8503_v46  ;;  %v8661_v29 = vadd.f32 %v4612_v22, %v4611_v18  ;;  %v8663_v63 = vadd.f32 %v4392_v52, %v4391_v54 }
 0x2d3   : > { %vm8667_vm3 = vmor %vm3602_vm1, %vm3603_vm0  ;;  %v8672_v11 = vadd.f32 %v8250_v44, %v1762_v35  ;;  %vm3607_vm4 = vcmp.eq.f32.partialorder %v3606_v27, 8.507059e+37  ;;  %v2655_v14 = vmul.f32 %v8608_v55, %v2654_v5  ;;  %5761 = vrcp.f32 %v8648_v34 }
 0x2d4   : > { %v8674_v59 = vpop.eup %5755  ;;  %v3605_v46 = vsel %vm8667_vm3, %v8591_v21, %v3601_v10  ;;  %v3609_v56 = vor.u32 1.1754944e-38, %v3608_v47  ;;  %v4081_v62 = vadd.f32 %v8603_v23, %v4080_v40  ;;  %vm4083_vm5 = vweird.f32 %v8603_v23 }
 0x2d5   : > { %v8681_v18 = vpop.eup %5757  ;;  %5763 = vpow2.f32 %v5193_v38  ;;  %v4466_v15 = vsel %vm4341_vm14, %v4267_v45, 0.0  ;;  %vm4082_vm7 = vweird.f32 %v8547_v17  ;;  %v4086_v21 = vand.u32 2147483647, %v8547_v17 }
 0x2d6   : > { %v8685_v57 = vpop.eup %5759  ;;  %v4088_v0 = vand.u32 2147483648, %v8547_v17  ;;  %v3610_v36 = vsel %vm3607_vm4, %v3609_v56, %v3605_v46  ;;  %v2661_v4 = vand.u32 2147483647, %v8559_v41  ;;  %v3133_v25 = vmul.f32 %v8674_v59, %v8614_v12  ;;  %vm8696_vm8 = vmor %vm4082_vm7, %vm4083_vm5 }
 0x2d7   : > { %v8694_v51 = vadd.f32 1.0, %v5754_v49  ;;  %v2656_v13 = vadd.f32 %v8608_v55, %v2655_v14  ;;  %vm2658_vm10 = vweird.f32 %v8608_v55  ;;  %v2663_v58 = vand.u32 2147483648, %v8559_v41 }
 0x2d8   : > { %v3613_v17 = vmul.f32 %v8681_v18, %v8627_v30  ;;  %v8705_v61 = vadd.f32 %v4466_v15, %v4465_v19  ;;  %v4085_v42 = vsel %vm8696_vm8, %v8603_v23, %v4081_v62  ;;  %vm2657_vm9 = vweird.f32 %v8559_v41 }
 0x2d9   : > { %v4093_v16 = vmul.f32 %v8685_v57, %v8635_v26  ;;  %v8713_v22 = vpop.eup %5761  ;;  %v4299_v52 = vmul.f32 %v3610_v36, %v8399_v24  ;;  %v4089_v60 = vor.u32 1.1754944e-38, %v4088_v0  ;;  %v3143_v27 = vand.u32 2147483648, %v8614_v12  ;;  %vm8720_vm11 = vmor %vm2657_vm9, %vm2658_vm10 }
 0x2da   : > { %v3623_v10 = vand.u32 2147483648, %v8627_v30  ;;  %vm4087_vm2 = vcmp.eq.f32.partialorder %v4086_v21, 8.507059e+37  ;;  %vm8724_vm12 = vcmp.eq.f32.partialorder %v2661_v4, 8.507059e+37  ;;  %v3134_v35 = vsub.f32 1.0, %v3133_v25 }
 0x2db   : > { %v5764_v5 = vpop.eup %5763  ;;  %5765 = vrcp.f32 %v8694_v51  ;;  %v4090_v24 = vsel %vm4087_vm2, %v4089_v60, %v4085_v42  ;;  %v2660_v54 = vsel %vm8720_vm11, %v8608_v55, %v2656_v13  ;;  %v2664_v47 = vor.u32 1.1754944e-38, %v2663_v58  ;;  %v1605_v13 = vpop.f32.mrf.mxu1 }
 0x2dc   : > { %v3614_v40 = vsub.f32 1.0, %v3613_v17  ;;  %vm3137_vm15 = vweird.f32 %v8614_v12  ;;  %v3141_v38 = vand.u32 2147483647, %v8614_v12  ;;  %v3621_v19 = vand.u32 2147483647, %v8627_v30  ;;  %v1685_v58 = vpop.f32.mrf.mxu2 }
 0x2dd   : > { %v4094_v45 = vsub.f32 1.0, %v4093_v16  ;;  %v2668_v49 = vmul.f32 %v8713_v22, %v8648_v34  ;;  %v4540_v8 = vsel %vm4341_vm14, %v4299_v52, 0.0  ;;  %v8738_v46 = vor.u32 1.1754944e-38, %v3143_v27  ;;  %v1765_v27 = vpop.f32.mrf.mxu3 }
 0x2de   : > { %vm3617_vm6 = vweird.f32 %v8627_v30  ;;  %v8741_v14 = vor.u32 1.1754944e-38, %v3623_v10  ;;  %v8743_v55 = vadd.f32 1.0, %v5764_v5  ;;  %v4331_v56 = vmul.f32 %v4090_v24, %v8436_v6 }
 0x2df   : > { %v2665_v62 = vsel %vm8724_vm12, %v2664_v47, %v2660_v54  ;;  %v3135_v15 = vmul.f32 %v8674_v59, %v3134_v35  ;;  %vm4097_vm13 = vweird.f32 %v8635_v26  ;;  %v5225_v21 = vmul.f32 -1.442695, %v8672_v11 }
 0x2e0   : > { %vm3138_vm0 = vweird.f32 %v8674_v59  ;;  %v3615_v0 = vmul.f32 %v8681_v18, %v3614_v40  ;;  %5767 = vrcp.f32 %v8743_v55  ;;  %v8755_v36 = vadd.f32 %v8250_v44, %v1525_v31 }
 0x2e1   : > { %v8757_v4 = vpop.eup %5765  ;;  %vm3618_vm1 = vweird.f32 %v8681_v18  ;;  %v4095_v6 = vmul.f32 %v8685_v57, %v4094_v45  ;;  %v4101_v25 = vand.u32 2147483647, %v8635_v26  ;;  %v2669_v33 = vsub.f32 1.0, %v2668_v49  ;;  %vm8801_vm7 = vmor %vm3137_vm15, %vm3138_vm0 }
 0x2e2   : > { %v8763_v17 = vadd.f32 %v4540_v8, %v8659_v37  ;;  %v8766_v42 = vmul.f32 %v2665_v62, %v8454_v20  ;;  %vm8768_vm3 = vcmp.eq.f32.partialorder %v3141_v38, 8.507059e+37  ;;  %vm8772_vm4 = vcmp.eq.f32.partialorder %v3621_v19, 8.507059e+37  ;;  %v1527_v20 = vpop.f32.mrf.mxu0  ;;  %vm8820_vm10 = vmor %vm3617_vm6, %vm3618_vm1 }
 0x2e3   : > { %v4103_v52 = vand.u32 2147483648, %v8635_v26  ;;  %v3148_v60 = vmul.f32 %v8757_v4, %v8694_v51  ;;  %v4614_v37 = vsel %vm4341_vm14, %v4331_v56, 0.0  ;;  %v3136_v10 = vadd.f32 %v8674_v59, %v3135_v15 }
 0x2e4   : > { %vm4098_vm5 = vweird.f32 %v8685_v57  ;;  %5769 = vpow2.f32 %v5225_v21  ;;  %v3616_v5 = vadd.f32 %v8681_v18, %v3615_v0  ;;  %v5130_v23 = vmul.f32 -1.442695, %v8755_v36 }
 0x2e5   : > { %v8785_v41 = vadd.f32 %v8250_v44, %v1605_v13  ;;  %v8788_v35 = vadd.f32 %v8250_v44, %v1685_v58  ;;  %v4096_v24 = vadd.f32 %v8685_v57, %v4095_v6  ;;  %v2670_v54 = vmul.f32 %v8713_v22, %v2669_v33  ;;  %vm8837_vm9 = vmor %vm4097_vm13, %vm4098_vm5 }
 0x2e6   : > { %v3149_v47 = vsub.f32 1.0, %v3148_v60  ;;  %v8793_v40 = vadd.f32 %v8250_v44, %v1765_v27  ;;  %v8795_v38 = vpop.eup %5767  ;;  %vm8805_vm8 = vcmp.eq.f32.partialorder %v4101_v25, 8.507059e+37  ;;  %5771 = vpow2.f32 %v5130_v23  ;;  %v1607_v27 = vpop.f32.mrf.mxu1 }
 0x2e7   : > { %v5162_v49 = vmul.f32 -1.442695, %v8785_v41  ;;  %v8811_v8 = vadd.f32 %v8250_v44, %v1527_v20  ;;  %v8814_v56 = vadd.f32 %v4614_v37, %v8661_v29  ;;  %v4104_v62 = vor.u32 1.1754944e-38, %v4103_v52 }
 0x2e8   : > { %v3628_v15 = vmul.f32 %v8795_v38, %v8743_v55  ;;  %v5194_v21 = vmul.f32 -1.442695, %v8788_v35  ;;  %v3140_v0 = vsel %vm8801_vm7, %v8674_v59, %v3136_v10  ;;  %v3620_v29 = vsel %vm8820_vm10, %v8681_v18, %v3616_v5 }
 0x2e9   : > { %vm2673_vm2 = vweird.f32 %v8713_v22  ;;  %5773 = vpow2.f32 %v5162_v49  ;;  %v4100_v59 = vsel %vm8837_vm9, %v8685_v57, %v4096_v24  ;;  %v2671_v25 = vadd.f32 %v8713_v22, %v2670_v54 }
 0x2ea   : > { %v5770_v6 = vpop.eup %5769  ;;  %v3150_v18 = vmul.f32 %v8757_v4, %v3149_v47  ;;  %v5226_v33 = vmul.f32 -1.442695, %v8793_v40  ;;  %v3629_v13 = vsub.f32 1.0, %v3628_v15  ;;  %5775 = vpow2.f32 %v5194_v21 }
 0x2eb   : > { %v8848_v26 = vadd.f32 1.0, %v5770_v6  ;;  %v5131_v58 = vmul.f32 -1.442695, %v8811_v8  ;;  %v3145_v52 = vsel %vm8768_vm3, %v8738_v46, %v3140_v0  ;;  %v3625_v57 = vsel %vm8772_vm4, %v8741_v14, %v3620_v29 }
 0x2ec   : > { %vm2672_vm11 = vweird.f32 %v8648_v34  ;;  %v2678_v60 = vand.u32 2147483648, %v8648_v34  ;;  %v5772_v37 = vpop.eup %5771  ;;  %v4105_v10 = vsel %vm8805_vm8, %v4104_v62, %v4100_v59  ;;  %v2676_v46 = vand.u32 2147483647, %v8648_v34 }
 0x2ed   : > { %vm8863_vm12 = vmor %vm2672_vm11, %vm2673_vm2  ;;  %v3158_v16 = vand.u32 2147483648, %v8694_v51  ;;  %5777 = vrcp.f32 %v8848_v26  ;;  %vm3153_vm15 = vweird.f32 %v8757_v4  ;;  %v8874_v31 = vadd.f32 1.0, %v5772_v37 }
 0x2ee   : > { %v2675_v14 = vsel %vm8863_vm12, %v8713_v22, %v2671_v25  ;;  %5779 = vpow2.f32 %v5226_v33  ;;  %v3151_v23 = vadd.f32 %v8757_v4, %v3150_v18  ;;  %v3630_v24 = vmul.f32 %v8795_v38, %v3629_v13  ;;  %v1687_v22 = vpop.f32.mrf.mxu2 }
 0x2ef   : > { %v5774_v5 = vpop.eup %5773  ;;  %5781 = vpow2.f32 %v5131_v58  ;;  %v8879_v34 = vadd.f32 %v8250_v44, %v1607_v27  ;;  %v4268_v54 = vmul.f32 %v3145_v52, %v8486_v50  ;;  %v4300_v47 = vmul.f32 %v3625_v57, %v8489_v9 }
 0x2f0   : > { %v2679_v19 = vor.u32 1.1754944e-38, %v2678_v60  ;;  %5783 = vrcp.f32 %v8874_v31  ;;  %v5776_v45 = vpop.eup %5775  ;;  %v4332_v49 = vmul.f32 %v4105_v10, %v8492_v28  ;;  %vm2677_vm6 = vcmp.eq.f32.partialorder %v2676_v46, 8.507059e+37  ;;  %v1767_v46 = vpop.f32.mrf.mxu3 }
 0x2f1   : > { %vm3152_vm13 = vweird.f32 %v8694_v51  ;;  %v3156_v12 = vand.u32 2147483647, %v8694_v51  ;;  %v3159_v50 = vor.u32 1.1754944e-38, %v3158_v16  ;;  %vm3633_vm1 = vweird.f32 %v8795_v38 }
 0x2f2   : > { %v2680_v62 = vsel %vm2677_vm6, %v2679_v19, %v2675_v14  ;;  %vm8889_vm0 = vmor %vm3152_vm13, %vm3153_vm15  ;;  %v8894_v9 = vadd.f32 1.0, %v5774_v5  ;;  %v3631_v51 = vadd.f32 %v8795_v38, %v3630_v24  ;;  %v5163_v0 = vmul.f32 -1.442695, %v8879_v34 }
 0x2f3   : > { %v8896_v21 = vpop.eup %5777  ;;  %v3155_v28 = vsel %vm8889_vm0, %v8757_v4, %v3151_v23  ;;  %v8904_v29 = vadd.f32 %v8250_v44, %v1687_v22  ;;  %v3638_v6 = vand.u32 2147483648, %v8743_v55  ;;  %v8910_v25 = vadd.f32 1.0, %v5776_v45 }
 0x2f4   : > { %v5780_v30 = vpop.eup %5779  ;;  %v4108_v59 = vmul.f32 %v8896_v21, %v8848_v26  ;;  %5785 = vrcp.f32 %v8894_v9  ;;  %v4237_v4 = vmul.f32 %v2680_v62, %v8540_v32  ;;  %vm3157_vm3 = vcmp.eq.f32.partialorder %v3156_v12, 8.507059e+37 }
 0x2f5   : > { %v5782_v18 = vpop.eup %5781  ;;  %vm3632_vm4 = vweird.f32 %v8743_v55  ;;  %v3636_v33 = vand.u32 2147483647, %v8743_v55  ;;  %v4394_v58 = vsel %vm4341_vm14, %v8766_v42, 0.0  ;;  %v4468_v52 = vsel %vm4341_vm14, %v4268_v54, 0.0 }
 0x2f6   : > { %v8915_v13 = vpop.eup %5783  ;;  %v3160_v57 = vsel %vm3157_vm3, %v3159_v50, %v3155_v28  ;;  %vm8922_vm5 = vmor %vm3632_vm4, %vm3633_vm1  ;;  %v4109_v32 = vsub.f32 1.0, %v4108_v59  ;;  %5787 = vpow2.f32 %v5163_v0  ;;  %v5195_v42 = vmul.f32 -1.442695, %v8904_v29 }
 0x2f7   : > { %v3635_v27 = vsel %vm8922_vm5, %v8795_v38, %v3631_v51  ;;  %v2683_v55 = vmul.f32 %v8915_v13, %v8874_v31  ;;  %v4542_v37 = vsel %vm4341_vm14, %v4300_v47, 0.0  ;;  %v3639_v10 = vor.u32 1.1754944e-38, %v3638_v6 }
 0x2f8   : > { %5789 = vrcp.f32 %v8910_v25  ;;  %v8934_v20 = vadd.f32 1.0, %v5780_v30  ;;  %v4616_v16 = vsel %vm4341_vm14, %v4332_v49, 0.0  ;;  %v4396_v14 = vsel %vm4341_vm14, %v4237_v4, 0.0  ;;  %v8973_v30 = vld [vmem:[%s9757_s2] ss:$0 sm:$0xff] }
 0x2f9   : > { %vm3637_vm7 = vcmp.eq.f32.partialorder %v3636_v33, 8.507059e+37  ;;  %v8938_v38 = vadd.f32 1.0, %v5782_v18  ;;  %v4269_v23 = vmul.f32 %v3160_v57, %v8589_v53  ;;  %v4110_v54 = vmul.f32 %v8896_v21, %v4109_v32  ;;  %v1530_v53 = vpop.f32.mrf.mxu0 }
 0x2fa   : > { %v8940_v5 = vpop.eup %5785  ;;  %v3640_v24 = vsel %vm3637_vm7, %v3639_v10, %v3635_v27  ;;  %v2684_v47 = vsub.f32 1.0, %v2683_v55  ;;  %v4395_v19 = vadd.f32 %v4394_v58, %v8663_v63  ;;  %v4469_v22 = vadd.f32 %v4468_v52, %v8705_v61 }
 0x2fb   : > { %5791 = vpow2.f32 %v5195_v42  ;;  %v8947_v45 = vadd.f32 %v8250_v44, %v1767_v46  ;;  %v4543_v49 = vadd.f32 %v4542_v37, %v8763_v17  ;;  %v8951_v12 = vadd.f32 %v4616_v16, %v8814_v56 }
 0x2fc   : > { %v4116_v62 = vand.u32 2147483647, %v8848_v26  ;;  %5793 = vrcp.f32 %v8934_v20  ;;  %v5788_v15 = vpop.eup %5787  ;;  %v8955_v50 = vadd.f32 %v4396_v14, %v4395_v19  ;;  %v4301_v63 = vmul.f32 %v3640_v24, %v8638_v48 }
 0x2fd   : > { %v3163_v61 = vmul.f32 %v8940_v5, %v8894_v9  ;;  %5795 = vrcp.f32 %v8938_v38  ;;  %v4470_v17 = vsel %vm4341_vm14, %v4269_v23, 0.0  ;;  %v4111_v56 = vadd.f32 %v8896_v21, %v4110_v54 }
 0x2fe   : > { %v8961_v44 = vpop.eup %5789  ;;  %vm4113_vm8 = vweird.f32 %v8896_v21  ;;  %v2685_v28 = vmul.f32 %v8915_v13, %v2684_v47  ;;  %v4118_v51 = vand.u32 2147483648, %v8848_v26  ;;  %v2691_v0 = vand.u32 2147483647, %v8874_v31 }
 0x2ff   : > { %v5227_v48 = vmul.f32 -1.442695, %v8947_v45  ;;  %v8976_v6 = vadd.f32 %v8973_v30, %v1530_v53  ;;  %vm4112_vm10 = vweird.f32 %v8848_v26  ;;  %vm8979_vm9 = vcmp.eq.f32.partialorder %v4116_v62, 8.507059e+37 }
 0x300   : > { %v2693_v18 = vand.u32 2147483648, %v8874_v31  ;;  %v8984_v4 = vadd.f32 1.0, %v5788_v15  ;;  %v8986_v58 = vadd.f32 %v4470_v17, %v4469_v22  ;;  %v4544_v52 = vsel %vm4341_vm14, %v4301_v63, 0.0  ;;  %vm8989_vm2 = vmor %vm4112_vm10, %vm4113_vm8  ;;  %v1610_v63 = vpop.f32.mrf.mxu1 }
 0x301   : > { %v5792_v33 = vpop.eup %5791  ;;  %v3164_v60 = vsub.f32 1.0, %v3163_v61  ;;  %v3643_v26 = vmul.f32 %v8961_v44, %v8910_v25  ;;  %v4115_v27 = vsel %vm8989_vm2, %v8896_v21, %v4111_v56  ;;  %v2686_v55 = vadd.f32 %v8915_v13, %v2685_v28 }
 0x302   : > { %v8995_v32 = vpop.eup %5793  ;;  %vm2688_vm11 = vweird.f32 %v8915_v13  ;;  %5797 = vrcp.f32 %v8984_v4  ;;  %v4119_v37 = vor.u32 1.1754944e-38, %v4118_v51  ;;  %vm2687_vm12 = vweird.f32 %v8874_v31 }
 0x303   : > { %v9003_v42 = vpop.eup %5795  ;;  %vm9006_vm15 = vcmp.eq.f32.partialorder %v2691_v0, 8.507059e+37  ;;  %5799 = vpow2.f32 %v5227_v48  ;;  %v9010_v46 = vadd.f32 %v4544_v52, %v4543_v49  ;;  %v2694_v16 = vor.u32 1.1754944e-38, %v2693_v18  ;;  %vm9016_vm13 = vmor %vm2687_vm12, %vm2688_vm11 }
 0x304   : > { %vm3167_vm6 = vweird.f32 %v8894_v9  ;;  %v3171_v21 = vand.u32 2147483647, %v8894_v9  ;;  %v4120_v14 = vsel %vm8979_vm9, %v4119_v37, %v4115_v27  ;;  %v3165_v31 = vmul.f32 %v8940_v5, %v3164_v60 }
 0x305   : > { %v3644_v24 = vsub.f32 1.0, %v3643_v26  ;;  %v4123_v54 = vmul.f32 %v8995_v32, %v8934_v20  ;;  %v2690_v47 = vsel %vm9016_vm13, %v8915_v13, %v2686_v55  ;;  %v3173_v19 = vand.u32 2147483648, %v8894_v9 }
 0x306   : > { %v2698_v22 = vmul.f32 %v9003_v42, %v8938_v38  ;;  %v9029_v49 = vadd.f32 1.0, %v5792_v33  ;;  %vm3647_vm0 = vweird.f32 %v8910_v25  ;;  %v3651_v62 = vand.u32 2147483647, %v8910_v25 }
 0x307   : > { %v3653_v53 = vand.u32 2147483648, %v8910_v25  ;;  %v4133_v15 = vand.u32 2147483648, %v8934_v20  ;;  %v4333_v13 = vmul.f32 %v4120_v14, %v8672_v11  ;;  %vm3168_vm1 = vweird.f32 %v8940_v5  ;;  %v1690_v14 = vpop.f32.mrf.mxu2 }
 0x308   : > { %v9035_v61 = vpop.eup %5797  ;;  %vm9039_vm3 = vcmp.eq.f32.partialorder %v3171_v21, 8.507059e+37  ;;  %5801 = vrcp.f32 %v9029_v49  ;;  %v2695_v28 = vsel %vm9006_vm15, %v2694_v16, %v2690_v47  ;;  %v3166_v51 = vadd.f32 %v8940_v5, %v3165_v31  ;;  %vm9062_vm5 = vmor %vm3167_vm6, %vm3168_vm1 }
 0x309   : > { %v5800_v56 = vpop.eup %5799  ;;  %v3645_v0 = vmul.f32 %v8961_v44, %v3644_v24  ;;  %v4124_v48 = vsub.f32 1.0, %v4123_v54  ;;  %v3174_v59 = vor.u32 1.1754944e-38, %v3173_v19  ;;  %v2699_v18 = vsub.f32 1.0, %v2698_v22  ;;  %v1770_v19 = vpop.f32.mrf.mxu3 }
 0x30a   : > { %v2708_v11 = vand.u32 2147483648, %v8938_v38  ;;  %v3178_v33 = vmul.f32 %v9035_v61, %v8984_v4  ;;  %v3654_v52 = vor.u32 1.1754944e-38, %v3653_v53  ;;  %vm4127_vm4 = vweird.f32 %v8934_v20 }
 0x30b   : > { %v4131_v57 = vand.u32 2147483647, %v8934_v20  ;;  %v9053_v60 = vor.u32 1.1754944e-38, %v4133_v15  ;;  %v2706_v26 = vand.u32 2147483647, %v8938_v38  ;;  %v4618_v27 = vsel %vm4341_vm14, %v4333_v13, 0.0 }
 0x30c   : > { %v4238_v55 = vmul.f32 %v2695_v28, %v8755_v36  ;;  %vm9066_vm7 = vcmp.eq.f32.partialorder %v3651_v62, 8.507059e+37  ;;  %vm2702_vm8 = vweird.f32 %v8938_v38  ;;  %v9071_v16 = vadd.f32 1.0, %v5800_v56  ;;  %v1532_v62 = vpop.f32.mrf.mxu0 }
 0x30d   : > { %v5132_v21 = vmul.f32 -1.442695, %v8976_v6  ;;  %v3170_v36 = vsel %vm9062_vm5, %v8940_v5, %v3166_v51  ;;  %v3646_v9 = vadd.f32 %v8961_v44, %v3645_v0  ;;  %vm3648_vm10 = vweird.f32 %v8961_v44 }
 0x30e   : > { %v4125_v23 = vmul.f32 %v8995_v32, %v4124_v48  ;;  %v9080_v31 = vpop.eup %5801  ;;  %v2700_v24 = vmul.f32 %v9003_v42, %v2699_v18  ;;  %v2709_v54 = vor.u32 1.1754944e-38, %v2708_v11  ;;  %v3179_v47 = vsub.f32 1.0, %v3178_v33  ;;  %vm9100_vm11 = vmor %vm3647_vm0, %vm3648_vm10  ;;  %v1612_v48 = vpop.f32.mrf.mxu1 }
 0x30f   : > { %5803 = vrcp.f32 %v9071_v16  ;;  %v9085_v22 = vadd.f32 %v4618_v27, %v8951_v12  ;;  %vm4128_vm9 = vweird.f32 %v8995_v32  ;;  %vm2703_vm2 = vweird.f32 %v9003_v42  ;;  %v1692_v38 = vpop.f32.mrf.mxu2 }
 0x310   : > { %v3658_v5 = vmul.f32 %v9080_v31, %v9029_v49  ;;  %v9092_v53 = vsel %vm4341_vm14, %v4238_v55, 0.0  ;;  %v3175_v15 = vsel %vm9039_vm3, %v3174_v59, %v3170_v36  ;;  %vm9104_vm12 = vcmp.eq.f32.partialorder %v4131_v57, 8.507059e+37  ;;  %vm9141_vm13 = vmor %vm4127_vm4, %vm4128_vm9 }
 0x311   : > { %5805 = vpow2.f32 %v5132_v21  ;;  %v9109_v56 = vadd.f32 %v8973_v30, %v1610_v63  ;;  %v3650_v17 = vsel %vm9100_vm11, %v8961_v44, %v3646_v9  ;;  %v4126_v28 = vadd.f32 %v8995_v32, %v4125_v23  ;;  %vm9158_vm0 = vmor %vm2702_vm8, %vm2703_vm2 }
 0x312   : > { %vm9115_vm15 = vcmp.eq.f32.partialorder %v2706_v26, 8.507059e+37  ;;  %v9120_v51 = vadd.f32 %v8973_v30, %v1690_v14  ;;  %v9123_v0 = vadd.f32 %v8973_v30, %v1770_v19  ;;  %v2701_v63 = vadd.f32 %v9003_v42, %v2700_v24 }
 0x313   : > { %v3180_v59 = vmul.f32 %v9035_v61, %v3179_v47  ;;  %v5164_v18 = vmul.f32 -1.442695, %v9109_v56  ;;  %v9129_v44 = vadd.f32 %v8973_v30, %v1532_v62  ;;  %vm3182_vm6 = vweird.f32 %v8984_v4 }
 0x314   : > { %v3659_v11 = vsub.f32 1.0, %v3658_v5  ;;  %v5196_v33 = vmul.f32 -1.442695, %v9120_v51  ;;  %v5228_v57 = vmul.f32 -1.442695, %v9123_v0  ;;  %v4270_v27 = vmul.f32 %v3175_v15, %v8785_v41 }
 0x315   : > { %v9134_v26 = vpop.eup %5803  ;;  %5807 = vpow2.f32 %v5164_v18  ;;  %v5133_v37 = vmul.f32 -1.442695, %v9129_v44  ;;  %v9147_v21 = vadd.f32 %v8973_v30, %v1612_v48  ;;  %v3655_v14 = vsel %vm9066_vm7, %v3654_v52, %v3650_v17 }
 0x316   : > { %v4130_v41 = vsel %vm9141_vm13, %v8995_v32, %v4126_v28  ;;  %v3186_v36 = vand.u32 2147483647, %v8984_v4  ;;  %v4138_v9 = vmul.f32 %v9134_v26, %v9071_v16  ;;  %v2705_v52 = vsel %vm9158_vm0, %v9003_v42, %v2701_v63 }
 0x317   : > { %v5806_v23 = vpop.eup %5805  ;;  %v3181_v32 = vadd.f32 %v9035_v61, %v3180_v59  ;;  %vm3183_vm1 = vweird.f32 %v9035_v61  ;;  %5809 = vpow2.f32 %v5196_v33  ;;  %v3660_v10 = vmul.f32 %v9080_v31, %v3659_v11 }
 0x318   : > { %v4139_v24 = vsub.f32 1.0, %v4138_v9  ;;  %v9171_v47 = vadd.f32 1.0, %v5806_v23  ;;  %5811 = vpow2.f32 %v5228_v57  ;;  %v4472_v19 = vsel %vm4341_vm14, %v4270_v27, 0.0  ;;  %vm9190_vm3 = vmor %vm3182_vm6, %vm3183_vm1 }
 0x319   : > { %v3188_v5 = vand.u32 2147483648, %v8984_v4  ;;  %5813 = vpow2.f32 %v5133_v37  ;;  %v5165_v62 = vmul.f32 -1.442695, %v9147_v21  ;;  %v4302_v42 = vmul.f32 %v3655_v14, %v8788_v35 }
 0x31a   : > { %v4135_v15 = vsel %vm9104_vm12, %v9053_v60, %v4130_v41  ;;  %5815 = vrcp.f32 %v9171_v47  ;;  %v9182_v12 = vadd.f32 %v8973_v30, %v1692_v38  ;;  %v2710_v28 = vsel %vm9115_vm15, %v2709_v54, %v2705_v52 }
 0x31b   : > { %v5808_v17 = vpop.eup %5807  ;;  %vm3663_vm4 = vweird.f32 %v9080_v31  ;;  %v3666_v35 = vand.u32 2147483647, %v9029_v49  ;;  %v3668_v60 = vand.u32 2147483648, %v9029_v49  ;;  %v3185_v13 = vsel %vm9190_vm3, %v9035_v61, %v3181_v32 }
 0x31c   : > { %v3661_v54 = vadd.f32 %v9080_v31, %v3660_v10  ;;  %v4140_v25 = vmul.f32 %v9134_v26, %v4139_v24  ;;  %v9202_v63 = vadd.f32 1.0, %v5808_v17  ;;  %v4334_v59 = vmul.f32 %v4135_v15, %v8793_v40 }
 0x31d   : > { %v5810_v4 = vpop.eup %5809  ;;  %vm3187_vm5 = vcmp.eq.f32.partialorder %v3186_v36, 8.507059e+37  ;;  %v3189_v18 = vor.u32 1.1754944e-38, %v3188_v5  ;;  %5817 = vpow2.f32 %v5165_v62  ;;  %v4239_v33 = vmul.f32 %v2710_v28, %v8811_v8  ;;  %v1772_v36 = vpop.f32.mrf.mxu3 }
 0x31e   : > { %v5812_v11 = vpop.eup %5811  ;;  %vm3662_vm7 = vweird.f32 %v9029_v49  ;;  %5819 = vrcp.f32 %v9202_v63  ;;  %v5197_v61 = vmul.f32 -1.442695, %v9182_v12  ;;  %vm9215_vm10 = vcmp.eq.f32.partialorder %v3666_v35, 8.507059e+37 }
 0x31f   : > { %v5814_v57 = vpop.eup %5813  ;;  %v3190_v27 = vsel %vm3187_vm5, %v3189_v18, %v3185_v13  ;;  %vm9211_vm8 = vmor %vm3662_vm7, %vm3663_vm4  ;;  %v9219_v37 = vadd.f32 1.0, %v5810_v4  ;;  %v9221_v8 = vadd.f32 1.0, %v5812_v11  ;;  %v3669_v41 = vor.u32 1.1754944e-38, %v3668_v60 }
 0x320   : > { %v9223_v49 = vpop.eup %5815  ;;  %v3665_v14 = vsel %vm9211_vm8, %v9080_v31, %v3661_v54  ;;  %v4141_v20 = vadd.f32 %v9134_v26, %v4140_v25  ;;  %vm4143_vm9 = vweird.f32 %v9134_v26  ;;  %v4148_v9 = vand.u32 2147483648, %v9071_v16  ;;  %v1535_v25 = vpop.f32.mrf.mxu0 }
 0x321   : > { %v2713_v23 = vmul.f32 %v9223_v49, %v9171_v47  ;;  %5821 = vrcp.f32 %v9219_v37  ;;  %v9234_v52 = vadd.f32 1.0, %v5814_v57  ;;  %v4271_v32 = vmul.f32 %v3190_v27, %v8879_v34 }
 0x322   : > { %vm4142_vm2 = vweird.f32 %v9071_v16  ;;  %v4146_v31 = vand.u32 2147483647, %v9071_v16  ;;  %5823 = vpow2.f32 %v5197_v61  ;;  %v4399_v10 = vadd.f32 %v9092_v53, %v8955_v50 }
 0x323   : > { %v5818_v38 = vpop.eup %5817  ;;  %v3670_v24 = vsel %vm9215_vm10, %v3669_v41, %v3665_v14  ;;  %vm9243_vm11 = vmor %vm4142_vm2, %vm4143_vm9  ;;  %5825 = vrcp.f32 %v9221_v8  ;;  %v9249_v34 = vadd.f32 %v8973_v30, %v1772_v36  ;;  %v4473_v16 = vadd.f32 %v4472_v19, %v8986_v58 }
 0x324   : > { %v9251_v62 = vpop.eup %5819  ;;  %v4546_v15 = vsel %vm4341_vm14, %v4302_v42, 0.0  ;;  %v4145_v50 = vsel %vm9243_vm11, %v9134_v26, %v4141_v20  ;;  %v2714_v53 = vsub.f32 1.0, %v2713_v23  ;;  %v4620_v17 = vsel %vm4341_vm14, %v4334_v59, 0.0 }
 0x325   : > { %v4400_v28 = vsel %vm4341_vm14, %v4239_v33, 0.0  ;;  %v4149_v48 = vor.u32 1.1754944e-38, %v4148_v9  ;;  %5827 = vrcp.f32 %v9234_v52  ;;  %v4474_v35 = vsel %vm4341_vm14, %v4271_v32, 0.0 }
 0x326   : > { %v4303_v60 = vmul.f32 %v3670_v24, %v8904_v29  ;;  %vm4147_vm12 = vcmp.eq.f32.partialorder %v4146_v31, 8.507059e+37  ;;  %v3193_v58 = vmul.f32 %v9251_v62, %v9202_v63  ;;  %v4547_v26 = vadd.f32 %v4546_v15, %v9010_v46 }
 0x327   : > { %v9265_v19 = vpop.eup %5821  ;;  %v4150_v42 = vsel %vm4147_vm12, %v4149_v48, %v4145_v50  ;;  %v9268_v13 = vadd.f32 1.0, %v5818_v38  ;;  %v5229_v54 = vmul.f32 -1.442695, %v9249_v34  ;;  %v4621_v59 = vadd.f32 %v4620_v17, %v9085_v22 }
 0x328   : > { %v5824_v4 = vpop.eup %5823  ;;  %v9272_v18 = vadd.f32 %v4400_v28, %v4399_v10  ;;  %v2715_v29 = vmul.f32 %v9223_v49, %v2714_v53  ;;  %v3673_v11 = vmul.f32 %v9265_v19, %v9219_v37  ;;  %v9279_v61 = vadd.f32 %v4474_v35, %v4473_v16 }
 0x329   : > { %v9277_v33 = vpop.eup %5825  ;;  %v2721_v46 = vand.u32 2147483647, %v9171_v47  ;;  %v2723_v57 = vand.u32 2147483648, %v9171_v47  ;;  %5829 = vrcp.f32 %v9268_v13  ;;  %v4548_v27 = vsel %vm4341_vm14, %v4303_v60, 0.0 }
 0x32a   : > { %v4335_v22 = vmul.f32 %v4150_v42, %v8947_v45  ;;  %v3194_v55 = vsub.f32 1.0, %v3193_v58  ;;  %v9287_v40 = vadd.f32 %v8973_v30, %v1535_v25  ;;  %v3203_v41 = vand.u32 2147483648, %v9202_v63 }
 0x32b   : > { %v9289_v14 = vpop.eup %5827  ;;  %v3674_v20 = vsub.f32 1.0, %v3673_v11  ;;  %v9292_v36 = vadd.f32 1.0, %v5824_v4  ;;  %5831 = vpow2.f32 %v5229_v54  ;;  %v2716_v9 = vadd.f32 %v9223_v49, %v2715_v29 }
 0x32c   : > { %vm2718_vm15 = vweird.f32 %v9223_v49  ;;  %v3201_v23 = vand.u32 2147483647, %v9202_v63  ;;  %v4153_v45 = vmul.f32 %v9277_v33, %v9221_v8  ;;  %v9299_v32 = vadd.f32 %v4548_v27, %v4547_v26 }
 0x32d   : > { %vm2717_vm6 = vweird.f32 %v9171_v47  ;;  %vm9302_vm13 = vcmp.eq.f32.partialorder %v2721_v46, 8.507059e+37  ;;  %v2724_v38 = vor.u32 1.1754944e-38, %v2723_v57  ;;  %v4622_v10 = vsel %vm4341_vm14, %v4335_v22, 0.0 }
 0x32e   : > { %v3195_v24 = vmul.f32 %v9251_v62, %v3194_v55  ;;  %vm3197_vm0 = vweird.f32 %v9202_v63  ;;  %v2728_v5 = vmul.f32 %v9289_v14, %v9234_v52  ;;  %vm9313_vm1 = vmor %vm2717_vm6, %vm2718_vm15  ;;  %v3204_v47 = vor.u32 1.1754944e-38, %v3203_v41 }
 0x32f   : > { %v9311_v16 = vpop.eup %5829  ;;  %v3675_v50 = vmul.f32 %v9265_v19, %v3674_v20  ;;  %5833 = vrcp.f32 %v9292_v36  ;;  %v5134_v53 = vmul.f32 -1.442695, %v9287_v40  ;;  %v2720_v17 = vsel %vm9313_vm1, %v9223_v49, %v2716_v9  ;;  %v1615_v49 = vpop.f32.mrf.mxu1 }
 0x330   : > { %vm9323_vm3 = vcmp.eq.f32.partialorder %v3201_v23, 8.507059e+37  ;;  %vm3677_vm4 = vweird.f32 %v9219_v37  ;;  %v3681_v48 = vand.u32 2147483647, %v9219_v37  ;;  %v4154_v35 = vsub.f32 1.0, %v4153_v45 }
 0x331   : > { %v5832_v60 = vpop.eup %5831  ;;  %v9329_v58 = vadd.f32 %v4622_v10, %v4621_v59  ;;  %v3683_v26 = vand.u32 2147483648, %v9219_v37  ;;  %v4163_v42 = vand.u32 2147483648, %v9221_v8  ;;  %v3208_v54 = vmul.f32 %v9311_v16, %v9268_v13 }
 0x332   : > { %v3196_v25 = vadd.f32 %v9251_v62, %v3195_v24  ;;  %vm3198_vm5 = vweird.f32 %v9251_v62  ;;  %v4161_v4 = vand.u32 2147483647, %v9221_v8  ;;  %v2729_v29 = vsub.f32 1.0, %v2728_v5 }
 0x333   : > { %v2725_v11 = vsel %vm9302_vm13, %v2724_v38, %v2720_v17  ;;  %v3676_v59 = vadd.f32 %v9265_v19, %v3675_v50  ;;  %vm3678_vm7 = vweird.f32 %v9265_v19  ;;  %v2738_v46 = vand.u32 2147483648, %v9234_v52  ;;  %vm9352_vm10 = vmor %vm3197_vm0, %vm3198_vm5  ;;  %v1695_v17 = vpop.f32.mrf.mxu2 }
 0x334   : > { %v4155_v57 = vmul.f32 %v9277_v33, %v4154_v35  ;;  %vm4157_vm8 = vweird.f32 %v9221_v8  ;;  %v2736_v27 = vand.u32 2147483647, %v9234_v52  ;;  %v9346_v22 = vadd.f32 1.0, %v5832_v60  ;;  %vm9366_vm2 = vmor %vm3677_vm4, %vm3678_vm7  ;;  %v1537_v60 = vpop.f32.mrf.mxu0 }
 0x335   : > { %v9348_v55 = vpop.eup %5833  ;;  %vm9356_vm9 = vcmp.eq.f32.partialorder %v3681_v48, 8.507059e+37  ;;  %v3684_v9 = vor.u32 1.1754944e-38, %v3683_v26  ;;  %v4164_v23 = vor.u32 1.1754944e-38, %v4163_v42  ;;  %v3209_v45 = vsub.f32 1.0, %v3208_v54 }
 0x336   : > { %v4240_v31 = vmul.f32 %v2725_v11, %v8976_v6  ;;  %v3200_v38 = vsel %vm9352_vm10, %v9251_v62, %v3196_v25  ;;  %vm9370_vm11 = vcmp.eq.f32.partialorder %v4161_v4, 8.507059e+37  ;;  %v2730_v24 = vmul.f32 %v9289_v14, %v2729_v29 }
 0x337   : > { %vm2732_vm12 = vweird.f32 %v9234_v52  ;;  %v3680_v6 = vsel %vm9366_vm2, %v9265_v19, %v3676_v59  ;;  %v2739_v5 = vor.u32 1.1754944e-38, %v2738_v46  ;;  %v3216_v62 = vand.u32 2147483647, %v9268_v13  ;;  %v1775_v19 = vpop.f32.mrf.mxu3  ;;  %v1617_v59 = vpop.f32.mrf.mxu1 }
 0x338   : > { %v3688_v37 = vmul.f32 %v9348_v55, %v9292_v36  ;;  %v4156_v15 = vadd.f32 %v9277_v33, %v4155_v57  ;;  %vm4158_vm15 = vweird.f32 %v9277_v33  ;;  %vm9384_vm6 = vcmp.eq.f32.partialorder %v2736_v27, 8.507059e+37 }
 0x339   : > { %vm3212_vm13 = vweird.f32 %v9268_v13  ;;  %5835 = vrcp.f32 %v9346_v22  ;;  %v3205_v48 = vsel %vm9323_vm3, %v3204_v47, %v3200_v38  ;;  %vm2733_vm0 = vweird.f32 %v9289_v14  ;;  %vm9403_vm1 = vmor %vm4157_vm8, %vm4158_vm15 }
 0x33a   : > { %v3210_v35 = vmul.f32 %v9311_v16, %v3209_v45  ;;  %5837 = vpow2.f32 %v5134_v53  ;;  %v4402_v26 = vsel %vm4341_vm14, %v4240_v31, 0.0  ;;  %v3685_v42 = vsel %vm9356_vm9, %v3684_v9, %v3680_v6  ;;  %vm9432_vm5 = vmor %vm2732_vm12, %vm2733_vm0 }
 0x33b   : > { %v2731_v54 = vadd.f32 %v9289_v14, %v2730_v24  ;;  %v3218_v25 = vand.u32 2147483648, %v9268_v13  ;;  %vm9407_vm3 = vcmp.eq.f32.partialorder %v3216_v62, 8.507059e+37  ;;  %v3689_v28 = vsub.f32 1.0, %v3688_v37 }
 0x33c   : > { %v9412_v4 = vadd.f32 %v8973_v30, %v1615_v49  ;;  %v9415_v29 = vadd.f32 %v8973_v30, %v1695_v17  ;;  %v9418_v11 = vadd.f32 %v8973_v30, %v1775_v19  ;;  %v4272_v8 = vmul.f32 %v3205_v48, %v9109_v56  ;;  %v1697_v48 = vpop.f32.mrf.mxu2 }
 0x33d   : > { %v4160_v46 = vsel %vm9403_vm1, %v9277_v33, %v4156_v15  ;;  %vm3213_vm4 = vweird.f32 %v9311_v16  ;;  %v9426_v57 = vadd.f32 %v8973_v30, %v1537_v60  ;;  %v3211_v27 = vadd.f32 %v9311_v16, %v3210_v35 }
 0x33e   : > { %v5166_v56 = vmul.f32 -1.442695, %v9412_v4  ;;  %v5198_v41 = vmul.f32 -1.442695, %v9415_v29  ;;  %v5230_v33 = vmul.f32 -1.442695, %v9418_v11  ;;  %v4304_v9 = vmul.f32 %v3685_v42, %v9120_v51  ;;  %vm9458_vm7 = vmor %vm3212_vm13, %vm3213_vm4 }
 0x33f   : > { %v9440_v20 = vpop.eup %5835  ;;  %v2735_v52 = vsel %vm9432_vm5, %v9289_v14, %v2731_v54  ;;  %v3219_v45 = vor.u32 1.1754944e-38, %v3218_v25  ;;  %v9447_v31 = vadd.f32 %v8973_v30, %v1617_v59  ;;  %v4165_v63 = vsel %vm9370_vm11, %v4164_v23, %v4160_v46  ;;  %v1777_v25 = vpop.f32.mrf.mxu3 }
 0x340   : > { %v5838_v38 = vpop.eup %5837  ;;  %v3690_v24 = vmul.f32 %v9348_v55, %v3689_v28  ;;  %5839 = vpow2.f32 %v5166_v56  ;;  %v5135_v6 = vmul.f32 -1.442695, %v9426_v57  ;;  %v4476_v62 = vsel %vm4341_vm14, %v4272_v8, 0.0 }
 0x341   : > { %v3696_v14 = vand.u32 2147483647, %v9292_v36  ;;  %v9463_v37 = vadd.f32 1.0, %v5838_v38  ;;  %5841 = vpow2.f32 %v5198_v41  ;;  %v2740_v23 = vsel %vm9384_vm6, %v2739_v5, %v2735_v52 }
 0x342   : > { %v3215_v10 = vsel %vm9458_vm7, %v9311_v16, %v3211_v27  ;;  %v4168_v15 = vmul.f32 %v9440_v20, %v9346_v22  ;;  %5843 = vpow2.f32 %v5230_v33  ;;  %v4550_v13 = vsel %vm4341_vm14, %v4304_v9, 0.0 }
 0x343   : > { %v4336_v17 = vmul.f32 %v4165_v63, %v9123_v0  ;;  %5845 = vrcp.f32 %v9463_v37  ;;  %v5167_v19 = vmul.f32 -1.442695, %v9447_v31  ;;  %v4403_v50 = vadd.f32 %v4402_v26, %v9272_v18 }
 0x344   : > { %v3691_v5 = vadd.f32 %v9348_v55, %v3690_v24  ;;  %vm3693_vm8 = vweird.f32 %v9348_v55  ;;  %5847 = vpow2.f32 %v5135_v6  ;;  %v4241_v16 = vmul.f32 %v2740_v23, %v9129_v44 }
 0x345   : > { %v3220_v35 = vsel %vm9407_vm3, %v3219_v45, %v3215_v10  ;;  %vm3692_vm10 = vweird.f32 %v9292_v36  ;;  %v3698_v0 = vand.u32 2147483648, %v9292_v36  ;;  %v4477_v42 = vadd.f32 %v4476_v62, %v9279_v61 }
 0x346   : > { %v5840_v60 = vpop.eup %5839  ;;  %v9486_v54 = vadd.f32 %v4550_v13, %v9299_v32  ;;  %v4169_v18 = vsub.f32 1.0, %v4168_v15  ;;  %v9489_v26 = vadd.f32 %v8973_v30, %v1697_v48  ;;  %v4624_v44 = vsel %vm4341_vm14, %v4336_v17, 0.0  ;;  %vm9492_vm9 = vmor %vm3692_vm10, %vm3693_vm8 }
 0x347   : > { %v5842_v47 = vpop.eup %5841  ;;  %vm9496_vm2 = vcmp.eq.f32.partialorder %v3696_v14, 8.507059e+37  ;;  %v9500_v61 = vadd.f32 1.0, %v5840_v60  ;;  %5849 = vpow2.f32 %v5167_v19  ;;  %v4273_v28 = vmul.f32 %v3220_v35, %v9147_v21 }
 0x348   : > { %v5844_v32 = vpop.eup %5843  ;;  %v3695_v59 = vsel %vm9492_vm9, %v9348_v55, %v3691_v5  ;;  %v4176_v8 = vand.u32 2147483647, %v9346_v22  ;;  %v9507_v46 = vadd.f32 1.0, %v5842_v47  ;;  %v4404_v27 = vsel %vm4341_vm14, %v4241_v16, 0.0 }
 0x349   : > { %v9509_v49 = vpop.eup %5845  ;;  %v3699_v56 = vor.u32 1.1754944e-38, %v3698_v0  ;;  %5851 = vrcp.f32 %v9500_v61  ;;  %v9514_v41 = vadd.f32 %v8973_v30, %v1777_v25  ;;  %v4170_v21 = vmul.f32 %v9440_v20, %v4169_v18 }
 0x34a   : > { %v5848_v33 = vpop.eup %5847  ;;  %v2743_v55 = vmul.f32 %v9509_v49, %v9463_v37  ;;  %5853 = vrcp.f32 %v9507_v46  ;;  %v5199_v9 = vmul.f32 -1.442695, %v9489_v26  ;;  %v9522_v52 = vadd.f32 %v4624_v44, %v9329_v58 }
 0x34b   : > { %v3700_v45 = vsel %vm9496_vm2, %v3699_v56, %v3695_v59  ;;  %vm4172_vm11 = vweird.f32 %v9346_v22  ;;  %v4178_v30 = vand.u32 2147483648, %v9346_v22  ;;  %v9528_v38 = vadd.f32 %v4404_v27, %v4403_v50 }
 0x34c   : > { %v4478_v63 = vsel %vm4341_vm14, %v4273_v28, 0.0  ;;  %vm9531_vm12 = vcmp.eq.f32.partialorder %v4176_v8, 8.507059e+37  ;;  %v2744_v6 = vsub.f32 1.0, %v2743_v55  ;;  %vm4173_vm15 = vweird.f32 %v9440_v20 }
 0x34d   : > { %v5850_v62 = vpop.eup %5849  ;;  %v9536_v58 = vadd.f32 1.0, %v5844_v32  ;;  %v9538_v51 = vadd.f32 1.0, %v5848_v33  ;;  %v5231_v14 = vmul.f32 -1.442695, %v9514_v41  ;;  %v4305_v23 = vmul.f32 %v3700_v45, %v9182_v12  ;;  %vm9563_vm13 = vmor %vm4172_vm11, %vm4173_vm15 }
 0x34e   : > { %v4171_v10 = vadd.f32 %v9440_v20, %v4170_v21  ;;  %v2745_v15 = vmul.f32 %v9509_v49, %v2744_v6  ;;  %5855 = vpow2.f32 %v5199_v9  ;;  %v4179_v17 = vor.u32 1.1754944e-38, %v4178_v30 }
 0x34f   : > { %v9544_v13 = vpop.eup %5851  ;;  %vm2748_vm6 = vweird.f32 %v9509_v49  ;;  %v2751_v19 = vand.u32 2147483647, %v9463_v37  ;;  %5857 = vrcp.f32 %v9536_v58  ;;  %v9555_v5 = vadd.f32 1.0, %v5850_v62 }
 0x350   : > { %v9549_v48 = vpop.eup %5853  ;;  %v2746_v50 = vadd.f32 %v9509_v49, %v2745_v15  ;;  %v3223_v12 = vmul.f32 %v9544_v13, %v9500_v61  ;;  %5859 = vrcp.f32 %v9538_v51  ;;  %v9557_v16 = vadd.f32 %v4478_v63, %v4477_v42 }
 0x351   : > { %v2753_v0 = vand.u32 2147483648, %v9463_v37  ;;  %v3703_v60 = vmul.f32 %v9549_v48, %v9507_v46  ;;  %5861 = vpow2.f32 %v5231_v14  ;;  %v9571_v18 = vsel %vm4341_vm14, %v4305_v23, 0.0 }
 0x352   : > { %v4175_v42 = vsel %vm9563_vm13, %v9440_v20, %v4171_v10  ;;  %vm2747_vm0 = vweird.f32 %v9463_v37  ;;  %v3224_v22 = vsub.f32 1.0, %v3223_v12  ;;  %vm9583_vm3 = vcmp.eq.f32.partialorder %v2751_v19, 8.507059e+37 }
 0x353   : > { %vm9579_vm1 = vmor %vm2747_vm0, %vm2748_vm6  ;;  %v3231_v44 = vand.u32 2147483647, %v9500_v61  ;;  %v3233_v53 = vand.u32 2147483648, %v9500_v61  ;;  %v3704_v36 = vsub.f32 1.0, %v3703_v60  ;;  %v3713_v28 = vand.u32 2147483648, %v9507_v46 }
 0x354   : > { %v5856_v32 = vpop.eup %5855  ;;  %v2750_v20 = vsel %vm9579_vm1, %v9509_v49, %v2746_v50  ;;  %v3225_v37 = vmul.f32 %v9544_v13, %v3224_v22  ;;  %5863 = vrcp.f32 %v9555_v5  ;;  %v9599_v8 = vsel %vm9531_vm12, %v4179_v17, %v4175_v42 }
 0x355   : > { %v9595_v59 = vpop.eup %5857  ;;  %v2754_v27 = vor.u32 1.1754944e-38, %v2753_v0  ;;  %vm3228_vm4 = vweird.f32 %v9544_v13  ;;  %v3711_v56 = vand.u32 2147483647, %v9507_v46  ;;  %vm3227_vm5 = vweird.f32 %v9500_v61 }
 0x356   : > { %v5860_v33 = vpop.eup %5859  ;;  %v3226_v49 = vadd.f32 %v9544_v13, %v3225_v37  ;;  %v3705_v21 = vmul.f32 %v9549_v48, %v3704_v36  ;;  %v4183_v55 = vmul.f32 %v9595_v59, %v9536_v58  ;;  %vm9610_vm7 = vcmp.eq.f32.partialorder %v3231_v44, 8.507059e+37  ;;  %vm9616_vm10 = vmor %vm3227_vm5, %vm3228_vm4 }
 0x357   : > { %v5862_v9 = vpop.eup %5861  ;;  %v2755_v45 = vsel %vm9583_vm3, %v2754_v27, %v2750_v20  ;;  %vm3707_vm8 = vweird.f32 %v9507_v46  ;;  %v2758_v63 = vmul.f32 %v5860_v33, %v9538_v51  ;;  %v3234_v61 = vor.u32 1.1754944e-38, %v3233_v53 }
 0x358   : > { %v3714_v6 = vor.u32 1.1754944e-38, %v3713_v28  ;;  %v2766_v62 = vand.u32 2147483647, %v9538_v51  ;;  %v9621_v14 = vadd.f32 1.0, %v5856_v32  ;;  %v3230_v23 = vsel %vm9616_vm10, %v9544_v13, %v3226_v49 }
 0x359   : > { %vm9626_vm9 = vcmp.eq.f32.partialorder %v3711_v56, 8.507059e+37  ;;  %v4184_v15 = vsub.f32 1.0, %v4183_v55  ;;  %v2759_v17 = vsub.f32 1.0, %v2758_v63  ;;  %v2768_v19 = vand.u32 2147483648, %v9538_v51 }
 0x35a   : > { %v5864_v50 = vpop.eup %5863  ;;  %v4242_v12 = vmul.f32 %v2755_v45, %v9287_v40  ;;  %v3706_v35 = vadd.f32 %v9549_v48, %v3705_v21  ;;  %vm3708_vm2 = vweird.f32 %v9549_v48  ;;  %v9634_v0 = vadd.f32 1.0, %v5862_v9 }
 0x35b   : > { %vm4187_vm11 = vweird.f32 %v9536_v58  ;;  %v4191_v13 = vand.u32 2147483647, %v9536_v58  ;;  %v2760_v60 = vmul.f32 %v5860_v33, %v2759_v17  ;;  %vm2763_vm12 = vweird.f32 %v5860_v33  ;;  %vm9649_vm13 = vmor %vm3707_vm8, %vm3708_vm2 }
 0x35c   : > { %v3238_v42 = vmul.f32 %v5864_v50, %v9555_v5  ;;  %v3235_v22 = vsel %vm9610_vm7, %v3234_v61, %v3230_v23  ;;  %vm2762_vm15 = vweird.f32 %v9538_v51  ;;  %vm9642_vm6 = vcmp.eq.f32.partialorder %v2766_v62, 8.507059e+37 }
 0x35d   : > { %5865 = vrcp.f32 %v9621_v14  ;;  %v4185_v47 = vmul.f32 %v9595_v59, %v4184_v15  ;;  %v2761_v44 = vadd.f32 %v5860_v33, %v2760_v60  ;;  %v2769_v53 = vor.u32 1.1754944e-38, %v2768_v19  ;;  %vm2764_vm0 = vmor %vm2762_vm15, %vm2763_vm12 }
 0x35e   : > { %v3239_v36 = vsub.f32 1.0, %v3238_v42  ;;  %v4406_v32 = vsel %vm4341_vm14, %v4242_v12, 0.0  ;;  %v3710_v51 = vsel %vm9649_vm13, %v9549_v48, %v3706_v35  ;;  %v3246_v20 = vand.u32 2147483647, %v9555_v5 }
 0x35f   : > { %v3248_v46 = vand.u32 2147483648, %v9555_v5  ;;  %v4274_v37 = vmul.f32 %v3235_v22, %v9412_v4  ;;  %v2765_v28 = vsel %vm2764_vm0, %v5860_v33, %v2761_v44  ;;  %vm3243_vm1 = vweird.f32 %v5864_v50 }
 0x360   : > { %v3240_v27 = vmul.f32 %v5864_v50, %v3239_v36  ;;  %vm4188_vm3 = vweird.f32 %v9595_v59  ;;  %v4193_v56 = vand.u32 2147483648, %v9536_v58  ;;  %v2770_v49 = vsel %vm9642_vm6, %v2769_v53, %v2765_v28 }
 0x361   : > { %vm3242_vm4 = vweird.f32 %v9555_v5  ;;  %v4407_v48 = vadd.f32 %v4406_v32, %v9528_v38  ;;  %v4186_v21 = vadd.f32 %v9595_v59, %v4185_v47  ;;  %v4243_v55 = vmul.f32 %v2770_v49, %v9426_v57  ;;  %vm9681_vm8 = vmor %vm4187_vm11, %vm4188_vm3 }
 0x362   : > { %v3241_v9 = vadd.f32 %v5864_v50, %v3240_v27  ;;  %v3715_v33 = vsel %vm9626_vm9, %v3714_v6, %v3710_v51  ;;  %vm3244_vm5 = vmor %vm3242_vm4, %vm3243_vm1  ;;  %vm3247_vm7 = vcmp.eq.f32.partialorder %v3246_v20, 8.507059e+37  ;;  %v3249_v45 = vor.u32 1.1754944e-38, %v3248_v46 }
 0x363   : > { %v5866_v4 = vpop.eup %5865  ;;  %5867 = vrcp.f32 %v9634_v0  ;;  %v4480_v30 = vsel %vm4341_vm14, %v4274_v37, 0.0  ;;  %v4408_v5 = vsel %vm4341_vm14, %v4243_v55, 0.0  ;;  %v4337_v57 = vmul.f32 %v9599_v8, %v9249_v34 }
 0x364   : > { %v3245_v63 = vsel %vm3244_vm5, %v5864_v50, %v3241_v9  ;;  %v3718_v38 = vmul.f32 %v5866_v4, %v9621_v14  ;;  %vm9685_vm10 = vcmp.eq.f32.partialorder %v4191_v13, 8.507059e+37  ;;  %v4409_v6 = vadd.f32 %v4408_v5, %v4407_v48 }
 0x365   : > { %v3250_v62 = vsel %vm3247_vm7, %v3249_v45, %v3245_v63  ;;  %v4190_v23 = vsel %vm9681_vm8, %v9595_v59, %v4186_v21  ;;  %v4194_v10 = vor.u32 1.1754944e-38, %v4193_v56  ;;  %v4481_v58 = vadd.f32 %v4480_v30, %v9557_v16 }
 0x366   : > { %v4275_v34 = vmul.f32 %v3250_v62, %v9447_v31  ;;  %v3719_v8 = vsub.f32 1.0, %v3718_v38  ;;  %v4306_v15 = vmul.f32 %v3715_v33, %v9415_v29  ;;  %v4410_v17 = vrot.slane %v4409_v6, 4 }
 0x367   : > { %v3728_v19 = vand.u32 2147483648, %v9621_v14  ;;  %vm3723_vm9 = vweird.f32 %v5866_v4  ;;  %v3726_v35 = vand.u32 2147483647, %v9621_v14  ;;  %v4553_v59 = vadd.f32 %v9571_v18, %v9486_v54 }
 0x368   : > { %v4482_v50 = vsel %vm4341_vm14, %v4275_v34, 0.0  ;;  %v3720_v12 = vmul.f32 %v5866_v4, %v3719_v8  ;;  %v4195_v31 = vsel %vm9685_vm10, %v4194_v10, %v4190_v23  ;;  %v4411_v60 = vadd.f32 %v4410_v17, %v4409_v6 }
 0x369   : > { %v5868_v13 = vpop.eup %5867  ;;  %v4483_v16 = vadd.f32 %v4482_v50, %v4481_v58  ;;  %v4626_v29 = vsel %vm4341_vm14, %v4337_v57, 0.0  ;;  %vm3722_vm2 = vweird.f32 %v9621_v14  ;;  %v4554_v40 = vsel %vm4341_vm14, %v4306_v15, 0.0 }
 0x36a   : > { %v3721_v42 = vadd.f32 %v5866_v4, %v3720_v12  ;;  %v4198_v22 = vmul.f32 %v5868_v13, %v9634_v0  ;;  %v4412_v25 = vrot.slane %v4411_v60, 2  ;;  %vm3724_vm11 = vmor %vm3722_vm2, %vm3723_vm9  ;;  %v3729_v44 = vor.u32 1.1754944e-38, %v3728_v19 }
 0x36b   : > { %v4484_v47 = vrot.slane %v4483_v16, 4  ;;  %v4338_v54 = vmul.f32 %v4195_v31, %v9418_v11  ;;  %vm3727_vm12 = vcmp.eq.f32.partialorder %v3726_v35, 8.507059e+37  ;;  %v4208_v20 = vand.u32 2147483648, %v9634_v0 }
 0x36c   : > { %v3725_v18 = vsel %vm3724_vm11, %v5866_v4, %v3721_v42  ;;  %v4199_v53 = vsub.f32 1.0, %v4198_v22  ;;  %v4413_v36 = vadd.f32 %v4412_v25, %v4411_v60  ;;  %vm4203_vm15 = vweird.f32 %v5868_v13 }
 0x36d   : > { %v4485_v32 = vadd.f32 %v4484_v47, %v4483_v16  ;;  %v3730_v51 = vsel %vm3727_vm12, %v3729_v44, %v3725_v18  ;;  %v4206_v37 = vand.u32 2147483647, %v9634_v0  ;;  %v4555_v28 = vadd.f32 %v4554_v40, %v4553_v59 }
 0x36e   : > { %v4307_v14 = vmul.f32 %v3730_v51, %v9489_v26  ;;  %v4200_v46 = vmul.f32 %v5868_v13, %v4199_v53  ;;  %v4414_v27 = vrot.slane %v4413_v36, 1  ;;  %vm4646_vm6 = vcmask 1041409  }
 0x36f   : > { %v4486_v56 = vrot.slane %v4485_v32, 2  ;;  %vm4648_vm13 = vcmask 1042434   ;;  %vm4202_vm0 = vweird.f32 %v9634_v0  ;;  %v4209_v9 = vor.u32 1.1754944e-38, %v4208_v20 }
 0x370   : > { %v4556_v11 = vsel %vm4341_vm14, %v4307_v14, 0.0  ;;  %v4201_v49 = vadd.f32 %v5868_v13, %v4200_v46  ;;  %v4415_v48 = vadd.f32 %v4414_v27, %v4413_v36  ;;  %vm4204_vm1 = vmor %vm4202_vm0, %vm4203_vm15  ;;  %v4627_v26 = vadd.f32 %v4626_v29, %v9522_v52 }
 0x371   : > { %v4487_v21 = vadd.f32 %v4486_v56, %v4485_v32  ;;  %v4557_v55 = vadd.f32 %v4556_v11, %v4555_v28  ;;  %v4628_v4 = vsel %vm4341_vm14, %v4338_v54, 0.0  ;;  %vm4207_vm3 = vcmp.eq.f32.partialorder %v4206_v37, 8.507059e+37 }
 0x372   : > { %v4205_v33 = vsel %vm4204_vm1, %v5868_v13, %v4201_v49  ;;  %v4647_v45 = vsel %vm4646_vm6, %v4415_v48, %v8339_v3  ;;  %vm4650_vm4 = vcmask 1043459   ;;  %v4629_v57 = vadd.f32 %v4628_v4, %v4627_v26 }
 0x373   : > { %v4488_v30 = vrot.slane %v4487_v21, 1  ;;  %v4558_v5 = vrot.slane %v4557_v55, 4  ;;  %v4210_v63 = vsel %vm4207_vm3, %v4209_v9, %v4205_v33  ;;  %v4649_v38 = vsel %vm4648_vm13, %v8349_v2, %v4647_v45 }
 0x374   : > { %v4339_v0 = vmul.f32 %v4210_v63, %v9514_v41  ;;  %vm4652_vm5 = vcmask 1044484   ;;  %v4526_v52 = vadd.f32 %v4525_v7, %v8356_v39  ;;  %v4598_v3 = vadd.f32 %v4597_v1, %v8335_v43  ;;  %v4340_v1 = vld [vmem:[#allocation2] sm:$0xff] }
 0x375   : > { %v4489_v24 = vadd.f32 %v4488_v30, %v4487_v21  ;;  %v4559_v61 = vadd.f32 %v4558_v5, %v4557_v55  ;;  %vm4654_vm7 = vcmask 1045509   ;;  %vm4656_vm8 = vcmask 1046534  }
 0x376   : > { %v4630_v6 = vsel %vm4341_vm14, %v4339_v0, 0.0  ;;  %v4599_v8 = vrot.slane %v4598_v3, 1  ;;  %vm4658_vm10 = vcmask 1047559  }
 0x377   : > { %v4651_v62 = vsel %vm4650_vm4, %v4489_v24, %v4649_v38  ;;  %v4560_v23 = vrot.slane %v4559_v61, 2  ;;  %v4631_v2 = vadd.f32 %v4630_v6, %v4629_v57 }
 0x378   : > { %v4653_v10 = vsel %vm4652_vm5, %v4526_v52, %v4651_v62  ;;  %v4600_v39 = vadd.f32 %v4599_v8, %v4598_v3 }
 0x379   : > { %v4561_v34 = vadd.f32 %v4560_v23, %v4559_v61  ;;  %v4632_v41 = vrot.slane %v4631_v2, 4 }
 0x37b   : > { %v4562_v58 = vrot.slane %v4561_v34, 1  ;;  %v4633_v15 = vadd.f32 %v4632_v41, %v4631_v2 }
 0x37d   : > { %v4563_v17 = vadd.f32 %v4562_v58, %v4561_v34  ;;  %v4634_v19 = vrot.slane %v4633_v15, 2 }
 0x37f   : > { %v4655_v7 = vsel %vm4654_vm7, %v4563_v17, %v4653_v10  ;;  %v4635_v50 = vadd.f32 %v4634_v19, %v4633_v15 }
 0x380   : > { %v4657_v12 = vsel %vm4656_vm8, %v4600_v39, %v4655_v7 }
 0x381   : > { %v4636_v43 = vrot.slane %v4635_v50, 1 }
 0x383   : > { %v4637_v35 = vadd.f32 %v4636_v43, %v4635_v50 }
 0x384   : > { %4666 = sbr.rel (%p5232_p10) target bundleno = 1050 (0x41a), region = 89 }
 0x385   : > { %v4659_v13 = vsel %vm4658_vm10, %v4637_v35, %v4657_v12 }
 0x386   : > { %v4661_v59 = vadd.f32 %v4659_v13, %v4340_v1 }
 0x388   : > { %4662 = vst.msk [vmem:[#allocation2] sm:$0xff] %vm4341_vm14, %v4661_v59 }
 0x389   : > { %v5311_v31 = vld [vmem:[%s9758_s3 + $0x8] sm:$0xff]  ;;  %v5310_v29 = vld [vmem:[%s9758_s3] sm:$0xff] }
 0x38a   : > { %4699 = vmatpush.bf16.msra.mxu0 %v5311_v31  ;;  %v5874_v22 = vld [vmem:[%s9759_s4] ss:$0 sm:$0xff] }
 0x38e   : > { %4700 = vmatpush.bf16.msra.mxu0 %v5310_v29 }
 0x38f   : > { %v4667_v60 = vld [vmem:[#allocation2] sm:$0xff] }
 0x390   : > { %v4668_v16 = vmul.f32 0.00390625, %v4667_v60 }
 0x392   : > { %v4669_v42 = vpack.c.bf16 %v4668_v16, %v4668_v16 }
 0x394   : > { %5241 = vmatmul.msk.bf16.vlgmr.msra.gmra.mxu0 %vm4341_vm14, %v4669_v42 }
 0x411   : > { %v4702_v40 = vpop.f32.mrf.mxu0 }
 0x412   : > { %v4703_v25 = vadd.f32 %v5874_v22, %v4702_v40 }
 0x414   : > { %4706 = vst [vmem:[%s9760_s5] sm:$0xff] %v4703_v25 }
 0x419   : > { %v4704_v47 = vpop.f32.mrf.mxu0 }
 0x41a PF: > { %s15_s22 = sadd.s32 1, %s5913_s22   ;;  %s10037_s18 = smov %s5901_s19 }
 0x41b   : > { %p12_p11 = scmp.ge.s32.totalorder %s15_s22, 4   ;;  %s10038_s19 = smov %s5981_s26 }
 0x41c   : > { %s10039_s20 = smov %s5909_s21  ;;  %s10040_s21 = smov %s10042_s23 }
 0x41d   :  { %14 = sbr.rel (!%p12_p11) target bundleno = 3 (0x3), region = 124 }

</bundles_post_ra>
